<compile_context>
chip_gen: v5e
topology: v5e:2x2
jax: 0.10.0
libtpu: 0.0.40
codegen_flags: <defaults>
</compile_context>

<pallas_src>
import math
from functools import partial

import jax
import jax.numpy as jnp
from jax import lax
from jax.experimental import pallas as pl
from jax.experimental.pallas import tpu as pltpu


# ----------------------------------------------------------------------------
# Pallas kernel: one grid step == W_BLK windows (a (R, C) token slab, R = W_BLK*N).
# ----------------------------------------------------------------------------
def window_attention_kernel(x_ref, wqkv_ref, bqkv_ref, bias_ref, wproj_ref, bproj_ref,
                            o_ref, qkv_ref, ctx_ref, *, num_heads, w_blk, n_tok, n_pat):
    R, C = x_ref.shape
    d = C // num_heads

    # Fused qkv projection for the whole slab: one (R, C) @ (C, 3C) MXU matmul.
    # The q columns of wqkv/bqkv already carry the 1/sqrt(d) scale (folded host-side).
    qkv = jnp.dot(x_ref[...], wqkv_ref[...], preferred_element_type=jnp.float32)
    qkv = qkv + bqkv_ref[...]
    # Stage to bf16 VMEM immediately: halves the live footprint and bounds vreg pressure
    # across the head loop (important for real Swin shapes, R=256 x 3C=2304).
    qkv_ref[...] = qkv.astype(jnp.bfloat16)

    # Which precomputed per-window bias pattern this grid step uses.
    pat = pl.program_id(0) % n_pat if n_pat > 1 else 0

    # Small static head loop (H = 4 here).  For H = 24 switch to lax.fori_loop with a
    # small unroll factor so live ranges stay bounded.
    for h in range(num_heads):
        qh = qkv_ref[:, h * d:(h + 1) * d].reshape(w_blk, n_tok, d)
        kh = qkv_ref[:, C + h * d:C + (h + 1) * d].reshape(w_blk, n_tok, d)
        vh = qkv_ref[:, 2 * C + h * d:2 * C + (h + 1) * d].reshape(w_blk, n_tok, d)

        # Batched per-window attention: no (R, R) block-diagonal waste, no cross-window
        # positions, hence no -1e9 blocker and no oversized bias DMA.
        s = jnp.einsum("bnd,bmd->bnm", qh, kh,
                       preferred_element_type=jnp.float32)          # (W_BLK, N, N) f32
        s = s + bias_ref[pat, h]                                     # rel-pos bias + shift mask

        # Numerically stable softmax in f32 (v5e has no bf16 VPU/EUP); exact divide --
        # it is not on the MXU critical path.
        s = s - jnp.max(s, axis=-1, keepdims=True)
        p = jnp.exp(s)
        p = p / jnp.sum(p, axis=-1, keepdims=True)

        ctx = jnp.einsum("bnm,bmd->bnd", p.astype(jnp.bfloat16), vh,
                         preferred_element_type=jnp.float32)         # (W_BLK, N, d)
        # Lane-offset write: this head's output lands at columns [h*d, (h+1)*d) of the
        # projection input, replacing H under-filled K=d matmuls with one K=C matmul.
        ctx_ref[:, h * d:(h + 1) * d] = ctx.reshape(R, d).astype(jnp.bfloat16)

    out = jnp.dot(ctx_ref[...], wproj_ref[...], preferred_element_type=jnp.float32)
    out = out + bproj_ref[...]
    # bf16 store halves output HBM traffic (C < 128 lanes => store-slot limited).
    o_ref[...] = out.astype(o_ref.dtype)


# ----------------------------------------------------------------------------
# Host-side glue
# ----------------------------------------------------------------------------
def make_relative_position_index(window_size):
    Wh, Ww = window_size
    coords = jnp.stack(jnp.meshgrid(jnp.arange(Wh), jnp.arange(Ww), indexing="ij"))
    coords_flatten = coords.reshape(2, -1)                                # (2, N)
    rel = coords_flatten[:, :, None] - coords_flatten[:, None, :]         # (2, N, N)
    rel = rel.transpose(1, 2, 0)                                          # (N, N, 2)
    r0 = (rel[..., 0] + Wh - 1) * (2 * Ww - 1)
    r1 = rel[..., 1] + Ww - 1
    return r0 + r1                                                        # (N, N)


def _pick_window_block(B_, nW, N, target_rows=128, min_blocks=2):
    """Largest divisor of B_ such that:
       * the slab has <= target_rows rows (generation-aware: 128 unless C is large),
       * there are at least `min_blocks` grid steps (pipelining + v7x megacore),
         preferring an even number of steps,
       * W_BLK and nW divide one another (bounded bias-pattern count),
       * the slab row count is sublane (8) aligned."""
    valid = []
    for wb in range(1, B_ + 1):
        if B_ % wb:
            continue
        n_blocks = B_ // wb
        if wb * N > target_rows and wb != 1:
            continue
        if n_blocks < min(min_blocks, B_):
            continue
        if not (nW % wb == 0 or wb % nW == 0):
            continue
        if (wb * N) % 8 != 0:
            continue
        valid.append(wb)
    if not valid:
        return 1
    even = [wb for wb in valid if (B_ // wb) % 2 == 0]
    pool = even if even else valid
    return max(pool)


def window_attention(x, act_scaling_factor, params, mask, *, num_heads, window_size):
    B_, N, C = x.shape
    d = C // num_heads
    scale = d ** (-0.5)
    orig_dtype = x.dtype

    # ---- fold constants / prep layouts (plain-JAX glue, traced once) ----
    # Fold 1/sqrt(d) into the q columns of the qkv projection (exact rewrite).
    w_qkv = params["w_qkv"].at[:, :C].multiply(scale).astype(jnp.bfloat16)
    b_qkv = params["b_qkv"].at[:, :C].multiply(scale).astype(jnp.float32)
    w_proj = params["w_proj"].astype(jnp.bfloat16)
    b_proj = params["b_proj"].astype(jnp.float32)

    # Relative position bias -> (H, N, N).
    rel_idx = make_relative_position_index(window_size).reshape(-1)
    rel_bias = params["rel_table"][rel_idx].reshape(N, N, num_heads)
    rel_bias = jnp.transpose(rel_bias, (2, 0, 1)).astype(jnp.float32)

    if mask is None:
        mask = jnp.zeros((1, N, N), dtype=jnp.float32)
    mask = mask.astype(jnp.float32)
    nW = mask.shape[0]

    # Generation-aware slab size: R = 128 unless C is large enough that the qkv/proj
    # matmuls dominate (v6e/v7x 256-wide MXU); v5e should always stay at 128.
    target_rows = 256 if C >= 256 else 128
    W_BLK = _pick_window_block(B_, nW, N, target_rows=target_rows, min_blocks=2)
    R = W_BLK * N
    n_blocks = B_ // W_BLK
    P = math.lcm(W_BLK, nW) // W_BLK   # distinct (step -> per-window mask) patterns

    # Per-pattern, per-window additive bias (rel-pos + shift mask): (P, H, W_BLK, N, N).
    # This is O(max(nW, W_BLK) * H * N^2), NOT O((R/N)^2 * H * N^2) like a dense
    # block-diagonal bias; it stays resident in VMEM for the whole grid.
    pats = []
    for p in range(P):
        per_w = [rel_bias + mask[(p * W_BLK + w) % nW][None] for w in range(W_BLK)]
        pats.append(jnp.stack(per_w, axis=1))          # (H, W_BLK, N, N)
    bias_pat = jnp.stack(pats, axis=0)                  # (P, H, W_BLK, N, N)

    x2 = x.reshape(B_ * N, C).astype(jnp.bfloat16)

    kernel = partial(window_attention_kernel, num_heads=num_heads,
                     w_blk=W_BLK, n_tok=N, n_pat=P)

    def build(single_buffer_consts):
        def const_spec(shape):
            zero_map = lambda i: (0,) * len(shape)
            if single_buffer_consts:
                # Grid-invariant operand: one VMEM buffer is enough (saves dead VMEM,
                # matters on v7x's 64 MiB for real Swin weight sizes).
                return pl.BlockSpec(shape, zero_map, pipeline_mode=pl.Buffered(1))
            return pl.BlockSpec(shape, zero_map)

        return pl.pallas_call(
            kernel,
            out_shape=jax.ShapeDtypeStruct((B_ * N, C), jnp.bfloat16),
            grid_spec=pltpu.PrefetchScalarGridSpec(
                num_scalar_prefetch=0,
                grid=(n_blocks,),
                in_specs=[
                    pl.BlockSpec((R, C), lambda i: (i, 0)),          # x slab (pipelined)
                    const_spec((C, 3 * C)),                          # W_qkv (bf16, scaled q)
                    const_spec((1, 3 * C)),                          # b_qkv
                    const_spec((P, num_heads, W_BLK, N, N)),         # per-window bias
                    const_spec((C, C)),                              # W_proj (bf16)
                    const_spec((1, C)),                              # b_proj
                ],
                out_specs=pl.BlockSpec((R, C), lambda i: (i, 0)),
                scratch_shapes=[
                    pltpu.VMEM((R, 3 * C), jnp.bfloat16),            # staged qkv
                    pltpu.VMEM((R, C), jnp.bfloat16),                # gathered head ctx
                ],
            ),
            compiler_params=pltpu.CompilerParams(
                dimension_semantics=("parallel",),
                vmem_limit_bytes=64 * 1024 * 1024,
            ),
        )

    args = (x2, w_qkv, b_qkv, bias_pat, w_proj, b_proj)
    use_single_buffer = hasattr(pl, "Buffered")
    try:
        out2 = build(use_single_buffer)(*args)
        out2 = jax.block_until_ready(out2)
    except Exception:
        # Fallback for JAX builds where pipeline_mode=Buffered(1) is not accepted.
        out2 = build(False)(*args)

    out = out2.reshape(B_, N, C).astype(orig_dtype)
    # QuantAct scale bookkeeping is identity in the FP-equivalent path.
    return out, act_scaling_factor


# ----------------------------------------------------------------------------
# Pure-JAX f32 reference (mirrors the PyTorch forward) for correctness checking
# ----------------------------------------------------------------------------
def reference(x, params, mask, *, num_heads, window_size):
    B_, N, C = x.shape
    d = C // num_heads
    scale = d ** (-0.5)

    qkv = x @ params["w_qkv"] + params["b_qkv"][0]
    qkv = qkv.reshape(B_, N, 3, num_heads, d).transpose(2, 0, 3, 1, 4)
    q, k, v = qkv[0], qkv[1], qkv[2]                                     # (B_, H, N, d)

    attn = jnp.einsum("bhnd,bhmd->bhnm", q, k) * scale

    rel_idx = make_relative_position_index(window_size).reshape(-1)
    rel_bias = params["rel_table"][rel_idx].reshape(N, N, num_heads)
    rel_bias = jnp.transpose(rel_bias, (2, 0, 1))                        # (H, N, N)
    attn = attn + rel_bias[None]

    nW = mask.shape[0]
    attn = attn.reshape(B_ // nW, nW, num_heads, N, N) + mask[None, :, None]
    attn = attn.reshape(B_, num_heads, N, N)

    attn = jax.nn.softmax(attn, axis=-1)
    out = jnp.einsum("bhnm,bhmd->bhnd", attn, v)
    out = out.transpose(0, 2, 1, 3).reshape(B_, N, C)
    out = out @ params["w_proj"] + params["b_proj"][0]
    return out


# ----------------------------------------------------------------------------
# Main
# ----------------------------------------------------------------------------
if __name__ == "__main__":
    # Small, module-consistent shapes.
    dim = 32
    num_heads = 4
    window_size = (4, 4)
    Wh, Ww = window_size
    N = Wh * Ww          # 16 tokens per window
    nW = 4               # number of windows per image
    B = 2                # batch
    B_ = B * nW          # 8

    key = jax.random.PRNGKey(0)
    k_x, k_wqkv, k_bqkv, k_wproj, k_bproj, k_tab, k_mask = jax.random.split(key, 7)

    params = {
        "w_qkv": (jax.random.normal(k_wqkv, (dim, 3 * dim), jnp.float32) * 0.05),
        "b_qkv": (jax.random.normal(k_bqkv, (1, 3 * dim), jnp.float32) * 0.01),
        "w_proj": (jax.random.normal(k_wproj, (dim, dim), jnp.float32) * 0.05),
        "b_proj": (jax.random.normal(k_bproj, (1, dim), jnp.float32) * 0.01),
        # trunc_normal_(std=0.02) analogue, deterministic
        "rel_table": (jax.random.normal(
            k_tab, ((2 * Wh - 1) * (2 * Ww - 1), num_heads), jnp.float32) * 0.02),
    }

    x = jax.random.normal(k_x, (B_, N, dim), jnp.float32)
    act_scaling_factor = jnp.float32(1.0)

    # deterministic 0 / -100 shifted-window style additive mask: (nW, N, N)
    mask_pattern = (jax.random.uniform(k_mask, (nW, N, N)) > 0.7).astype(jnp.float32)
    mask_pattern = mask_pattern * jnp.transpose(mask_pattern, (0, 2, 1))  # symmetric
    mask = jnp.where(mask_pattern > 0, -100.0, 0.0).astype(jnp.float32)
    mask = mask.at[:, jnp.arange(N), jnp.arange(N)].set(0.0)              # keep diagonal

    out, out_scale = window_attention(
        x, act_scaling_factor, params, mask,
        num_heads=num_heads, window_size=window_size)
    out = jax.block_until_ready(out)

    ref = reference(x, params, mask, num_heads=num_heads, window_size=window_size)
    assert out.shape == (B_, N, dim)
    # bf16 MXU operands + bf16 output store -> compare against the f32 reference with a
    # bf16-appropriate tolerance.
    max_err = jnp.max(jnp.abs(out - ref))
    assert jnp.allclose(out, ref, rtol=2e-2, atol=2e-2), f"max abs err {max_err}"

    print("KERNEL_OK")
</pallas_src>

<mosaic_0001>
module attributes {stable_mosaic.version = 11 : i64} {
  func.func @window_attention_kernel(%arg0: i32, %arg1: memref<64x32xbf16, #tpu.memory_space<vmem>>, %arg2: memref<32x96xbf16, #tpu.memory_space<vmem>>, %arg3: memref<1x96xf32, #tpu.memory_space<vmem>>, %arg4: memref<1x4x4x16x16xf32, #tpu.memory_space<vmem>>, %arg5: memref<32x32xbf16, #tpu.memory_space<vmem>>, %arg6: memref<1x32xf32, #tpu.memory_space<vmem>>, %arg7: memref<64x32xbf16, #tpu.memory_space<vmem>>, %arg8: memref<64x96xbf16, #tpu.memory_space<vmem>>, %arg9: memref<64x32xbf16, #tpu.memory_space<vmem>>) attributes {dimension_semantics = [#tpu.dimension_semantics<parallel>], iteration_bounds = array<i64: 2>, scalar_prefetch = 0 : i64, scratch_operands = 2 : i64, tpu.core_type = #tpu.core_type<tc>, window_params = [{transform_indices = @transform_0, window_bounds = array<i64: 64, 32>}, {pipeline_mode = #tpu.pipeline_mode<synchronous>, transform_indices = @transform_1, window_bounds = array<i64: 32, 96>}, {pipeline_mode = #tpu.pipeline_mode<synchronous>, transform_indices = @transform_2, window_bounds = array<i64: 1, 96>}, {pipeline_mode = #tpu.pipeline_mode<synchronous>, transform_indices = @transform_3, window_bounds = array<i64: 1, 4, 4, 16, 16>}, {pipeline_mode = #tpu.pipeline_mode<synchronous>, transform_indices = @transform_4, window_bounds = array<i64: 32, 32>}, {pipeline_mode = #tpu.pipeline_mode<synchronous>, transform_indices = @transform_5, window_bounds = array<i64: 1, 32>}, {transform_indices = @transform_6, window_bounds = array<i64: 64, 32>}]} {
    %c0 = arith.constant 0 : index
    %c0_0 = arith.constant 0 : index
    %0 = vector.load %arg1[%c0, %c0_0] : memref<64x32xbf16, #tpu.memory_space<vmem>>, vector<64x32xbf16>
    %c0_1 = arith.constant 0 : index
    %c0_2 = arith.constant 0 : index
    %1 = vector.load %arg2[%c0_1, %c0_2] : memref<32x96xbf16, #tpu.memory_space<vmem>>, vector<32x96xbf16>
    %cst = arith.constant dense<0.000000e+00> : vector<64x96xf32>
    %2 = tpu.matmul %0, %1, %cst {dimension_numbers = #tpu.dot_dimension_numbers<[1], [0], [0], [1], [0, 0, 1, 1], [], []>} : vector<64x32xbf16>, vector<32x96xbf16>, vector<64x96xf32> -> vector<64x96xf32>
    %c0_3 = arith.constant 0 : index
    %c0_4 = arith.constant 0 : index
    %3 = vector.load %arg3[%c0_3, %c0_4] : memref<1x96xf32, #tpu.memory_space<vmem>>, vector<1x96xf32>
    %4 = vector.broadcast %3 : vector<1x96xf32> to vector<64x96xf32>
    %5 = arith.addf %2, %4 : vector<64x96xf32>
    %6 = arith.truncf %5 : vector<64x96xf32> to vector<64x96xbf16>
    %c0_5 = arith.constant 0 : index
    %c0_6 = arith.constant 0 : index
    %7 = vector.load %arg8[%c0_5, %c0_6] : memref<64x96xbf16, #tpu.memory_space<vmem>>, vector<64x96xbf16>
    tpu.vector_store %arg8[%c0_5, %c0_6], %6 {strides = array<i32>} : memref<64x96xbf16, #tpu.memory_space<vmem>>, vector<64x96xbf16>,
    %c0_7 = arith.constant 0 : index
    %c0_8 = arith.constant 0 : index
    %8 = vector.load %arg8[%c0_7, %c0_8] : memref<64x96xbf16, #tpu.memory_space<vmem>>, vector<64x8xbf16>
    %9 = vector.shape_cast %8 : vector<64x8xbf16> to vector<4x16x8xbf16>
    %c0_9 = arith.constant 0 : index
    %c32 = arith.constant 32 : index
    %10 = vector.load %arg8[%c0_9, %c32] : memref<64x96xbf16, #tpu.memory_space<vmem>>, vector<64x8xbf16>
    %11 = vector.shape_cast %10 : vector<64x8xbf16> to vector<4x16x8xbf16>
    %c0_10 = arith.constant 0 : index
    %c64 = arith.constant 64 : index
    %12 = vector.load %arg8[%c0_10, %c64] : memref<64x96xbf16, #tpu.memory_space<vmem>>, vector<64x8xbf16>
    %13 = vector.shape_cast %12 : vector<64x8xbf16> to vector<4x16x8xbf16>
    "tpu.trace_start"() <{level = 10 : i32, message = "bnd,bmd->bnm"}> : () -> ()
    %cst_11 = arith.constant dense<0.000000e+00> : vector<4x16x16xf32>
    %14 = tpu.matmul %9, %11, %cst_11 {dimension_numbers = #tpu.dot_dimension_numbers<[2], [2], [1], [1], [0, 0, 0, 1, 1, 1], [0], [0]>} : vector<4x16x8xbf16>, vector<4x16x8xbf16>, vector<4x16x16xf32> -> vector<4x16x16xf32>
    "tpu.trace_stop"() : () -> ()
    %c0_12 = arith.constant 0 : index
    %c0_13 = arith.constant 0 : index
    %c0_14 = arith.constant 0 : index
    %c0_15 = arith.constant 0 : index
    %c0_16 = arith.constant 0 : index
    %15 = vector.load %arg4[%c0_12, %c0_13, %c0_14, %c0_15, %c0_16] : memref<1x4x4x16x16xf32, #tpu.memory_space<vmem>>, vector<1x1x4x16x16xf32>
    %16 = vector.shape_cast %15 : vector<1x1x4x16x16xf32> to vector<4x16x16xf32>
    %17 = arith.addf %14, %16 : vector<4x16x16xf32>
    %cst_17 = arith.constant dense<0xFF800000> : vector<4x16xf32>
    %18 = vector.multi_reduction <maximumf>, %17, %cst_17 [2] : vector<4x16x16xf32> to vector<4x16xf32>
    %19 = vector.shape_cast %18 : vector<4x16xf32> to vector<4x16x1xf32>
    %20 = vector.broadcast %19 : vector<4x16x1xf32> to vector<4x16x16xf32>
    %21 = arith.subf %17, %20 : vector<4x16x16xf32>
    %22 = math.exp %21 : vector<4x16x16xf32>
    %cst_18 = arith.constant dense<0.000000e+00> : vector<4x16xf32>
    %23 = vector.multi_reduction <add>, %22, %cst_18 [2] : vector<4x16x16xf32> to vector<4x16xf32>
    %24 = vector.shape_cast %23 : vector<4x16xf32> to vector<4x16x1xf32>
    %25 = vector.broadcast %24 : vector<4x16x1xf32> to vector<4x16x16xf32>
    %26 = arith.divf %22, %25 : vector<4x16x16xf32>
    %27 = arith.truncf %26 : vector<4x16x16xf32> to vector<4x16x16xbf16>
    "tpu.trace_start"() <{level = 10 : i32, message = "bnm,bmd->bnd"}> : () -> ()
    %cst_19 = arith.constant dense<0.000000e+00> : vector<4x16x8xf32>
    %28 = tpu.matmul %27, %13, %cst_19 {dimension_numbers = #tpu.dot_dimension_numbers<[2], [1], [1], [2], [0, 0, 0, 1, 1, 2], [0], [0]>} : vector<4x16x16xbf16>, vector<4x16x8xbf16>, vector<4x16x8xf32> -> vector<4x16x8xf32>
    "tpu.trace_stop"() : () -> ()
    %29 = vector.shape_cast %28 : vector<4x16x8xf32> to vector<64x8xf32>
    %30 = arith.truncf %29 : vector<64x8xf32> to vector<64x8xbf16>
    %c0_20 = arith.constant 0 : index
    %c0_21 = arith.constant 0 : index
    %31 = vector.load %arg9[%c0_20, %c0_21] : memref<64x32xbf16, #tpu.memory_space<vmem>>, vector<64x8xbf16>
    tpu.vector_store %arg9[%c0_20, %c0_21], %30 {strides = array<i32>} : memref<64x32xbf16, #tpu.memory_space<vmem>>, vector<64x8xbf16>,
    %c0_22 = arith.constant 0 : index
    %c8 = arith.constant 8 : index
    %32 = vector.load %arg8[%c0_22, %c8] : memref<64x96xbf16, #tpu.memory_space<vmem>>, vector<64x8xbf16>
    %33 = vector.shape_cast %32 : vector<64x8xbf16> to vector<4x16x8xbf16>
    %c0_23 = arith.constant 0 : index
    %c40 = arith.constant 40 : index
    %34 = vector.load %arg8[%c0_23, %c40] : memref<64x96xbf16, #tpu.memory_space<vmem>>, vector<64x8xbf16>
    %35 = vector.shape_cast %34 : vector<64x8xbf16> to vector<4x16x8xbf16>
    %c0_24 = arith.constant 0 : index
    %c72 = arith.constant 72 : index
    %36 = vector.load %arg8[%c0_24, %c72] : memref<64x96xbf16, #tpu.memory_space<vmem>>, vector<64x8xbf16>
    %37 = vector.shape_cast %36 : vector<64x8xbf16> to vector<4x16x8xbf16>
    "tpu.trace_start"() <{level = 10 : i32, message = "bnd,bmd->bnm"}> : () -> ()
    %cst_25 = arith.constant dense<0.000000e+00> : vector<4x16x16xf32>
    %38 = tpu.matmul %33, %35, %cst_25 {dimension_numbers = #tpu.dot_dimension_numbers<[2], [2], [1], [1], [0, 0, 0, 1, 1, 1], [0], [0]>} : vector<4x16x8xbf16>, vector<4x16x8xbf16>, vector<4x16x16xf32> -> vector<4x16x16xf32>
    "tpu.trace_stop"() : () -> ()
    %c0_26 = arith.constant 0 : index
    %c1 = arith.constant 1 : index
    %c0_27 = arith.constant 0 : index
    %c0_28 = arith.constant 0 : index
    %c0_29 = arith.constant 0 : index
    %39 = vector.load %arg4[%c0_26, %c1, %c0_27, %c0_28, %c0_29] : memref<1x4x4x16x16xf32, #tpu.memory_space<vmem>>, vector<1x1x4x16x16xf32>
    %40 = vector.shape_cast %39 : vector<1x1x4x16x16xf32> to vector<4x16x16xf32>
    %41 = arith.addf %38, %40 : vector<4x16x16xf32>
    %cst_30 = arith.constant dense<0xFF800000> : vector<4x16xf32>
    %42 = vector.multi_reduction <maximumf>, %41, %cst_30 [2] : vector<4x16x16xf32> to vector<4x16xf32>
    %43 = vector.shape_cast %42 : vector<4x16xf32> to vector<4x16x1xf32>
    %44 = vector.broadcast %43 : vector<4x16x1xf32> to vector<4x16x16xf32>
    %45 = arith.subf %41, %44 : vector<4x16x16xf32>
    %46 = math.exp %45 : vector<4x16x16xf32>
    %cst_31 = arith.constant dense<0.000000e+00> : vector<4x16xf32>
    %47 = vector.multi_reduction <add>, %46, %cst_31 [2] : vector<4x16x16xf32> to vector<4x16xf32>
    %48 = vector.shape_cast %47 : vector<4x16xf32> to vector<4x16x1xf32>
    %49 = vector.broadcast %48 : vector<4x16x1xf32> to vector<4x16x16xf32>
    %50 = arith.divf %46, %49 : vector<4x16x16xf32>
    %51 = arith.truncf %50 : vector<4x16x16xf32> to vector<4x16x16xbf16>
    "tpu.trace_start"() <{level = 10 : i32, message = "bnm,bmd->bnd"}> : () -> ()
    %cst_32 = arith.constant dense<0.000000e+00> : vector<4x16x8xf32>
    %52 = tpu.matmul %51, %37, %cst_32 {dimension_numbers = #tpu.dot_dimension_numbers<[2], [1], [1], [2], [0, 0, 0, 1, 1, 2], [0], [0]>} : vector<4x16x16xbf16>, vector<4x16x8xbf16>, vector<4x16x8xf32> -> vector<4x16x8xf32>
    "tpu.trace_stop"() : () -> ()
    %53 = vector.shape_cast %52 : vector<4x16x8xf32> to vector<64x8xf32>
    %54 = arith.truncf %53 : vector<64x8xf32> to vector<64x8xbf16>
    %c0_33 = arith.constant 0 : index
    %c8_34 = arith.constant 8 : index
    %55 = vector.load %arg9[%c0_33, %c8_34] : memref<64x32xbf16, #tpu.memory_space<vmem>>, vector<64x8xbf16>
    tpu.vector_store %arg9[%c0_33, %c8_34], %54 {strides = array<i32>} : memref<64x32xbf16, #tpu.memory_space<vmem>>, vector<64x8xbf16>,
    %c0_35 = arith.constant 0 : index
    %c16 = arith.constant 16 : index
    %56 = vector.load %arg8[%c0_35, %c16] : memref<64x96xbf16, #tpu.memory_space<vmem>>, vector<64x8xbf16>
    %57 = vector.shape_cast %56 : vector<64x8xbf16> to vector<4x16x8xbf16>
    %c0_36 = arith.constant 0 : index
    %c48 = arith.constant 48 : index
    %58 = vector.load %arg8[%c0_36, %c48] : memref<64x96xbf16, #tpu.memory_space<vmem>>, vector<64x8xbf16>
    %59 = vector.shape_cast %58 : vector<64x8xbf16> to vector<4x16x8xbf16>
    %c0_37 = arith.constant 0 : index
    %c80 = arith.constant 80 : index
    %60 = vector.load %arg8[%c0_37, %c80] : memref<64x96xbf16, #tpu.memory_space<vmem>>, vector<64x8xbf16>
    %61 = vector.shape_cast %60 : vector<64x8xbf16> to vector<4x16x8xbf16>
    "tpu.trace_start"() <{level = 10 : i32, message = "bnd,bmd->bnm"}> : () -> ()
    %cst_38 = arith.constant dense<0.000000e+00> : vector<4x16x16xf32>
    %62 = tpu.matmul %57, %59, %cst_38 {dimension_numbers = #tpu.dot_dimension_numbers<[2], [2], [1], [1], [0, 0, 0, 1, 1, 1], [0], [0]>} : vector<4x16x8xbf16>, vector<4x16x8xbf16>, vector<4x16x16xf32> -> vector<4x16x16xf32>
    "tpu.trace_stop"() : () -> ()
    %c0_39 = arith.constant 0 : index
    %c2 = arith.constant 2 : index
    %c0_40 = arith.constant 0 : index
    %c0_41 = arith.constant 0 : index
    %c0_42 = arith.constant 0 : index
    %63 = vector.load %arg4[%c0_39, %c2, %c0_40, %c0_41, %c0_42] : memref<1x4x4x16x16xf32, #tpu.memory_space<vmem>>, vector<1x1x4x16x16xf32>
    %64 = vector.shape_cast %63 : vector<1x1x4x16x16xf32> to vector<4x16x16xf32>
    %65 = arith.addf %62, %64 : vector<4x16x16xf32>
    %cst_43 = arith.constant dense<0xFF800000> : vector<4x16xf32>
    %66 = vector.multi_reduction <maximumf>, %65, %cst_43 [2] : vector<4x16x16xf32> to vector<4x16xf32>
    %67 = vector.shape_cast %66 : vector<4x16xf32> to vector<4x16x1xf32>
    %68 = vector.broadcast %67 : vector<4x16x1xf32> to vector<4x16x16xf32>
    %69 = arith.subf %65, %68 : vector<4x16x16xf32>
    %70 = math.exp %69 : vector<4x16x16xf32>
    %cst_44 = arith.constant dense<0.000000e+00> : vector<4x16xf32>
    %71 = vector.multi_reduction <add>, %70, %cst_44 [2] : vector<4x16x16xf32> to vector<4x16xf32>
    %72 = vector.shape_cast %71 : vector<4x16xf32> to vector<4x16x1xf32>
    %73 = vector.broadcast %72 : vector<4x16x1xf32> to vector<4x16x16xf32>
    %74 = arith.divf %70, %73 : vector<4x16x16xf32>
    %75 = arith.truncf %74 : vector<4x16x16xf32> to vector<4x16x16xbf16>
    "tpu.trace_start"() <{level = 10 : i32, message = "bnm,bmd->bnd"}> : () -> ()
    %cst_45 = arith.constant dense<0.000000e+00> : vector<4x16x8xf32>
    %76 = tpu.matmul %75, %61, %cst_45 {dimension_numbers = #tpu.dot_dimension_numbers<[2], [1], [1], [2], [0, 0, 0, 1, 1, 2], [0], [0]>} : vector<4x16x16xbf16>, vector<4x16x8xbf16>, vector<4x16x8xf32> -> vector<4x16x8xf32>
    "tpu.trace_stop"() : () -> ()
    %77 = vector.shape_cast %76 : vector<4x16x8xf32> to vector<64x8xf32>
    %78 = arith.truncf %77 : vector<64x8xf32> to vector<64x8xbf16>
    %c0_46 = arith.constant 0 : index
    %c16_47 = arith.constant 16 : index
    %79 = vector.load %arg9[%c0_46, %c16_47] : memref<64x32xbf16, #tpu.memory_space<vmem>>, vector<64x8xbf16>
    tpu.vector_store %arg9[%c0_46, %c16_47], %78 {strides = array<i32>} : memref<64x32xbf16, #tpu.memory_space<vmem>>, vector<64x8xbf16>,
    %c0_48 = arith.constant 0 : index
    %c24 = arith.constant 24 : index
    %80 = vector.load %arg8[%c0_48, %c24] : memref<64x96xbf16, #tpu.memory_space<vmem>>, vector<64x8xbf16>
    %81 = vector.shape_cast %80 : vector<64x8xbf16> to vector<4x16x8xbf16>
    %c0_49 = arith.constant 0 : index
    %c56 = arith.constant 56 : index
    %82 = vector.load %arg8[%c0_49, %c56] : memref<64x96xbf16, #tpu.memory_space<vmem>>, vector<64x8xbf16>
    %83 = vector.shape_cast %82 : vector<64x8xbf16> to vector<4x16x8xbf16>
    %c0_50 = arith.constant 0 : index
    %c88 = arith.constant 88 : index
    %84 = vector.load %arg8[%c0_50, %c88] : memref<64x96xbf16, #tpu.memory_space<vmem>>, vector<64x8xbf16>
    %85 = vector.shape_cast %84 : vector<64x8xbf16> to vector<4x16x8xbf16>
    "tpu.trace_start"() <{level = 10 : i32, message = "bnd,bmd->bnm"}> : () -> ()
    %cst_51 = arith.constant dense<0.000000e+00> : vector<4x16x16xf32>
    %86 = tpu.matmul %81, %83, %cst_51 {dimension_numbers = #tpu.dot_dimension_numbers<[2], [2], [1], [1], [0, 0, 0, 1, 1, 1], [0], [0]>} : vector<4x16x8xbf16>, vector<4x16x8xbf16>, vector<4x16x16xf32> -> vector<4x16x16xf32>
    "tpu.trace_stop"() : () -> ()
    %c0_52 = arith.constant 0 : index
    %c3 = arith.constant 3 : index
    %c0_53 = arith.constant 0 : index
    %c0_54 = arith.constant 0 : index
    %c0_55 = arith.constant 0 : index
    %87 = vector.load %arg4[%c0_52, %c3, %c0_53, %c0_54, %c0_55] : memref<1x4x4x16x16xf32, #tpu.memory_space<vmem>>, vector<1x1x4x16x16xf32>
    %88 = vector.shape_cast %87 : vector<1x1x4x16x16xf32> to vector<4x16x16xf32>
    %89 = arith.addf %86, %88 : vector<4x16x16xf32>
    %cst_56 = arith.constant dense<0xFF800000> : vector<4x16xf32>
    %90 = vector.multi_reduction <maximumf>, %89, %cst_56 [2] : vector<4x16x16xf32> to vector<4x16xf32>
    %91 = vector.shape_cast %90 : vector<4x16xf32> to vector<4x16x1xf32>
    %92 = vector.broadcast %91 : vector<4x16x1xf32> to vector<4x16x16xf32>
    %93 = arith.subf %89, %92 : vector<4x16x16xf32>
    %94 = math.exp %93 : vector<4x16x16xf32>
    %cst_57 = arith.constant dense<0.000000e+00> : vector<4x16xf32>
    %95 = vector.multi_reduction <add>, %94, %cst_57 [2] : vector<4x16x16xf32> to vector<4x16xf32>
    %96 = vector.shape_cast %95 : vector<4x16xf32> to vector<4x16x1xf32>
    %97 = vector.broadcast %96 : vector<4x16x1xf32> to vector<4x16x16xf32>
    %98 = arith.divf %94, %97 : vector<4x16x16xf32>
    %99 = arith.truncf %98 : vector<4x16x16xf32> to vector<4x16x16xbf16>
    "tpu.trace_start"() <{level = 10 : i32, message = "bnm,bmd->bnd"}> : () -> ()
    %cst_58 = arith.constant dense<0.000000e+00> : vector<4x16x8xf32>
    %100 = tpu.matmul %99, %85, %cst_58 {dimension_numbers = #tpu.dot_dimension_numbers<[2], [1], [1], [2], [0, 0, 0, 1, 1, 2], [0], [0]>} : vector<4x16x16xbf16>, vector<4x16x8xbf16>, vector<4x16x8xf32> -> vector<4x16x8xf32>
    "tpu.trace_stop"() : () -> ()
    %101 = vector.shape_cast %100 : vector<4x16x8xf32> to vector<64x8xf32>
    %102 = arith.truncf %101 : vector<64x8xf32> to vector<64x8xbf16>
    %c0_59 = arith.constant 0 : index
    %c24_60 = arith.constant 24 : index
    %103 = vector.load %arg9[%c0_59, %c24_60] : memref<64x32xbf16, #tpu.memory_space<vmem>>, vector<64x8xbf16>
    tpu.vector_store %arg9[%c0_59, %c24_60], %102 {strides = array<i32>} : memref<64x32xbf16, #tpu.memory_space<vmem>>, vector<64x8xbf16>,
    %c0_61 = arith.constant 0 : index
    %c0_62 = arith.constant 0 : index
    %104 = vector.load %arg9[%c0_61, %c0_62] : memref<64x32xbf16, #tpu.memory_space<vmem>>, vector<64x32xbf16>
    %c0_63 = arith.constant 0 : index
    %c0_64 = arith.constant 0 : index
    %105 = vector.load %arg5[%c0_63, %c0_64] : memref<32x32xbf16, #tpu.memory_space<vmem>>, vector<32x32xbf16>
    %cst_65 = arith.constant dense<0.000000e+00> : vector<64x32xf32>
    %106 = tpu.matmul %104, %105, %cst_65 {dimension_numbers = #tpu.dot_dimension_numbers<[1], [0], [0], [1], [0, 0, 1, 1], [], []>} : vector<64x32xbf16>, vector<32x32xbf16>, vector<64x32xf32> -> vector<64x32xf32>
    %c0_66 = arith.constant 0 : index
    %c0_67 = arith.constant 0 : index
    %107 = vector.load %arg6[%c0_66, %c0_67] : memref<1x32xf32, #tpu.memory_space<vmem>>, vector<1x32xf32>
    %108 = vector.broadcast %107 : vector<1x32xf32> to vector<64x32xf32>
    %109 = arith.addf %106, %108 : vector<64x32xf32>
    %110 = arith.truncf %109 : vector<64x32xf32> to vector<64x32xbf16>
    %c0_68 = arith.constant 0 : index
    %c0_69 = arith.constant 0 : index
    %111 = vector.load %arg7[%c0_68, %c0_69] : memref<64x32xbf16, #tpu.memory_space<vmem>>, vector<64x32xbf16>
    tpu.vector_store %arg7[%c0_68, %c0_69], %110 {strides = array<i32>} : memref<64x32xbf16, #tpu.memory_space<vmem>>, vector<64x32xbf16>,
    return
  }
  func.func @transform_0(%arg0: i32) -> (i32, i32) {
    %c0_i32 = arith.constant 0 : i32
    %c0_i32_0 = arith.constant 0 : i32
    return %arg0, %c0_i32 : i32, i32
  }
  func.func @transform_1(%arg0: i32) -> (i32, i32) {
    %c0_i32 = arith.constant 0 : i32
    %c0_i32_0 = arith.constant 0 : i32
    %c0_i32_1 = arith.constant 0 : i32
    return %c0_i32, %c0_i32_0 : i32, i32
  }
  func.func @transform_2(%arg0: i32) -> (i32, i32) {
    %c0_i32 = arith.constant 0 : i32
    %c0_i32_0 = arith.constant 0 : i32
    %c0_i32_1 = arith.constant 0 : i32
    return %c0_i32, %c0_i32_0 : i32, i32
  }
  func.func @transform_3(%arg0: i32) -> (i32, i32, i32, i32, i32) {
    %c0_i32 = arith.constant 0 : i32
    %c0_i32_0 = arith.constant 0 : i32
    %c0_i32_1 = arith.constant 0 : i32
    %c0_i32_2 = arith.constant 0 : i32
    %c0_i32_3 = arith.constant 0 : i32
    %c0_i32_4 = arith.constant 0 : i32
    return %c0_i32, %c0_i32_0, %c0_i32_1, %c0_i32_2, %c0_i32_3 : i32, i32, i32, i32, i32
  }
  func.func @transform_4(%arg0: i32) -> (i32, i32) {
    %c0_i32 = arith.constant 0 : i32
    %c0_i32_0 = arith.constant 0 : i32
    %c0_i32_1 = arith.constant 0 : i32
    return %c0_i32, %c0_i32_0 : i32, i32
  }
  func.func @transform_5(%arg0: i32) -> (i32, i32) {
    %c0_i32 = arith.constant 0 : i32
    %c0_i32_0 = arith.constant 0 : i32
    %c0_i32_1 = arith.constant 0 : i32
    return %c0_i32, %c0_i32_0 : i32, i32
  }
  func.func @transform_6(%arg0: i32) -> (i32, i32) {
    %c0_i32 = arith.constant 0 : i32
    %c0_i32_0 = arith.constant 0 : i32
    return %arg0, %c0_i32 : i32, i32
  }
}

module attributes {stable_mosaic.version = 11 : i64} {
  func.func @window_attention_kernel(%arg0: i32, %arg1: memref<64x32xbf16, #tpu.memory_space<vmem>>, %arg2: memref<32x96xbf16, #tpu.memory_space<vmem>>, %arg3: memref<1x96xf32, #tpu.memory_space<vmem>>, %arg4: memref<1x4x4x16x16xf32, #tpu.memory_space<vmem>>, %arg5: memref<32x32xbf16, #tpu.memory_space<vmem>>, %arg6: memref<1x32xf32, #tpu.memory_space<vmem>>, %arg7: memref<64x32xbf16, #tpu.memory_space<vmem>>, %arg8: memref<64x96xbf16, #tpu.memory_space<vmem>>, %arg9: memref<64x32xbf16, #tpu.memory_space<vmem>>) attributes {dimension_semantics = [#tpu.dimension_semantics<parallel>], iteration_bounds = array<i64: 2>, scalar_prefetch = 0 : i64, scratch_operands = 2 : i64, tpu.core_type = #tpu.core_type<tc>, window_params = [{transform_indices = @transform_0, window_bounds = array<i64: 64, 32>}, {pipeline_mode = #tpu.pipeline_mode<synchronous>, transform_indices = @transform_1, window_bounds = array<i64: 32, 96>}, {pipeline_mode = #tpu.pipeline_mode<synchronous>, transform_indices = @transform_2, window_bounds = array<i64: 1, 96>}, {pipeline_mode = #tpu.pipeline_mode<synchronous>, transform_indices = @transform_3, window_bounds = array<i64: 1, 4, 4, 16, 16>}, {pipeline_mode = #tpu.pipeline_mode<synchronous>, transform_indices = @transform_4, window_bounds = array<i64: 32, 32>}, {pipeline_mode = #tpu.pipeline_mode<synchronous>, transform_indices = @transform_5, window_bounds = array<i64: 1, 32>}, {transform_indices = @transform_6, window_bounds = array<i64: 64, 32>}]} {
    %c0 = arith.constant 0 : index
    %c0_0 = arith.constant 0 : index
    %0 = vector.load %arg1[%c0, %c0_0] : memref<64x32xbf16, #tpu.memory_space<vmem>>, vector<64x32xbf16>
    %c0_1 = arith.constant 0 : index
    %c0_2 = arith.constant 0 : index
    %1 = vector.load %arg2[%c0_1, %c0_2] : memref<32x96xbf16, #tpu.memory_space<vmem>>, vector<32x96xbf16>
    %cst = arith.constant dense<0.000000e+00> : vector<64x96xf32>
    %2 = tpu.matmul %0, %1, %cst {dimension_numbers = #tpu.dot_dimension_numbers<[1], [0], [0], [1], [0, 0, 1, 1], [], []>} : vector<64x32xbf16>, vector<32x96xbf16>, vector<64x96xf32> -> vector<64x96xf32>
    %c0_3 = arith.constant 0 : index
    %c0_4 = arith.constant 0 : index
    %3 = vector.load %arg3[%c0_3, %c0_4] : memref<1x96xf32, #tpu.memory_space<vmem>>, vector<1x96xf32>
    %4 = vector.broadcast %3 : vector<1x96xf32> to vector<64x96xf32>
    %5 = arith.addf %2, %4 : vector<64x96xf32>
    %6 = arith.truncf %5 : vector<64x96xf32> to vector<64x96xbf16>
    %c0_5 = arith.constant 0 : index
    %c0_6 = arith.constant 0 : index
    %7 = vector.load %arg8[%c0_5, %c0_6] : memref<64x96xbf16, #tpu.memory_space<vmem>>, vector<64x96xbf16>
    tpu.vector_store %arg8[%c0_5, %c0_6], %6 {strides = array<i32>} : memref<64x96xbf16, #tpu.memory_space<vmem>>, vector<64x96xbf16>,
    %c0_7 = arith.constant 0 : index
    %c0_8 = arith.constant 0 : index
    %8 = vector.load %arg8[%c0_7, %c0_8] : memref<64x96xbf16, #tpu.memory_space<vmem>>, vector<64x8xbf16>
    %9 = vector.shape_cast %8 : vector<64x8xbf16> to vector<4x16x8xbf16>
    %c0_9 = arith.constant 0 : index
    %c32 = arith.constant 32 : index
    %10 = vector.load %arg8[%c0_9, %c32] : memref<64x96xbf16, #tpu.memory_space<vmem>>, vector<64x8xbf16>
    %11 = vector.shape_cast %10 : vector<64x8xbf16> to vector<4x16x8xbf16>
    %c0_10 = arith.constant 0 : index
    %c64 = arith.constant 64 : index
    %12 = vector.load %arg8[%c0_10, %c64] : memref<64x96xbf16, #tpu.memory_space<vmem>>, vector<64x8xbf16>
    %13 = vector.shape_cast %12 : vector<64x8xbf16> to vector<4x16x8xbf16>
    "tpu.trace_start"() <{level = 10 : i32, message = "bnd,bmd->bnm"}> : () -> ()
    %cst_11 = arith.constant dense<0.000000e+00> : vector<4x16x16xf32>
    %14 = tpu.matmul %9, %11, %cst_11 {dimension_numbers = #tpu.dot_dimension_numbers<[2], [2], [1], [1], [0, 0, 0, 1, 1, 1], [0], [0]>} : vector<4x16x8xbf16>, vector<4x16x8xbf16>, vector<4x16x16xf32> -> vector<4x16x16xf32>
    "tpu.trace_stop"() : () -> ()
    %c0_12 = arith.constant 0 : index
    %c0_13 = arith.constant 0 : index
    %c0_14 = arith.constant 0 : index
    %c0_15 = arith.constant 0 : index
    %c0_16 = arith.constant 0 : index
    %15 = vector.load %arg4[%c0_12, %c0_13, %c0_14, %c0_15, %c0_16] : memref<1x4x4x16x16xf32, #tpu.memory_space<vmem>>, vector<1x1x4x16x16xf32>
    %16 = vector.shape_cast %15 : vector<1x1x4x16x16xf32> to vector<4x16x16xf32>
    %17 = arith.addf %14, %16 : vector<4x16x16xf32>
    %cst_17 = arith.constant dense<0xFF800000> : vector<4x16xf32>
    %18 = vector.multi_reduction <maximumf>, %17, %cst_17 [2] : vector<4x16x16xf32> to vector<4x16xf32>
    %19 = vector.shape_cast %18 : vector<4x16xf32> to vector<4x16x1xf32>
    %20 = vector.broadcast %19 : vector<4x16x1xf32> to vector<4x16x16xf32>
    %21 = arith.subf %17, %20 : vector<4x16x16xf32>
    %22 = math.exp %21 : vector<4x16x16xf32>
    %cst_18 = arith.constant dense<0.000000e+00> : vector<4x16xf32>
    %23 = vector.multi_reduction <add>, %22, %cst_18 [2] : vector<4x16x16xf32> to vector<4x16xf32>
    %24 = vector.shape_cast %23 : vector<4x16xf32> to vector<4x16x1xf32>
    %25 = vector.broadcast %24 : vector<4x16x1xf32> to vector<4x16x16xf32>
    %26 = arith.divf %22, %25 : vector<4x16x16xf32>
    %27 = arith.truncf %26 : vector<4x16x16xf32> to vector<4x16x16xbf16>
    "tpu.trace_start"() <{level = 10 : i32, message = "bnm,bmd->bnd"}> : () -> ()
    %cst_19 = arith.constant dense<0.000000e+00> : vector<4x16x8xf32>
    %28 = tpu.matmul %27, %13, %cst_19 {dimension_numbers = #tpu.dot_dimension_numbers<[2], [1], [1], [2], [0, 0, 0, 1, 1, 2], [0], [0]>} : vector<4x16x16xbf16>, vector<4x16x8xbf16>, vector<4x16x8xf32> -> vector<4x16x8xf32>
    "tpu.trace_stop"() : () -> ()
    %29 = vector.shape_cast %28 : vector<4x16x8xf32> to vector<64x8xf32>
    %30 = arith.truncf %29 : vector<64x8xf32> to vector<64x8xbf16>
    %c0_20 = arith.constant 0 : index
    %c0_21 = arith.constant 0 : index
    %31 = vector.load %arg9[%c0_20, %c0_21] : memref<64x32xbf16, #tpu.memory_space<vmem>>, vector<64x8xbf16>
    tpu.vector_store %arg9[%c0_20, %c0_21], %30 {strides = array<i32>} : memref<64x32xbf16, #tpu.memory_space<vmem>>, vector<64x8xbf16>,
    %c0_22 = arith.constant 0 : index
    %c8 = arith.constant 8 : index
    %32 = vector.load %arg8[%c0_22, %c8] : memref<64x96xbf16, #tpu.memory_space<vmem>>, vector<64x8xbf16>
    %33 = vector.shape_cast %32 : vector<64x8xbf16> to vector<4x16x8xbf16>
    %c0_23 = arith.constant 0 : index
    %c40 = arith.constant 40 : index
    %34 = vector.load %arg8[%c0_23, %c40] : memref<64x96xbf16, #tpu.memory_space<vmem>>, vector<64x8xbf16>
    %35 = vector.shape_cast %34 : vector<64x8xbf16> to vector<4x16x8xbf16>
    %c0_24 = arith.constant 0 : index
    %c72 = arith.constant 72 : index
    %36 = vector.load %arg8[%c0_24, %c72] : memref<64x96xbf16, #tpu.memory_space<vmem>>, vector<64x8xbf16>
    %37 = vector.shape_cast %36 : vector<64x8xbf16> to vector<4x16x8xbf16>
    "tpu.trace_start"() <{level = 10 : i32, message = "bnd,bmd->bnm"}> : () -> ()
    %cst_25 = arith.constant dense<0.000000e+00> : vector<4x16x16xf32>
    %38 = tpu.matmul %33, %35, %cst_25 {dimension_numbers = #tpu.dot_dimension_numbers<[2], [2], [1], [1], [0, 0, 0, 1, 1, 1], [0], [0]>} : vector<4x16x8xbf16>, vector<4x16x8xbf16>, vector<4x16x16xf32> -> vector<4x16x16xf32>
    "tpu.trace_stop"() : () -> ()
    %c0_26 = arith.constant 0 : index
    %c1 = arith.constant 1 : index
    %c0_27 = arith.constant 0 : index
    %c0_28 = arith.constant 0 : index
    %c0_29 = arith.constant 0 : index
    %39 = vector.load %arg4[%c0_26, %c1, %c0_27, %c0_28, %c0_29] : memref<1x4x4x16x16xf32, #tpu.memory_space<vmem>>, vector<1x1x4x16x16xf32>
    %40 = vector.shape_cast %39 : vector<1x1x4x16x16xf32> to vector<4x16x16xf32>
    %41 = arith.addf %38, %40 : vector<4x16x16xf32>
    %cst_30 = arith.constant dense<0xFF800000> : vector<4x16xf32>
    %42 = vector.multi_reduction <maximumf>, %41, %cst_30 [2] : vector<4x16x16xf32> to vector<4x16xf32>
    %43 = vector.shape_cast %42 : vector<4x16xf32> to vector<4x16x1xf32>
    %44 = vector.broadcast %43 : vector<4x16x1xf32> to vector<4x16x16xf32>
    %45 = arith.subf %41, %44 : vector<4x16x16xf32>
    %46 = math.exp %45 : vector<4x16x16xf32>
    %cst_31 = arith.constant dense<0.000000e+00> : vector<4x16xf32>
    %47 = vector.multi_reduction <add>, %46, %cst_31 [2] : vector<4x16x16xf32> to vector<4x16xf32>
    %48 = vector.shape_cast %47 : vector<4x16xf32> to vector<4x16x1xf32>
    %49 = vector.broadcast %48 : vector<4x16x1xf32> to vector<4x16x16xf32>
    %50 = arith.divf %46, %49 : vector<4x16x16xf32>
    %51 = arith.truncf %50 : vector<4x16x16xf32> to vector<4x16x16xbf16>
    "tpu.trace_start"() <{level = 10 : i32, message = "bnm,bmd->bnd"}> : () -> ()
    %cst_32 = arith.constant dense<0.000000e+00> : vector<4x16x8xf32>
    %52 = tpu.matmul %51, %37, %cst_32 {dimension_numbers = #tpu.dot_dimension_numbers<[2], [1], [1], [2], [0, 0, 0, 1, 1, 2], [0], [0]>} : vector<4x16x16xbf16>, vector<4x16x8xbf16>, vector<4x16x8xf32> -> vector<4x16x8xf32>
    "tpu.trace_stop"() : () -> ()
    %53 = vector.shape_cast %52 : vector<4x16x8xf32> to vector<64x8xf32>
    %54 = arith.truncf %53 : vector<64x8xf32> to vector<64x8xbf16>
    %c0_33 = arith.constant 0 : index
    %c8_34 = arith.constant 8 : index
    %55 = vector.load %arg9[%c0_33, %c8_34] : memref<64x32xbf16, #tpu.memory_space<vmem>>, vector<64x8xbf16>
    tpu.vector_store %arg9[%c0_33, %c8_34], %54 {strides = array<i32>} : memref<64x32xbf16, #tpu.memory_space<vmem>>, vector<64x8xbf16>,
    %c0_35 = arith.constant 0 : index
    %c16 = arith.constant 16 : index
    %56 = vector.load %arg8[%c0_35, %c16] : memref<64x96xbf16, #tpu.memory_space<vmem>>, vector<64x8xbf16>
    %57 = vector.shape_cast %56 : vector<64x8xbf16> to vector<4x16x8xbf16>
    %c0_36 = arith.constant 0 : index
    %c48 = arith.constant 48 : index
    %58 = vector.load %arg8[%c0_36, %c48] : memref<64x96xbf16, #tpu.memory_space<vmem>>, vector<64x8xbf16>
    %59 = vector.shape_cast %58 : vector<64x8xbf16> to vector<4x16x8xbf16>
    %c0_37 = arith.constant 0 : index
    %c80 = arith.constant 80 : index
    %60 = vector.load %arg8[%c0_37, %c80] : memref<64x96xbf16, #tpu.memory_space<vmem>>, vector<64x8xbf16>
    %61 = vector.shape_cast %60 : vector<64x8xbf16> to vector<4x16x8xbf16>
    "tpu.trace_start"() <{level = 10 : i32, message = "bnd,bmd->bnm"}> : () -> ()
    %cst_38 = arith.constant dense<0.000000e+00> : vector<4x16x16xf32>
    %62 = tpu.matmul %57, %59, %cst_38 {dimension_numbers = #tpu.dot_dimension_numbers<[2], [2], [1], [1], [0, 0, 0, 1, 1, 1], [0], [0]>} : vector<4x16x8xbf16>, vector<4x16x8xbf16>, vector<4x16x16xf32> -> vector<4x16x16xf32>
    "tpu.trace_stop"() : () -> ()
    %c0_39 = arith.constant 0 : index
    %c2 = arith.constant 2 : index
    %c0_40 = arith.constant 0 : index
    %c0_41 = arith.constant 0 : index
    %c0_42 = arith.constant 0 : index
    %63 = vector.load %arg4[%c0_39, %c2, %c0_40, %c0_41, %c0_42] : memref<1x4x4x16x16xf32, #tpu.memory_space<vmem>>, vector<1x1x4x16x16xf32>
    %64 = vector.shape_cast %63 : vector<1x1x4x16x16xf32> to vector<4x16x16xf32>
    %65 = arith.addf %62, %64 : vector<4x16x16xf32>
    %cst_43 = arith.constant dense<0xFF800000> : vector<4x16xf32>
    %66 = vector.multi_reduction <maximumf>, %65, %cst_43 [2] : vector<4x16x16xf32> to vector<4x16xf32>
    %67 = vector.shape_cast %66 : vector<4x16xf32> to vector<4x16x1xf32>
    %68 = vector.broadcast %67 : vector<4x16x1xf32> to vector<4x16x16xf32>
    %69 = arith.subf %65, %68 : vector<4x16x16xf32>
    %70 = math.exp %69 : vector<4x16x16xf32>
    %cst_44 = arith.constant dense<0.000000e+00> : vector<4x16xf32>
    %71 = vector.multi_reduction <add>, %70, %cst_44 [2] : vector<4x16x16xf32> to vector<4x16xf32>
    %72 = vector.shape_cast %71 : vector<4x16xf32> to vector<4x16x1xf32>
    %73 = vector.broadcast %72 : vector<4x16x1xf32> to vector<4x16x16xf32>
    %74 = arith.divf %70, %73 : vector<4x16x16xf32>
    %75 = arith.truncf %74 : vector<4x16x16xf32> to vector<4x16x16xbf16>
    "tpu.trace_start"() <{level = 10 : i32, message = "bnm,bmd->bnd"}> : () -> ()
    %cst_45 = arith.constant dense<0.000000e+00> : vector<4x16x8xf32>
    %76 = tpu.matmul %75, %61, %cst_45 {dimension_numbers = #tpu.dot_dimension_numbers<[2], [1], [1], [2], [0, 0, 0, 1, 1, 2], [0], [0]>} : vector<4x16x16xbf16>, vector<4x16x8xbf16>, vector<4x16x8xf32> -> vector<4x16x8xf32>
    "tpu.trace_stop"() : () -> ()
    %77 = vector.shape_cast %76 : vector<4x16x8xf32> to vector<64x8xf32>
    %78 = arith.truncf %77 : vector<64x8xf32> to vector<64x8xbf16>
    %c0_46 = arith.constant 0 : index
    %c16_47 = arith.constant 16 : index
    %79 = vector.load %arg9[%c0_46, %c16_47] : memref<64x32xbf16, #tpu.memory_space<vmem>>, vector<64x8xbf16>
    tpu.vector_store %arg9[%c0_46, %c16_47], %78 {strides = array<i32>} : memref<64x32xbf16, #tpu.memory_space<vmem>>, vector<64x8xbf16>,
    %c0_48 = arith.constant 0 : index
    %c24 = arith.constant 24 : index
    %80 = vector.load %arg8[%c0_48, %c24] : memref<64x96xbf16, #tpu.memory_space<vmem>>, vector<64x8xbf16>
    %81 = vector.shape_cast %80 : vector<64x8xbf16> to vector<4x16x8xbf16>
    %c0_49 = arith.constant 0 : index
    %c56 = arith.constant 56 : index
    %82 = vector.load %arg8[%c0_49, %c56] : memref<64x96xbf16, #tpu.memory_space<vmem>>, vector<64x8xbf16>
    %83 = vector.shape_cast %82 : vector<64x8xbf16> to vector<4x16x8xbf16>
    %c0_50 = arith.constant 0 : index
    %c88 = arith.constant 88 : index
    %84 = vector.load %arg8[%c0_50, %c88] : memref<64x96xbf16, #tpu.memory_space<vmem>>, vector<64x8xbf16>
    %85 = vector.shape_cast %84 : vector<64x8xbf16> to vector<4x16x8xbf16>
    "tpu.trace_start"() <{level = 10 : i32, message = "bnd,bmd->bnm"}> : () -> ()
    %cst_51 = arith.constant dense<0.000000e+00> : vector<4x16x16xf32>
    %86 = tpu.matmul %81, %83, %cst_51 {dimension_numbers = #tpu.dot_dimension_numbers<[2], [2], [1], [1], [0, 0, 0, 1, 1, 1], [0], [0]>} : vector<4x16x8xbf16>, vector<4x16x8xbf16>, vector<4x16x16xf32> -> vector<4x16x16xf32>
    "tpu.trace_stop"() : () -> ()
    %c0_52 = arith.constant 0 : index
    %c3 = arith.constant 3 : index
    %c0_53 = arith.constant 0 : index
    %c0_54 = arith.constant 0 : index
    %c0_55 = arith.constant 0 : index
    %87 = vector.load %arg4[%c0_52, %c3, %c0_53, %c0_54, %c0_55] : memref<1x4x4x16x16xf32, #tpu.memory_space<vmem>>, vector<1x1x4x16x16xf32>
    %88 = vector.shape_cast %87 : vector<1x1x4x16x16xf32> to vector<4x16x16xf32>
    %89 = arith.addf %86, %88 : vector<4x16x16xf32>
    %cst_56 = arith.constant dense<0xFF800000> : vector<4x16xf32>
    %90 = vector.multi_reduction <maximumf>, %89, %cst_56 [2] : vector<4x16x16xf32> to vector<4x16xf32>
    %91 = vector.shape_cast %90 : vector<4x16xf32> to vector<4x16x1xf32>
    %92 = vector.broadcast %91 : vector<4x16x1xf32> to vector<4x16x16xf32>
    %93 = arith.subf %89, %92 : vector<4x16x16xf32>
    %94 = math.exp %93 : vector<4x16x16xf32>
    %cst_57 = arith.constant dense<0.000000e+00> : vector<4x16xf32>
    %95 = vector.multi_reduction <add>, %94, %cst_57 [2] : vector<4x16x16xf32> to vector<4x16xf32>
    %96 = vector.shape_cast %95 : vector<4x16xf32> to vector<4x16x1xf32>
    %97 = vector.broadcast %96 : vector<4x16x1xf32> to vector<4x16x16xf32>
    %98 = arith.divf %94, %97 : vector<4x16x16xf32>
    %99 = arith.truncf %98 : vector<4x16x16xf32> to vector<4x16x16xbf16>
    "tpu.trace_start"() <{level = 10 : i32, message = "bnm,bmd->bnd"}> : () -> ()
    %cst_58 = arith.constant dense<0.000000e+00> : vector<4x16x8xf32>
    %100 = tpu.matmul %99, %85, %cst_58 {dimension_numbers = #tpu.dot_dimension_numbers<[2], [1], [1], [2], [0, 0, 0, 1, 1, 2], [0], [0]>} : vector<4x16x16xbf16>, vector<4x16x8xbf16>, vector<4x16x8xf32> -> vector<4x16x8xf32>
    "tpu.trace_stop"() : () -> ()
    %101 = vector.shape_cast %100 : vector<4x16x8xf32> to vector<64x8xf32>
    %102 = arith.truncf %101 : vector<64x8xf32> to vector<64x8xbf16>
    %c0_59 = arith.constant 0 : index
    %c24_60 = arith.constant 24 : index
    %103 = vector.load %arg9[%c0_59, %c24_60] : memref<64x32xbf16, #tpu.memory_space<vmem>>, vector<64x8xbf16>
    tpu.vector_store %arg9[%c0_59, %c24_60], %102 {strides = array<i32>} : memref<64x32xbf16, #tpu.memory_space<vmem>>, vector<64x8xbf16>,
    %c0_61 = arith.constant 0 : index
    %c0_62 = arith.constant 0 : index
    %104 = vector.load %arg9[%c0_61, %c0_62] : memref<64x32xbf16, #tpu.memory_space<vmem>>, vector<64x32xbf16>
    %c0_63 = arith.constant 0 : index
    %c0_64 = arith.constant 0 : index
    %105 = vector.load %arg5[%c0_63, %c0_64] : memref<32x32xbf16, #tpu.memory_space<vmem>>, vector<32x32xbf16>
    %cst_65 = arith.constant dense<0.000000e+00> : vector<64x32xf32>
    %106 = tpu.matmul %104, %105, %cst_65 {dimension_numbers = #tpu.dot_dimension_numbers<[1], [0], [0], [1], [0, 0, 1, 1], [], []>} : vector<64x32xbf16>, vector<32x32xbf16>, vector<64x32xf32> -> vector<64x32xf32>
    %c0_66 = arith.constant 0 : index
    %c0_67 = arith.constant 0 : index
    %107 = vector.load %arg6[%c0_66, %c0_67] : memref<1x32xf32, #tpu.memory_space<vmem>>, vector<1x32xf32>
    %108 = vector.broadcast %107 : vector<1x32xf32> to vector<64x32xf32>
    %109 = arith.addf %106, %108 : vector<64x32xf32>
    %110 = arith.truncf %109 : vector<64x32xf32> to vector<64x32xbf16>
    %c0_68 = arith.constant 0 : index
    %c0_69 = arith.constant 0 : index
    %111 = vector.load %arg7[%c0_68, %c0_69] : memref<64x32xbf16, #tpu.memory_space<vmem>>, vector<64x32xbf16>
    tpu.vector_store %arg7[%c0_68, %c0_69], %110 {strides = array<i32>} : memref<64x32xbf16, #tpu.memory_space<vmem>>, vector<64x32xbf16>,
    return
  }
  func.func @transform_0(%arg0: i32) -> (i32, i32) {
    %c0_i32 = arith.constant 0 : i32
    %c0_i32_0 = arith.constant 0 : i32
    return %arg0, %c0_i32 : i32, i32
  }
  func.func @transform_1(%arg0: i32) -> (i32, i32) {
    %c0_i32 = arith.constant 0 : i32
    %c0_i32_0 = arith.constant 0 : i32
    %c0_i32_1 = arith.constant 0 : i32
    return %c0_i32, %c0_i32_0 : i32, i32
  }
  func.func @transform_2(%arg0: i32) -> (i32, i32) {
    %c0_i32 = arith.constant 0 : i32
    %c0_i32_0 = arith.constant 0 : i32
    %c0_i32_1 = arith.constant 0 : i32
    return %c0_i32, %c0_i32_0 : i32, i32
  }
  func.func @transform_3(%arg0: i32) -> (i32, i32, i32, i32, i32) {
    %c0_i32 = arith.constant 0 : i32
    %c0_i32_0 = arith.constant 0 : i32
    %c0_i32_1 = arith.constant 0 : i32
    %c0_i32_2 = arith.constant 0 : i32
    %c0_i32_3 = arith.constant 0 : i32
    %c0_i32_4 = arith.constant 0 : i32
    return %c0_i32, %c0_i32_0, %c0_i32_1, %c0_i32_2, %c0_i32_3 : i32, i32, i32, i32, i32
  }
  func.func @transform_4(%arg0: i32) -> (i32, i32) {
    %c0_i32 = arith.constant 0 : i32
    %c0_i32_0 = arith.constant 0 : i32
    %c0_i32_1 = arith.constant 0 : i32
    return %c0_i32, %c0_i32_0 : i32, i32
  }
  func.func @transform_5(%arg0: i32) -> (i32, i32) {
    %c0_i32 = arith.constant 0 : i32
    %c0_i32_0 = arith.constant 0 : i32
    %c0_i32_1 = arith.constant 0 : i32
    return %c0_i32, %c0_i32_0 : i32, i32
  }
  func.func @transform_6(%arg0: i32) -> (i32, i32) {
    %c0_i32 = arith.constant 0 : i32
    %c0_i32_0 = arith.constant 0 : i32
    return %arg0, %c0_i32 : i32, i32
  }
}

</mosaic_0001>

<bundles_post_ra>
// kernel: tpu_custom_call.1
= control target key start
LH: loop header
LB: loop body
LE: loop exit
PB: predicated region body
PF: predicated region fallthrough
CT: control target
= control target key end

     0   :  { %11 = vsyncpa [#allocation5], 0  ;;  %s2902_s21 = smov 0   ;;  %s3548_s0 = inlined_call_operand.vmem [shape: bf16[128,32], index: 0, kind: input, shape index: {}]   ;;  %s3549_s1 = inlined_call_operand.vmem [shape: bf16[32,96], index: 1, kind: input, shape index: {}]   ;;  %s3550_s2 = inlined_call_operand.vmem [shape: f32[1,96], index: 2, kind: input, shape index: {}]   ;;  %s3551_s3 = inlined_call_operand.hbm [shape: f32[1,4,4,16,16], index: 3, kind: input, shape index: {}]   ;;  %s3552_s4 = inlined_call_operand.vmem [shape: bf16[32,32], index: 4, kind: input, shape index: {}]   ;;  %s3553_s5 = inlined_call_operand.vmem [shape: f32[1,32], index: 5, kind: input, shape index: {}]   ;;  %s3554_s6 = inlined_call_operand.vmem [shape: bf16[128,32], index: 6, kind: output, shape index: {}]  }
   0x1 LB: > { %s196_s24 = sshll.u32 %s3551_s3, 4  ;;  %s2443_s25 = sadd.s32 4294967295, %s2848_s21   ;;  %s2848_s21 = sphi %s2902_s21, %s17_s21   ;;  %s197_s24 = int_to_ptr.hbm [resolvable:$true] %s196_s24 }
   0x2   : > { %p2445_p0 = scmp.ge.s32.totalorder %s2848_s21, 1  ;;  %p179_p1 = scmp.lt.s32.totalorder %s2848_s21, 3 }
   0x3   : > { %p2650_p2 = scmp.eq.s32.totalorder %s2443_s25, 0  ;;  %s2850_s26 = smov [#allocation4]  }
   0x4   : > { %p180_p3 = pnand %p2445_p0, %p179_p1  ;;  %s198_s27 = sshll.u32 %s2850_s26, 4  ;;  %s199_s27 = int_to_ptr.vmem [resolvable:$true] %s198_s27 }
   0x5   : > { %s2851_s28 = smov 128   ;;  %s2852_s29 = smov 8  }
   0x6   : > { %p2646_p4 = pneg %p180_p3  ;;  %229 = sbr.rel (%p180_p3) target bundleno = 2534 (0x9e6), region = 44 }
   0x8   : > { %p2647_p5 = pnand %p2650_p2, %p2646_p4 }
   0xa   : > { %2649 = dma.hbm_to_vmem [thread:$0]  (!%p2647_p5), %s197_s24, 4096, %s199_s27, [#allocation5], %s2851_s28, %s2851_s28, %s2852_s29  }
   0xb   : > { %2843 = dma.done.wait (%p2650_p2), [#allocation5], 4096  }
   0xc   : > { %2845 = vsyncadd (%p2650_p2), [#allocation5], 4294963200  ;;  %s2450_s30 = sshll.u32 %s2443_s25, 3  ;;  %v2613_v0 = vld [vmem:[%s3549_s1 + $0x8] sm:$0xff]  ;;  %v2612_v1 = vld [vmem:[%s3549_s1] sm:$0xff]  ;;  %vm321_vm0 = vcmask 261120  }
   0xd   : > { %p261_p6 = scmp.lt.s32.totalorder %s2450_s30, 15  ;;  %2636 = vmatpush.bf16.msra.mxu1 %v2613_v0  ;;  %2638 = vmatpush.bf16.msra.mxu3 %v2613_v0  ;;  %v2677_v6 = vld [vmem:[%s3550_s2] ss:$0 sm:$0xff]  ;;  %vm371_vm1 = vcmask 781312   ;;  %s2853_s17 = smov 96   ;;  %vm403_vm2 = vcmask 64512  }
   0xe   : > { %340 = vmatpush.bf16.msra.mxu0 %v2613_v0  ;;  %2637 = vmatpush.bf16.msra.mxu2 %v2613_v0  ;;  %s2854_s18 = smov 64   ;;  %v390_v44 = vld [vmem:[#allocation4 + $0x10] sm:$0xff]  ;;  %v388_v46 = vld [vmem:[#allocation4] sm:$0xff]  ;;  %vm505_vm3 = vcmask 130048   ;;  %v391_v52 = vld [vmem:[#allocation4 + $0x18] sm:$0xff]  ;;  %s2855_s19 = smov 88  }
   0xf   : > { %s3572_s30 = smov (!%p261_p6, %s2450_s30), 15  ;;  %v389_v54 = vld [vmem:[#allocation4 + $0x8] sm:$0xff]  ;;  %v392_v60 = vld [vmem:[#allocation4 + $0x20] sm:$0xff]  ;;  %v394_v0 = vld [vmem:[#allocation4 + $0x30] sm:$0xff]  ;;  %s2856_s20 = smov 120  }
  0x10   : > { %s2451_s7 = sshll.u32 %s3572_s30, 2  ;;  %s2857_s22 = smov 56  }
  0x11   : > { %s264_s14 = scalar_lea.vmem %s3548_s0, %s2451_s7  ;;  %2639 = vmatpush.bf16.msra.mxu1 %v2612_v1  ;;  %2641 = vmatpush.bf16.msra.mxu3 %v2612_v1  ;;  %s2858_s23 = smov 80  }
  0x12   : > { %v2609_v2 = vld [vmem:[%s264_s14 + $0x8] sm:$0xff]  ;;  %v2611_v3 = vld [vmem:[%s264_s14 + $0x18] sm:$0xff]  ;;  %v2608_v4 = vld [vmem:[%s264_s14] sm:$0xff]  ;;  %341 = vmatpush.bf16.msra.mxu0 %v2612_v1  ;;  %2640 = vmatpush.bf16.msra.mxu2 %v2612_v1  ;;  %s2859_s24 = smov 112   ;;  %s2860_s25 = smov 72  }
  0x13   : > { %v2610_v5 = vld [vmem:[%s264_s14 + $0x10] sm:$0xff]  ;;  %s2861_s26 = smov 48   ;;  %s2862_s27 = smov 104  }
  0x14   : > { %2479 = vmatmul.msk.bf16.vlgmr.msra.gmra.mxu1 %vm321_vm0, %v2609_v2  ;;  %2481 = vmatmul.msk.bf16.vlgmr.msra.gmra.mxu3 %vm321_vm0, %v2611_v3  ;;  %s2863_s28 = smov 40   ;;  %s2864_s29 = smov 8  }
  0x15   : > { %2478 = vmatmul.msk.bf16.vlgmr.msra.gmra.mxu0 %vm321_vm0, %v2608_v4  ;;  %2480 = vmatmul.msk.bf16.vlgmr.msra.gmra.mxu2 %vm321_vm0, %v2610_v5  ;;  %v393_v5 = vld [vmem:[#allocation4 + $0x28] sm:$0xff]  ;;  %s2865_s8 = smov 16   ;;  %s2866_s9 = smov 24  }
  0x91   : > { %v348_v7 = vpop.f32.mrf.mxu1 }
  0x92   : > { %v349_v8 = vadd.f32 %v2677_v6, %v348_v7  ;;  %v343_v9 = vpop.f32.mrf.mxu0 }
  0x93   : > { %v344_v10 = vadd.f32 %v2677_v6, %v343_v9  ;;  %v395_v9 = vld [vmem:[#allocation4 + $0x38] sm:$0xff] }
  0x94   : > { %v365_v11 = vpack.c.bf16 %v349_v8, %v349_v8 }
  0x95   : > { %v363_v12 = vpack.c.bf16 %v344_v10, %v344_v10 }
  0x96   : > { %374 = vst.msk [vmem:[#allocation2 + $0x8] sm:$0xf] %vm371_vm1, %v365_v11 }
  0x97   : > { %v358_v13 = vpop.f32.mrf.mxu3  ;;  %372 = vst.msk [vmem:[#allocation2] sm:$0xf] %vm371_vm1, %v363_v12 }
  0x98   : > { %v359_v14 = vadd.f32 %v2677_v6, %v358_v13  ;;  %v353_v15 = vpop.f32.mrf.mxu2 }
  0x99   : > { %v350_v16 = vpop.f32.mrf.mxu1  ;;  %v354_v17 = vadd.f32 %v2677_v6, %v353_v15 }
  0x9a   : > { %v369_v18 = vpack.c.bf16 %v359_v14, %v359_v14  ;;  %v351_v19 = vadd.f32 %v2677_v6, %v350_v16  ;;  %v345_v20 = vpop.f32.mrf.mxu0 }
  0x9b   : > { %v367_v21 = vpack.c.bf16 %v354_v17, %v354_v17  ;;  %v346_v22 = vadd.f32 %v2677_v6, %v345_v20 }
  0x9c   : > { %378 = vst.msk [vmem:[#allocation2 + $0x18] sm:$0xf] %vm371_vm1, %v369_v18  ;;  %v366_v23 = vpack.c.bf16 %v351_v19, %v351_v19 }
  0x9d   : > { %376 = vst.msk [vmem:[#allocation2 + $0x10] sm:$0xf] %vm371_vm1, %v367_v21  ;;  %v364_v24 = vpack.c.bf16 %v346_v22, %v346_v22 }
  0x9e   : > { %375 = vst.msk [vmem:[#allocation2 + $0xc] sm:$0xf] %vm371_vm1, %v366_v23 }
  0x9f   : > { %v360_v25 = vpop.f32.mrf.mxu3  ;;  %373 = vst.msk [vmem:[#allocation2 + $0x4] sm:$0xf] %vm371_vm1, %v364_v24 }
  0xa0   : > { %v361_v26 = vadd.f32 %v2677_v6, %v360_v25  ;;  %v355_v27 = vpop.f32.mrf.mxu2 }
  0xa1   : > { %v356_v28 = vadd.f32 %v2677_v6, %v355_v27 }
  0xa2   : > { %v370_v29 = vpack.c.bf16 %v361_v26, %v361_v26 }
  0xa3   : > { %v368_v30 = vpack.c.bf16 %v356_v28, %v356_v28 }
  0xa4   : > { %379 = vst.msk [vmem:[#allocation2 + $0x1c] sm:$0xf] %vm371_vm1, %v370_v29 }
  0xa5   : > { %377 = vst.msk [vmem:[#allocation2 + $0x14] sm:$0xf] %vm371_vm1, %v368_v30  ;;  %v2942_v31 = vld [vmem:[#allocation2 + $0x8] sm:$0xff] }
  0xa6   : > { %429 = vrot.lane.b32.xlu0 %v2942_v31, %s2853_s17  ;;  %v2614_v33 = vld [vmem:[#allocation2] sm:$0xff] }
  0xa7   : > { %v2968_v2 = vld [vmem:[#allocation2] sm:$0xff] }
  0xab   : > { %v2945_v32 = vld [vmem:[#allocation2 + $0x18] sm:$0xff] }
  0xac   : > { %483 = vrot.lane.b32.xlu1 %v2945_v32, %s2853_s17  ;;  %v2948_v34 = vld [vmem:[#allocation2 + $0x10] sm:$0xff] }
  0xae   : > { %401 = vrot.lane.b32.xlu0 %v2614_v33, %s2853_s17 }
  0xb4   : > { %456 = vrot.lane.b32.xlu1 %v2948_v34, %s2853_s17 }
  0xbc   : > { %711 = vrot.lane.b32.xlu1 %v2614_v33, %s2854_s18 }
 0x118   : > { %v430_v35 = vpop.permute.xlu0 %429 }
 0x119   : > { %v435_v36 = vsel %vm403_vm2, %v430_v35, 0 }
 0x11a   : > { %444 = vmatpush.bf16.xpose.msrb.mxu2 %v435_v36 }
 0x11e   : > { %v484_v37 = vpop.permute.xlu1 %483 }
 0x11f   : > { %v489_v38 = vsel %vm403_vm2, %v484_v37, 0 }
 0x120   : > { %v402_v39 = vpop.permute.xlu0 %401 }
 0x121   : > { %2491 = vmatmul.msk.bf16.vlgmr.msrb.gmra.mxu2 %vm403_vm2, %v2942_v31  ;;  %v408_v40 = vsel %vm403_vm2, %v402_v39, 0 }
 0x122   : > { %417 = vmatpush.bf16.xpose.msrb.mxu1 %v408_v40 }
 0x126   : > { %v457_v41 = vpop.permute.xlu1 %456 }
 0x127   : > { %v462_v42 = vsel %vm403_vm2, %v457_v41, 0 }
 0x128   : > { %471 = vmatpush.bf16.xpose.msrb.mxu3 %v462_v42 }
 0x129   : > { %2486 = vmatmul.msk.bf16.vlgmr.msrb.gmra.mxu1 %vm403_vm2, %v2614_v33 }
 0x12a   : > { %498 = vmatpush.bf16.xpose.msra.mxu1 %v489_v38 }
 0x12e   : > { %v712_v43 = vpop.permute.xlu1 %711 }
 0x12f   : > { %2496 = vmatmul.msk.bf16.vlgmr.msrb.gmra.mxu3 %vm403_vm2, %v2948_v34  ;;  %724 = vmatpush.bf16.msra.mxu2 %v712_v43 }
 0x139   : > { %2501 = vmatmul.msk.bf16.vlgmr.msra.gmra.mxu1 %vm403_vm2, %v2945_v32 }
 0x1a4   : > { %v446_v45 = vpop.f32.mrf.mxu2 }
 0x1a5   : > { %v447_v47 = vadd.f32 %v446_v45, %v390_v44 }
 0x1a6   : > { %v419_v48 = vpop.f32.mrf.mxu1 }
 0x1a7   : > { %v420_v49 = vadd.f32 %v419_v48, %v388_v46  ;;  %v512_v50 = vsel %vm505_vm3, %v447_v47, -inf }
 0x1a8   : > { %513 = vmax.xlane.f32.xlu0 %v512_v50  ;;  %v2619_v50 = vld [vmem:[#allocation2 + $0x8] sm:$0xff] }
 0x1a9   : > { %v506_v51 = vsel %vm505_vm3, %v420_v49, -inf }
 0x1aa   : > { %507 = vmax.xlane.f32.xlu2 %v506_v51  ;;  %v3016_v51 = vld [vmem:[#allocation2 + $0x18] sm:$0xff] }
 0x1ac   : > { %v448_v53 = vpop.f32.mrf.mxu2 }
 0x1ad   : > { %v449_v55 = vadd.f32 %v448_v53, %v391_v52  ;;  %v2620_v53 = vld [vmem:[#allocation2 + $0x10] sm:$0xff] }
 0x1ae   : > { %v421_v56 = vpop.f32.mrf.mxu1 }
 0x1af   : > { %v422_v57 = vadd.f32 %v421_v56, %v389_v54  ;;  %v515_v58 = vsel %vm505_vm3, %v449_v55, -inf }
 0x1b0   : > { %516 = vmax.xlane.f32.xlu1 %v515_v58  ;;  %v3028_v58 = vld [vmem:[#allocation2] sm:$0xff] }
 0x1b1   : > { %v509_v59 = vsel %vm505_vm3, %v422_v57, -inf }
 0x1b2   : > { %v473_v61 = vpop.f32.mrf.mxu3  ;;  %510 = vmax.xlane.f32.xlu2 %v509_v59 }
 0x1b3   : > { %v474_v62 = vadd.f32 %v473_v61, %v392_v60 }
 0x1b5   : > { %v518_v63 = vsel %vm505_vm3, %v474_v62, -inf }
 0x1b6   : > { %v500_v1 = vpop.f32.mrf.mxu1 }
 0x1b7   : > { %v501_v3 = vadd.f32 %v500_v1, %v394_v0 }
 0x1b9   : > { %v524_v4 = vsel %vm505_vm3, %v501_v3, -inf }
 0x1ba   : > { %519 = vmax.xlane.f32.xlu2 %v518_v63  ;;  %v475_v6 = vpop.f32.mrf.mxu3 }
 0x1bb   : > { %v2973_v7 = vadd.f32 %v475_v6, %v393_v5 }
 0x1bc   : > { %847 = vrot.lane.b32.xlu0 %v2968_v2, %s2855_s19 }
 0x1bd   : > { %v521_v8 = vsel %vm505_vm3, %v2973_v7, -inf }
 0x1be   : > { %v502_v10 = vpop.f32.mrf.mxu1 }
 0x1bf   : > { %v2979_v11 = vadd.f32 %v502_v10, %v395_v9 }
 0x1c1   : > { %v527_v12 = vsel %vm505_vm3, %v2979_v11, -inf }
 0x1c2   : > { %525 = vmax.xlane.f32.xlu2 %v524_v4 }
 0x1c9   : > { %786 = vrot.lane.b32.xlu1 %v2945_v32, %s2854_s18 }
 0x1ca   : > { %522 = vmax.xlane.f32.xlu2 %v521_v8 }
 0x1d2   : > { %528 = vmax.xlane.f32.xlu2 %v527_v12 }
 0x1ea   : > { %736 = vrot.lane.b32.xlu2 %v2942_v31, %s2854_s18 }
 0x21b   : > { %v514_v13 = vpop.xlane.xlu0 %513 }
 0x21c   : > { %v532_v14 = vsub.f32 %v447_v47, %v514_v13 }
 0x21d   : > { %v508_v15 = vpop.xlane.xlu2 %507 }
 0x21e   : > { %v542_v16 = vmul.f32 1.442695, %v532_v14  ;;  %v530_v17 = vsub.f32 %v420_v49, %v508_v15 }
 0x220   : > { %2679 = vpow2.f32 %v542_v16  ;;  %v538_v18 = vmul.f32 1.442695, %v530_v17 }
 0x222   : > { %2681 = vpow2.f32 %v538_v18 }
 0x223   : > { %v517_v19 = vpop.xlane.xlu1 %516 }
 0x224   : > { %v533_v20 = vsub.f32 %v449_v55, %v517_v19 }
 0x225   : > { %v511_v21 = vpop.xlane.xlu2 %510 }
 0x226   : > { %v2985_v22 = vpop.eup %2679  ;;  %v544_v23 = vmul.f32 1.442695, %v533_v20  ;;  %v531_v24 = vsub.f32 %v422_v57, %v511_v21 }
 0x227   : > { %v560_v25 = vsel %vm505_vm3, %v2985_v22, 0.0 }
 0x228   : > { %v2989_v26 = vpop.eup %2681  ;;  %2683 = vpow2.f32 %v544_v23  ;;  %v540_v27 = vmul.f32 1.442695, %v531_v24  ;;  %561 = vadd.xlane.f32.xlu0 %v560_v25 }
 0x229   : > { %v554_v28 = vsel %vm505_vm3, %v2989_v26, 0.0 }
 0x22a   : > { %2685 = vpow2.f32 %v540_v27  ;;  %555 = vadd.xlane.f32.xlu2 %v554_v28 }
 0x22d   : > { %v520_v29 = vpop.xlane.xlu2 %519 }
 0x22e   : > { %v2993_v30 = vpop.eup %2683  ;;  %v534_v31 = vsub.f32 %v474_v62, %v520_v29  ;;  %v848_v47 = vpop.permute.xlu0 %847 }
 0x22f   : > { %v563_v32 = vsel %vm505_vm3, %v2993_v30, 0.0  ;;  %v853_v49 = vsel %vm403_vm2, %v848_v47, 0 }
 0x230   : > { %v2997_v33 = vpop.eup %2685  ;;  %v546_v35 = vmul.f32 1.442695, %v534_v31  ;;  %564 = vadd.xlane.f32.xlu1 %v563_v32 }
 0x231   : > { %v557_v36 = vsel %vm505_vm3, %v2997_v33, 0.0 }
 0x232   : > { %2687 = vpow2.f32 %v546_v35  ;;  %558 = vadd.xlane.f32.xlu2 %v557_v36 }
 0x235   : > { %v526_v37 = vpop.xlane.xlu2 %525 }
 0x236   : > { %v536_v38 = vsub.f32 %v501_v3, %v526_v37 }
 0x238   : > { %v3001_v39 = vpop.eup %2687  ;;  %v550_v40 = vmul.f32 1.442695, %v536_v38 }
 0x239   : > { %v566_v41 = vsel %vm505_vm3, %v3001_v39, 0.0 }
 0x23a   : > { %2689 = vpow2.f32 %v550_v40  ;;  %567 = vadd.xlane.f32.xlu2 %v566_v41 }
 0x23b   : > { %v787_v42 = vpop.permute.xlu1 %786 }
 0x23c   : > { %799 = vmatpush.bf16.msrb.mxu2 %v787_v42  ;;  %761 = vrot.lane.b32.xlu0 %v2948_v34, %s2854_s18  ;;  %s3527_s18 = scalar_lea.vmem %s3554_s6, %s2451_s7 }
 0x23d   : > { %v523_v43 = vpop.xlane.xlu2 %522 }
 0x23e   : > { %v535_v34 = vsub.f32 %v2973_v7, %v523_v43 }
 0x240   : > { %v3007_v44 = vpop.eup %2689  ;;  %v548_v52 = vmul.f32 1.442695, %v535_v34 }
 0x241   : > { %v572_v45 = vsel %vm505_vm3, %v3007_v44, 0.0 }
 0x242   : > { %573 = vadd.xlane.f32.xlu2 %v572_v45  ;;  %2691 = vpow2.f32 %v548_v52 }
 0x245   : > { %v529_v46 = vpop.xlane.xlu2 %528 }
 0x246   : > { %v537_v54 = vsub.f32 %v2979_v11, %v529_v46 }
 0x248   : > { %v552_v55 = vmul.f32 1.442695, %v537_v54  ;;  %v3023_v56 = vpop.eup %2691 }
 0x249   : > { %845 = vrot.lane.b32.xlu1 %v2968_v2, %s2856_s20  ;;  %v569_v57 = vsel %vm505_vm3, %v3023_v56, 0.0 }
 0x24a   : > { %2693 = vpow2.f32 %v552_v55 }
 0x24d   : > { %v737_v48 = vpop.permute.xlu2 %736 }
 0x24e   : > { %749 = vmatpush.bf16.msra.mxu3 %v737_v48 }
 0x250   : > { %v3030_v59 = vpop.eup %2693 }
 0x251   : > { %876 = vrot.lane.b32.xlu1 %v2619_v50, %s2855_s19  ;;  %v575_v60 = vsel %vm505_vm3, %v3030_v59, 0.0 }
 0x252   : > { %862 = vmatpush.bf16.xpose.msrb.mxu3 %v853_v49 }
 0x259   : > { %934 = vrot.lane.b32.xlu1 %v3016_v51, %s2855_s19 }
 0x25a   : > { %905 = vrot.lane.b32.xlu2 %v2620_v53, %s2855_s19 }
 0x261   : > { %1211 = vrot.lane.b32.xlu1 %v2620_v53, %s2857_s22 }
 0x262   : > { %874 = vrot.lane.b32.xlu2 %v2619_v50, %s2856_s20 }
 0x266   : > { %570 = vadd.xlane.f32.xlu0 %v569_v57 }
 0x26a   : > { %1329 = vrot.lane.b32.xlu2 %v3028_v58, %s2858_s23 }
 0x26e   : > { %576 = vadd.xlane.f32.xlu0 %v575_v60 }
 0x282   : > { %903 = vrot.lane.b32.xlu0 %v2620_v53, %s2856_s20 }
 0x28a   : > { %932 = vrot.lane.b32.xlu0 %v3016_v51, %s2856_s20 }
 0x292   : > { %1161 = vrot.lane.b32.xlu0 %v2968_v2, %s2857_s22 }
 0x29a   : > { %1186 = vrot.lane.b32.xlu0 %v2619_v50, %s2857_s22 }
 0x29b   : > { %v562_v61 = vpop.xlane.xlu0 %561 }
 0x29c   : > { %2695 = vrcp.f32 %v562_v61  ;;  %vm613_vm5 = vweird.f32 %v562_v61  ;;  %v619_v2 = vand.u32 2147483648, %v562_v61  ;;  %v617_v10 = vand.u32 2147483647, %v562_v61 }
 0x29d   : > { %v556_v62 = vpop.xlane.xlu2 %555 }
 0x29e   : > { %2697 = vrcp.f32 %v556_v62  ;;  %vm583_vm8 = vweird.f32 %v556_v62  ;;  %v589_v14 = vand.u32 2147483648, %v556_v62  ;;  %v587_v17 = vand.u32 2147483647, %v556_v62 }
 0x29f   : > { %v620_v20 = vor.u32 1.1754944e-38, %v619_v2  ;;  %vm618_vm10 = vcmp.eq.f32.partialorder %v617_v10, 8.507059e+37 }
 0x2a0   : > { %v590_v29 = vor.u32 1.1754944e-38, %v589_v14  ;;  %vm588_vm11 = vcmp.eq.f32.partialorder %v587_v17, 8.507059e+37 }
 0x2a2   : > { %v2696_v63 = vpop.eup %2695 }
 0x2a3   : > { %v609_v0 = vmul.f32 %v2696_v63, %v562_v61  ;;  %v565_v1 = vpop.xlane.xlu1 %564  ;;  %vm614_vm4 = vweird.f32 %v2696_v63 }
 0x2a4   : > { %v2698_v3 = vpop.eup %2697  ;;  %2699 = vrcp.f32 %v565_v1  ;;  %vm3042_vm7 = vmor %vm613_vm5, %vm614_vm4  ;;  %v632_v31 = vand.u32 2147483647, %v565_v1  ;;  %v634_v32 = vand.u32 2147483648, %v565_v1  ;;  %vm628_vm13 = vweird.f32 %v565_v1 }
 0x2a5   : > { %v610_v4 = vsub.f32 1.0, %v609_v0  ;;  %v579_v5 = vmul.f32 %v2698_v3, %v556_v62  ;;  %v559_v6 = vpop.xlane.xlu2 %558  ;;  %vm584_vm6 = vweird.f32 %v2698_v3 }
 0x2a6   : > { %2701 = vrcp.f32 %v559_v6  ;;  %vm3048_vm9 = vmor %vm583_vm8, %vm584_vm6  ;;  %v602_v40 = vand.u32 2147483647, %v559_v6  ;;  %v604_v41 = vand.u32 2147483648, %v559_v6  ;;  %vm633_vm1 = vcmp.eq.f32.partialorder %v632_v31, 8.507059e+37 }
 0x2a7   : > { %v611_v7 = vmul.f32 %v2696_v63, %v610_v4  ;;  %v580_v8 = vsub.f32 1.0, %v579_v5  ;;  %v635_v46 = vor.u32 1.1754944e-38, %v634_v32  ;;  %vm598_vm4 = vweird.f32 %v559_v6 }
 0x2a8   : > { %v605_v34 = vor.u32 1.1754944e-38, %v604_v41  ;;  %vm603_vm6 = vcmp.eq.f32.partialorder %v602_v40, 8.507059e+37 }
 0x2a9   : > { %v612_v9 = vadd.f32 %v2696_v63, %v611_v7  ;;  %v581_v11 = vmul.f32 %v2698_v3, %v580_v8 }
 0x2aa   : > { %v2700_v12 = vpop.eup %2699 }
 0x2ab   : > { %v616_v15 = vsel %vm3042_vm7, %v2696_v63, %v612_v9  ;;  %v582_v16 = vadd.f32 %v2698_v3, %v581_v11  ;;  %v624_v18 = vmul.f32 %v2700_v12, %v565_v1  ;;  %vm629_vm12 = vweird.f32 %v2700_v12 }
 0x2ac   : > { %v2702_v19 = vpop.eup %2701  ;;  %v621_v28 = vsel %vm618_vm10, %v620_v20, %v616_v15  ;;  %vm630_vm15 = vmor %vm628_vm13, %vm629_vm12 }
 0x2ad   : > { %v586_v23 = vsel %vm3048_vm9, %v2698_v3, %v582_v16  ;;  %v625_v24 = vsub.f32 1.0, %v624_v18  ;;  %v594_v25 = vmul.f32 %v2702_v19, %v559_v6  ;;  %v3054_v27 = vpop.xlane.xlu2 %567  ;;  %v622_v42 = vmul.f32 %v2985_v22, %v621_v28 }
 0x2ae   : > { %v762_v35 = vpop.permute.xlu0 %761  ;;  %v591_v38 = vsel %vm588_vm11, %v590_v29, %v586_v23  ;;  %vm599_vm14 = vweird.f32 %v2702_v19  ;;  %2703 = vrcp.f32 %v3054_v27  ;;  %v649_v17 = vand.u32 2147483648, %v3054_v27 }
 0x2af   : > { %v626_v36 = vmul.f32 %v2700_v12, %v625_v24  ;;  %v595_v37 = vsub.f32 1.0, %v594_v25  ;;  %774 = vmatpush.bf16.msrb.mxu1 %v762_v35  ;;  %v592_v47 = vmul.f32 %v2989_v26, %v591_v38  ;;  %vm600_vm5 = vmor %vm598_vm4, %vm599_vm14  ;;  %v700_v52 = vpack.c.bf16 %v622_v42, %v622_v42 }
 0x2b0   : > { %vm643_vm8 = vweird.f32 %v3054_v27  ;;  %v650_v23 = vor.u32 1.1754944e-38, %v649_v17 }
 0x2b1   : > { %v627_v43 = vadd.f32 %v2700_v12, %v626_v36  ;;  %v596_v45 = vmul.f32 %v2702_v19, %v595_v37  ;;  %v698_v57 = vpack.c.bf16 %v592_v47, %v592_v47  ;;  %v733_v62 = vunpack.c.l.b16 %v700_v52 }
 0x2b3   : > { %v631_v48 = vsel %vm630_vm15, %v2700_v12, %v627_v43  ;;  %v597_v49 = vadd.f32 %v2702_v19, %v596_v45  ;;  %v708_v0 = vunpack.c.l.b16 %v698_v57 }
 0x2b4   : > { %v636_v50 = vsel %vm633_vm1, %v635_v46, %v631_v48  ;;  %v2704_v9 = vpop.eup %2703 }
 0x2b5   : > { %v637_v53 = vmul.f32 %v2993_v30, %v636_v50  ;;  %v601_v54 = vsel %vm600_vm5, %v2702_v19, %v597_v49  ;;  %v3059_v22 = vpop.xlane.xlu2 %573  ;;  %v639_v10 = vmul.f32 %v2704_v9, %v3054_v27  ;;  %vm644_vm7 = vweird.f32 %v2704_v9 }
 0x2b6   : > { %v606_v55 = vsel %vm603_vm6, %v605_v34, %v601_v54  ;;  %2705 = vrcp.f32 %v3059_v22  ;;  %v647_v19 = vand.u32 2147483647, %v3054_v27  ;;  %vm645_vm9 = vmor %vm643_vm8, %vm644_vm7  ;;  %vm673_vm13 = vweird.f32 %v3059_v22 }
 0x2b7   : > { %v701_v60 = vpack.c.bf16 %v637_v53, %v637_v53  ;;  %v607_v61 = vmul.f32 %v2997_v33, %v606_v55  ;;  %v640_v11 = vsub.f32 1.0, %v639_v10  ;;  %v679_v27 = vand.u32 2147483648, %v3059_v22 }
 0x2b8   : > { %vm648_vm10 = vcmp.eq.f32.partialorder %v647_v19, 8.507059e+37  ;;  %v677_v41 = vand.u32 2147483647, %v3059_v22 }
 0x2b9   : > { %v734_v26 = vunpack.c.l.b16 %v701_v60  ;;  %v699_v63 = vpack.c.bf16 %v607_v61, %v607_v61  ;;  %v641_v13 = vmul.f32 %v2704_v9, %v640_v11  ;;  %v680_v49 = vor.u32 1.1754944e-38, %v679_v27 }
 0x2ba   : > { %vm678_vm5 = vcmp.eq.f32.partialorder %v677_v41, 8.507059e+37 }
 0x2bb   : > { %v709_v1 = vunpack.c.l.b16 %v699_v63  ;;  %v846_v3 = vpop.permute.xlu1 %845  ;;  %v735_v4 = vpack.c.b16 %v734_v26, %v733_v62  ;;  %v642_v16 = vadd.f32 %v2704_v9, %v641_v13 }
 0x2bc   : > { %v2706_v12 = vpop.eup %2705 }
 0x2bd   : > { %v906_v5 = vpop.permute.xlu2 %905  ;;  %2503 = vmatmul.msk.bf16.vlgmr.msra.gmra.mxu3 %vm505_vm3, %v735_v4  ;;  %v710_v30 = vpack.c.b16 %v709_v1, %v708_v0  ;;  %v669_v14 = vmul.f32 %v2706_v12, %v3059_v22  ;;  %v646_v21 = vsel %vm645_vm9, %v2704_v9, %v642_v16  ;;  %vm674_vm11 = vweird.f32 %v2706_v12 }
 0x2be   : > { %v911_v6 = vsel %vm403_vm2, %v906_v5, 0  ;;  %v651_v29 = vsel %vm648_vm10, %v650_v23, %v646_v21  ;;  %vm3078_vm14 = vmor %vm673_vm13, %vm674_vm11  ;;  %vm814_vm10 = vcmask 60416  }
 0x2bf   : > { %2502 = vmatmul.msk.bf16.vlgmr.msra.gmra.mxu2 %vm505_vm3, %v710_v30  ;;  %v670_v18 = vsub.f32 1.0, %v669_v14  ;;  %v652_v38 = vmul.f32 %v3001_v39, %v651_v29 }
 0x2c0   : > { %920 = vmatpush.bf16.xpose.msra.mxu2 %v911_v6 }
 0x2c1   : > { %v671_v24 = vmul.f32 %v2706_v12, %v670_v18  ;;  %v702_v48 = vpack.c.bf16 %v652_v38, %v652_v38 }
 0x2c3   : > { %v877_v7 = vpop.permute.xlu1 %876  ;;  %v672_v35 = vadd.f32 %v2706_v12, %v671_v24  ;;  %v758_v60 = vunpack.c.l.b16 %v702_v48 }
 0x2c4   : > { %v882_v8 = vsel %vm403_vm2, %v877_v7, 0 }
 0x2c5   : > { %891 = vmatpush.bf16.xpose.msra.mxu1 %v882_v8  ;;  %v676_v46 = vsel %vm3078_vm14, %v2706_v12, %v672_v35  ;;  %v875_v8 = vpop.permute.xlu2 %874 }
 0x2c6   : > { %v681_v53 = vsel %vm678_vm5, %v680_v49, %v676_v46  ;;  %v833_v46 = vld [vmem:[#allocation4 + $0x48] sm:$0xff] }
 0x2c7   : > { %v682_v61 = vmul.f32 %v3007_v44, %v681_v53 }
 0x2cb   : > { %v935_v33 = vpop.permute.xlu1 %934 }
 0x2cc   : > { %v940_v2 = vsel %vm403_vm2, %v935_v33, 0 }
 0x2cd   : > { %2510 = vmatmul.msk.bf16.vlgmr.msrb.gmra.mxu3 %vm403_vm2, %v846_v3  ;;  %v1330_v9 = vpop.permute.xlu2 %1329 }
 0x2ce   : > { %949 = vmatpush.bf16.xpose.msra.mxu3 %v940_v2 }
 0x2d3   : > { %v1212_v33 = vpop.permute.xlu1 %1211 }
 0x2d9   : > { %v571_v15 = vpop.xlane.xlu0 %570 }
 0x2da   : > { %2707 = vrcp.f32 %v571_v15  ;;  %v664_v32 = vand.u32 2147483648, %v571_v15  ;;  %v662_v37 = vand.u32 2147483647, %v571_v15  ;;  %vm658_vm15 = vweird.f32 %v571_v15 }
 0x2dc   : > { %v665_v45 = vor.u32 1.1754944e-38, %v664_v32  ;;  %vm663_vm4 = vcmp.eq.f32.partialorder %v662_v37, 8.507059e+37  ;;  %v838_v37 = vld [vmem:[#allocation4 + $0x70] sm:$0xff] }
 0x2e0   : > { %v2708_v20 = vpop.eup %2707 }
 0x2e1   : > { %v654_v25 = vmul.f32 %v2708_v20, %v571_v15  ;;  %v577_v28 = vpop.xlane.xlu0 %576  ;;  %vm659_vm12 = vweird.f32 %v2708_v20 }
 0x2e2   : > { %2709 = vrcp.f32 %v577_v28  ;;  %vm660_vm1 = vmor %vm658_vm15, %vm659_vm12  ;;  %v694_v54 = vand.u32 2147483648, %v577_v28  ;;  %v692_v57 = vand.u32 2147483647, %v577_v28  ;;  %vm688_vm7 = vweird.f32 %v577_v28 }
 0x2e3   : > { %v655_v31 = vsub.f32 1.0, %v654_v25 }
 0x2e4   : > { %v695_v63 = vor.u32 1.1754944e-38, %v694_v54  ;;  %vm693_vm9 = vcmp.eq.f32.partialorder %v692_v57, 8.507059e+37  ;;  %v839_v54 = vld [vmem:[#allocation4 + $0x78] sm:$0xff] }
 0x2e5   : > { %v656_v36 = vmul.f32 %v2708_v20, %v655_v31 }
 0x2e7   : > { %v657_v42 = vadd.f32 %v2708_v20, %v656_v36  ;;  %v834_v36 = vld [vmem:[#allocation4 + $0x50] sm:$0xff] }
 0x2e8   : > { %v2710_v43 = vpop.eup %2709 }
 0x2e9   : > { %v661_v47 = vsel %vm660_vm1, %v2708_v20, %v657_v42  ;;  %v684_v39 = vmul.f32 %v2710_v43, %v577_v28  ;;  %vm689_vm6 = vweird.f32 %v2710_v43  ;;  %v832_v20 = vld [vmem:[#allocation4 + $0x40] sm:$0xff] }
 0x2ea   : > { %v666_v50 = vsel %vm663_vm4, %v665_v45, %v661_v47  ;;  %vm690_vm8 = vmor %vm688_vm7, %vm689_vm6 }
 0x2eb   : > { %v667_v34 = vmul.f32 %v3023_v56, %v666_v50  ;;  %v685_v52 = vsub.f32 1.0, %v684_v39  ;;  %v704_v56 = vpack.c.bf16 %v682_v61, %v682_v61  ;;  %v835_v39 = vld [vmem:[#allocation4 + $0x58] sm:$0xff] }
 0x2ed   : > { %v703_v22 = vpack.c.bf16 %v667_v34, %v667_v34  ;;  %v686_v55 = vmul.f32 %v2710_v43, %v685_v52  ;;  %v783_v6 = vunpack.c.l.b16 %v704_v56 }
 0x2ef   : > { %v759_v62 = vunpack.c.l.b16 %v703_v22  ;;  %v687_v26 = vadd.f32 %v2710_v43, %v686_v55  ;;  %v836_v55 = vld [vmem:[#allocation4 + $0x60] sm:$0xff] }
 0x2f1   : > { %v691_v0 = vsel %vm690_vm8, %v2710_v43, %v687_v26  ;;  %v760_v1 = vpack.c.b16 %v759_v62, %v758_v60 }
 0x2f2   : > { %v696_v3 = vsel %vm693_vm9, %v695_v63, %v691_v0  ;;  %v837_v63 = vld [vmem:[#allocation4 + $0x68] sm:$0xff] }
 0x2f3   : > { %v697_v4 = vmul.f32 %v3030_v59, %v696_v3  ;;  %2504 = vmatmul.msk.bf16.vlgmr.msrb.gmra.mxu1 %vm505_vm3, %v760_v1  ;;  %v1335_v59 = vsel %vm403_vm2, %v1330_v9, 0 }
 0x2f4   : > { %v904_v5 = vpop.permute.xlu0 %903 }
 0x2f5   : > { %v705_v30 = vpack.c.bf16 %v697_v4, %v697_v4 }
 0x2f7   : > { %v784_v7 = vunpack.c.l.b16 %v705_v30 }
 0x2f9   : > { %v785_v44 = vpack.c.b16 %v784_v7, %v783_v6 }
 0x2fb   : > { %2505 = vmatmul.msk.bf16.vlgmr.msrb.gmra.mxu2 %vm505_vm3, %v785_v44 }
 0x2fc   : > { %1224 = vmatpush.bf16.msrb.mxu2 %v1212_v33  ;;  %v933_v2 = vpop.permute.xlu0 %932 }
 0x2fd   : > { %2525 = vmatmul.msk.bf16.vlgmr.msra.gmra.mxu3 %vm403_vm2, %v933_v2 }
 0x303   : > { %2515 = vmatmul.msk.bf16.vlgmr.msra.gmra.mxu1 %vm403_vm2, %v875_v8 }
 0x304   : > { %v1162_v10 = vpop.permute.xlu0 %1161 }
 0x305   : > { %1174 = vmatpush.bf16.msrb.mxu0 %v1162_v10 }
 0x309   : > { %1344 = vmatpush.bf16.xpose.msra.mxu0 %v1335_v59 }
 0x30b   : > { %2520 = vmatmul.msk.bf16.vlgmr.msra.gmra.mxu2 %vm403_vm2, %v904_v5 }
 0x30c   : > { %v1187_v11 = vpop.permute.xlu0 %1186 }
 0x30d   : > { %1199 = vmatpush.bf16.msrb.mxu1 %v1187_v11 }
 0x340   : > { %v751_v12 = vpop.f32.mrf.mxu3 }
 0x341   : > { %v808_v13 = vpack.c.bf16 %v751_v12, %v751_v12 }
 0x342   : > { %v726_v14 = vpop.f32.mrf.mxu2 }
 0x343   : > { %817 = vst.msk [vmem:[#allocation3 + $0x8] sm:$0xf] %vm814_vm10, %v808_v13  ;;  %v806_v15 = vpack.c.bf16 %v726_v14, %v726_v14 }
 0x345   : > { %815 = vst.msk [vmem:[#allocation3] sm:$0xf] %vm814_vm10, %v806_v15 }
 0x348   : > { %v753_v16 = vpop.f32.mrf.mxu3 }
 0x349   : > { %v809_v17 = vpack.c.bf16 %v753_v16, %v753_v16 }
 0x34a   : > { %v728_v18 = vpop.f32.mrf.mxu2 }
 0x34b   : > { %818 = vst.msk [vmem:[#allocation3 + $0xc] sm:$0xf] %vm814_vm10, %v809_v17  ;;  %v807_v19 = vpack.c.bf16 %v728_v18, %v728_v18 }
 0x34d   : > { %816 = vst.msk [vmem:[#allocation3 + $0x4] sm:$0xf] %vm814_vm10, %v807_v19 }
 0x350   : > { %v864_v21 = vpop.f32.mrf.mxu3 }
 0x351   : > { %v865_v23 = vadd.f32 %v864_v21, %v832_v20 }
 0x353   : > { %v956_v24 = vsel %vm505_vm3, %v865_v23, -inf }
 0x354   : > { %957 = vmax.xlane.f32.xlu2 %v956_v24 }
 0x358   : > { %v866_v29 = vpop.f32.mrf.mxu3 }
 0x359   : > { %v867_v48 = vadd.f32 %v866_v29, %v833_v46 }
 0x35b   : > { %v959_v53 = vsel %vm505_vm3, %v867_v48, -inf }
 0x370   : > { %v776_v25 = vpop.f32.mrf.mxu1 }
 0x371   : > { %v810_v28 = vpack.c.bf16 %v776_v25, %v776_v25 }
 0x373   : > { %819 = vst.msk [vmem:[#allocation3 + $0x10] sm:$0xf] %vm814_vm10, %v810_v28 }
 0x378   : > { %v778_v31 = vpop.f32.mrf.mxu1 }
 0x379   : > { %v811_v32 = vpack.c.bf16 %v778_v31, %v778_v31 }
 0x37b   : > { %820 = vst.msk [vmem:[#allocation3 + $0x14] sm:$0xf] %vm814_vm10, %v811_v32 }
 0x37e   : > { %v801_v35 = vpop.f32.mrf.mxu2 }
 0x37f   : > { %v812_v38 = vpack.c.bf16 %v801_v35, %v801_v35  ;;  %v3142_v35 = vld [vmem:[#allocation2 + $0x10] sm:$0xff] }
 0x380   : > { %v893_v27 = vpop.f32.mrf.mxu1  ;;  %v951_v40 = vpop.f32.mrf.mxu3 }
 0x381   : > { %821 = vst.msk [vmem:[#allocation3 + $0x18] sm:$0xf] %vm814_vm10, %v812_v38  ;;  %v894_v41 = vadd.f32 %v893_v27, %v834_v36  ;;  %v3102_v42 = vadd.f32 %v951_v40, %v838_v37  ;;  %v3146_v36 = vld [vmem:[#allocation2 + $0x8] sm:$0xff]  ;;  %v3155_v38 = vld [vmem:[#allocation2] sm:$0xff] }
 0x383   : > { %v962_v43 = vsel %vm505_vm3, %v894_v41, -inf  ;;  %v974_v45 = vsel %vm505_vm3, %v3102_v42, -inf }
 0x384   : > { %963 = vmax.xlane.f32.xlu1 %v962_v43  ;;  %975 = vmax.xlane.f32.xlu2 %v974_v45 }
 0x386   : > { %v803_v47 = vpop.f32.mrf.mxu2 }
 0x387   : > { %v813_v49 = vpack.c.bf16 %v803_v47, %v803_v47 }
 0x388   : > { %v895_v50 = vpop.f32.mrf.mxu1  ;;  %v953_v22 = vpop.f32.mrf.mxu3 }
 0x389   : > { %822 = vst.msk [vmem:[#allocation3 + $0x1c] sm:$0xf] %vm814_vm10, %v813_v49  ;;  %v896_v34 = vadd.f32 %v895_v50, %v835_v39  ;;  %v3110_v60 = vadd.f32 %v953_v22, %v839_v54 }
 0x38b   : > { %v965_v52 = vsel %vm505_vm3, %v896_v34, -inf  ;;  %v977_v26 = vsel %vm505_vm3, %v3110_v60, -inf }
 0x38c   : > { %966 = vmax.xlane.f32.xlu0 %v965_v52  ;;  %960 = vmax.xlane.f32.xlu1 %v959_v53 }
 0x38e   : > { %v922_v57 = vpop.f32.mrf.mxu2 }
 0x38f   : > { %v923_v61 = vadd.f32 %v922_v57, %v836_v55 }
 0x391   : > { %v968_v62 = vsel %vm505_vm3, %v923_v61, -inf }
 0x394   : > { %969 = vmax.xlane.f32.xlu0 %v968_v62  ;;  %978 = vmax.xlane.f32.xlu1 %v977_v26 }
 0x396   : > { %v924_v0 = vpop.f32.mrf.mxu2 }
 0x397   : > { %v925_v1 = vadd.f32 %v924_v0, %v837_v63 }
 0x399   : > { %v971_v3 = vsel %vm505_vm3, %v925_v1, -inf }
 0x39a   : > { %972 = vmax.xlane.f32.xlu2 %v971_v3 }
 0x3a8   : > { %1327 = vrot.lane.b32.xlu0 %v3028_v58, %s2859_s24 }
 0x3c7   : > { %v958_v56 = vpop.xlane.xlu2 %957 }
 0x3c8   : > { %v980_v4 = vsub.f32 %v865_v23, %v958_v56 }
 0x3ca   : > { %v988_v5 = vmul.f32 1.442695, %v980_v4 }
 0x3cc   : > { %2711 = vpow2.f32 %v988_v5 }
 0x3d2   : > { %v3118_v30 = vpop.eup %2711 }
 0x3d3   : > { %v1004_v6 = vsel %vm505_vm3, %v3118_v30, 0.0 }
 0x3d4   : > { %1005 = vadd.xlane.f32.xlu0 %v1004_v6 }
 0x3f7   : > { %v964_v7 = vpop.xlane.xlu1 %963  ;;  %v976_v14 = vpop.xlane.xlu2 %975 }
 0x3f8   : > { %v982_v8 = vsub.f32 %v894_v41, %v964_v7  ;;  %v986_v37 = vsub.f32 %v3102_v42, %v976_v14 }
 0x3fa   : > { %v992_v44 = vmul.f32 1.442695, %v982_v8  ;;  %v1000_v27 = vmul.f32 1.442695, %v986_v37 }
 0x3fc   : > { %2713 = vpow2.f32 %v992_v44 }
 0x3ff   : > { %v961_v33 = vpop.xlane.xlu1 %960  ;;  %v967_v2 = vpop.xlane.xlu0 %966 }
 0x400   : > { %v981_v9 = vsub.f32 %v867_v48, %v961_v33  ;;  %v983_v10 = vsub.f32 %v896_v34, %v967_v2  ;;  %v3172_v48 = vld [vmem:[#allocation2 + $0x18] sm:$0xff] }
 0x402   : > { %v3122_v59 = vpop.eup %2713  ;;  %v990_v11 = vmul.f32 1.442695, %v981_v9  ;;  %v994_v12 = vmul.f32 1.442695, %v983_v10 }
 0x403   : > { %v1010_v13 = vsel %vm505_vm3, %v3122_v59, 0.0 }
 0x404   : > { %2715 = vpow2.f32 %v990_v11  ;;  %1011 = vadd.xlane.f32.xlu2 %v1010_v13 }
 0x405   : > { %2717 = vpow2.f32 %v994_v12 }
 0x407   : > { %v970_v15 = vpop.xlane.xlu0 %969  ;;  %v979_v40 = vpop.xlane.xlu1 %978 }
 0x408   : > { %v984_v16 = vsub.f32 %v923_v61, %v970_v15  ;;  %v987_v41 = vsub.f32 %v3110_v60, %v979_v40 }
 0x40a   : > { %v3126_v17 = vpop.eup %2715  ;;  %v996_v18 = vmul.f32 1.442695, %v984_v16  ;;  %v1002_v43 = vmul.f32 1.442695, %v987_v41 }
 0x40b   : > { %v3128_v19 = vpop.eup %2717  ;;  %v1007_v20 = vsel %vm505_vm3, %v3126_v17, 0.0 }
 0x40c   : > { %1008 = vadd.xlane.f32.xlu2 %v1007_v20  ;;  %v1013_v21 = vsel %vm505_vm3, %v3128_v19, 0.0  ;;  %2719 = vpow2.f32 %v996_v18 }
 0x40d   : > { %1014 = vadd.xlane.f32.xlu1 %v1013_v21  ;;  %v973_v23 = vpop.xlane.xlu2 %972 }
 0x40e   : > { %v985_v24 = vsub.f32 %v925_v1, %v973_v23 }
 0x410   : > { %v998_v25 = vmul.f32 1.442695, %v985_v24 }
 0x412   : > { %2721 = vpow2.f32 %v998_v25  ;;  %v3134_v28 = vpop.eup %2719 }
 0x413   : > { %v1016_v29 = vsel %vm505_vm3, %v3134_v28, 0.0  ;;  %2723 = vpow2.f32 %v1000_v27 }
 0x414   : > { %2725 = vpow2.f32 %v1002_v43 }
 0x415   : > { %1017 = vadd.xlane.f32.xlu1 %v1016_v29 }
 0x418   : > { %v3138_v31 = vpop.eup %2721 }
 0x419   : > { %v1019_v32 = vsel %vm505_vm3, %v3138_v31, 0.0 }
 0x41a   : > { %1020 = vadd.xlane.f32.xlu0 %v1019_v32  ;;  %v3168_v47 = vpop.permute.xlu0 %1327 }
 0x424   : > { %1387 = vrot.lane.b32.xlu2 %v3142_v35, %s2858_s23 }
 0x42e   : > { %1236 = vrot.lane.b32.xlu1 %v3016_v51, %s2857_s22  ;;  %1358 = vrot.lane.b32.xlu0 %v3146_v36, %s2858_s23  ;;  %v3160_v51 = vpop.eup %2723 }
 0x42f   : > { %v1022_v45 = vsel %vm505_vm3, %v3160_v51, 0.0  ;;  %v3164_v42 = vpop.eup %2725 }
 0x430   : > { %v1025_v46 = vsel %vm505_vm3, %v3164_v42, 0.0 }
 0x436   : > { %1356 = vrot.lane.b32.xlu0 %v3146_v36, %s2859_s24 }
 0x43e   : > { %1811 = vrot.lane.b32.xlu0 %v3155_v38, %s2860_s25 }
 0x447   : > { %v1006_v39 = vpop.xlane.xlu0 %1005 }
 0x448   : > { %2727 = vrcp.f32 %v1006_v39  ;;  %v1039_v62 = vand.u32 2147483648, %v1006_v39  ;;  %vm1033_vm12 = vweird.f32 %v1006_v39  ;;  %v1037_v63 = vand.u32 2147483647, %v1006_v39 }
 0x44a   : > { %v1040_v6 = vor.u32 1.1754944e-38, %v1039_v62  ;;  %vm1038_vm4 = vcmp.eq.f32.partialorder %v1037_v63, 8.507059e+37 }
 0x44d   : > { %1023 = vadd.xlane.f32.xlu2 %v1022_v45 }
 0x44e   : > { %v2728_v49 = vpop.eup %2727 }
 0x44f   : > { %v1029_v50 = vmul.f32 %v2728_v49, %v1006_v39  ;;  %vm1034_vm11 = vweird.f32 %v2728_v49 }
 0x450   : > { %vm3180_vm14 = vmor %vm1033_vm12, %vm1034_vm11 }
 0x451   : > { %v1030_v52 = vsub.f32 1.0, %v1029_v50 }
 0x453   : > { %v1031_v54 = vmul.f32 %v2728_v49, %v1030_v52 }
 0x455   : > { %v1032_v61 = vadd.f32 %v2728_v49, %v1031_v54 }
 0x457   : > { %v1036_v56 = vsel %vm3180_vm14, %v2728_v49, %v1032_v61 }
 0x458   : > { %1026 = vadd.xlane.f32.xlu1 %v1025_v46  ;;  %v1041_v11 = vsel %vm1038_vm4, %v1040_v6, %v1036_v56 }
 0x459   : > { %v1042_v32 = vmul.f32 %v3118_v30, %v1041_v11 }
 0x45b   : > { %v1148_v30 = vpack.c.bf16 %v1042_v32, %v1042_v32 }
 0x465   : > { %1385 = vrot.lane.b32.xlu2 %v3142_v35, %s2859_s24 }
 0x46d   : > { %1414 = vrot.lane.b32.xlu2 %v3172_v48, %s2859_s24 }
 0x471   : > { %1416 = vrot.lane.b32.xlu1 %v3172_v48, %s2858_s23 }
 0x475   : > { %1643 = vrot.lane.b32.xlu2 %v3028_v58, %s2861_s26 }
 0x477   : > { %v1012_v34 = vpop.xlane.xlu2 %1011 }
 0x478   : > { %2729 = vrcp.f32 %v1012_v34  ;;  %v1069_v1 = vand.u32 2147483648, %v1012_v34  ;;  %vm1063_vm15 = vweird.f32 %v1012_v34  ;;  %v1067_v4 = vand.u32 2147483647, %v1012_v34 }
 0x47a   : > { %v1070_v12 = vor.u32 1.1754944e-38, %v1069_v1  ;;  %vm1068_vm5 = vcmp.eq.f32.partialorder %v1067_v4, 8.507059e+37 }
 0x47e   : > { %v2730_v53 = vpop.eup %2729 }
 0x47f   : > { %v1059_v22 = vmul.f32 %v2730_v53, %v1012_v34  ;;  %v1009_v55 = vpop.xlane.xlu2 %1008  ;;  %vm1064_vm13 = vweird.f32 %v2730_v53 }
 0x480   : > { %2731 = vrcp.f32 %v1009_v55  ;;  %v1015_v57 = vpop.xlane.xlu1 %1014  ;;  %vm3186_vm1 = vmor %vm1063_vm15, %vm1064_vm13  ;;  %v1052_v14 = vand.u32 2147483647, %v1009_v55  ;;  %v1054_v15 = vand.u32 2147483648, %v1009_v55  ;;  %vm1048_vm8 = vweird.f32 %v1009_v55 }
 0x481   : > { %v1060_v60 = vsub.f32 1.0, %v1059_v22  ;;  %2733 = vrcp.f32 %v1015_v57  ;;  %v1084_v21 = vand.u32 2147483648, %v1015_v57  ;;  %v1082_v24 = vand.u32 2147483647, %v1015_v57 }
 0x482   : > { %vm1078_vm9 = vweird.f32 %v1015_v57  ;;  %v1055_v27 = vor.u32 1.1754944e-38, %v1054_v15  ;;  %vm1053_vm11 = vcmp.eq.f32.partialorder %v1052_v14, 8.507059e+37 }
 0x483   : > { %v1061_v26 = vmul.f32 %v2730_v53, %v1060_v60  ;;  %v1085_v45 = vor.u32 1.1754944e-38, %v1084_v21  ;;  %vm1083_vm13 = vcmp.eq.f32.partialorder %v1082_v24, 8.507059e+37 }
 0x485   : > { %v1062_v0 = vadd.f32 %v2730_v53, %v1061_v26  ;;  %v1158_v26 = vunpack.c.l.b16 %v1148_v30 }
 0x486   : > { %v2732_v3 = vpop.eup %2731 }
 0x487   : > { %v2734_v5 = vpop.eup %2733  ;;  %v1044_v8 = vmul.f32 %v2732_v3, %v1009_v55  ;;  %v1388_v44 = vpop.permute.xlu2 %1387  ;;  %v1066_v33 = vsel %vm3186_vm1, %v2730_v53, %v1062_v0  ;;  %vm1049_vm6 = vweird.f32 %v2732_v3 }
 0x488   : > { %v1074_v2 = vmul.f32 %v2734_v5, %v1015_v57  ;;  %v1393_v9 = vsel %vm403_vm2, %v1388_v44, 0  ;;  %v1018_v10 = vpop.xlane.xlu1 %1017  ;;  %v1071_v18 = vsel %vm1068_vm5, %v1070_v12, %v1066_v33  ;;  %vm1079_vm7 = vweird.f32 %v2734_v5  ;;  %vm1050_vm10 = vmor %vm1048_vm8, %vm1049_vm6 }
 0x489   : > { %v1045_v13 = vsub.f32 1.0, %v1044_v8  ;;  %2735 = vrcp.f32 %v1018_v10  ;;  %1402 = vmatpush.bf16.xpose.msra.mxu2 %v1393_v9  ;;  %v1072_v37 = vmul.f32 %v3122_v59, %v1071_v18  ;;  %vm1080_vm12 = vmor %vm1078_vm9, %vm1079_vm7  ;;  %v1099_v54 = vand.u32 2147483648, %v1018_v10 }
 0x48a   : > { %v1075_v16 = vsub.f32 1.0, %v1074_v2  ;;  %v1097_v61 = vand.u32 2147483647, %v1018_v10  ;;  %vm1093_vm15 = vweird.f32 %v1018_v10 }
 0x48b   : > { %v1046_v20 = vmul.f32 %v2732_v3, %v1045_v13  ;;  %v1150_v52 = vpack.c.bf16 %v1072_v37, %v1072_v37 }
 0x48c   : > { %v1076_v23 = vmul.f32 %v2734_v5, %v1075_v16  ;;  %vm1098_vm4 = vcmp.eq.f32.partialorder %v1097_v61, 8.507059e+37 }
 0x48d   : > { %v1047_v25 = vadd.f32 %v2732_v3, %v1046_v20  ;;  %v1021_v29 = vpop.xlane.xlu0 %1020  ;;  %v1183_v58 = vunpack.c.l.b16 %v1150_v52 }
 0x48e   : > { %v1077_v40 = vadd.f32 %v2734_v5, %v1076_v23  ;;  %2737 = vrcp.f32 %v1021_v29  ;;  %v1114_v4 = vand.u32 2147483648, %v1021_v29  ;;  %v1112_v8 = vand.u32 2147483647, %v1021_v29 }
 0x48f   : > { %v2736_v41 = vpop.eup %2735  ;;  %v1051_v43 = vsel %vm1050_vm10, %v2732_v3, %v1047_v25  ;;  %vm1108_vm6 = vweird.f32 %v1021_v29 }
 0x490   : > { %v1056_v46 = vsel %vm1053_vm11, %v1055_v27, %v1051_v43  ;;  %v1081_v39 = vsel %vm1080_vm12, %v2734_v5, %v1077_v40  ;;  %v1089_v49 = vmul.f32 %v2736_v41, %v1018_v10  ;;  %vm1094_vm14 = vweird.f32 %v2736_v41 }
 0x491   : > { %v1086_v50 = vsel %vm1083_vm13, %v1085_v45, %v1081_v39  ;;  %v1057_v34 = vmul.f32 %v3126_v17, %v1056_v46  ;;  %vm1095_vm1 = vmor %vm1093_vm15, %vm1094_vm14  ;;  %v1100_v17 = vor.u32 1.1754944e-38, %v1099_v54  ;;  %v1115_v2 = vor.u32 1.1754944e-38, %v1114_v4 }
 0x492   : > { %v1087_v59 = vmul.f32 %v3128_v19, %v1086_v50  ;;  %v1090_v53 = vsub.f32 1.0, %v1089_v49  ;;  %vm1113_vm8 = vcmp.eq.f32.partialorder %v1112_v8, 8.507059e+37 }
 0x493   : > { %v1149_v22 = vpack.c.bf16 %v1057_v34, %v1057_v34 }
 0x494   : > { %v2738_v55 = vpop.eup %2737  ;;  %v1151_v57 = vpack.c.bf16 %v1087_v59, %v1087_v59  ;;  %v1091_v60 = vmul.f32 %v2736_v41, %v1090_v53 }
 0x495   : > { %v1104_v62 = vmul.f32 %v2738_v55, %v1021_v29  ;;  %v1159_v63 = vunpack.c.l.b16 %v1149_v22  ;;  %vm1109_vm5 = vweird.f32 %v2738_v55 }
 0x496   : > { %v1184_v0 = vunpack.c.l.b16 %v1151_v57  ;;  %v1092_v1 = vadd.f32 %v2736_v41, %v1091_v60  ;;  %vm1110_vm7 = vmor %vm1108_vm6, %vm1109_vm5 }
 0x497   : > { %v1105_v3 = vsub.f32 1.0, %v1104_v62  ;;  %v1160_v56 = vpack.c.b16 %v1159_v63, %v1158_v26 }
 0x498   : > { %v1096_v19 = vsel %vm1095_vm1, %v2736_v41, %v1092_v1  ;;  %v1185_v5 = vpack.c.b16 %v1184_v0, %v1183_v58 }
 0x499   : > { %v1101_v6 = vsel %vm1098_vm4, %v1100_v17, %v1096_v19  ;;  %v1106_v7 = vmul.f32 %v2738_v55, %v1105_v3  ;;  %2526 = vmatmul.msk.bf16.vlgmr.msrb.gmra.mxu0 %vm505_vm3, %v1160_v56 }
 0x49a   : > { %2527 = vmatmul.msk.bf16.vlgmr.msrb.gmra.mxu1 %vm505_vm3, %v1185_v5  ;;  %v1102_v44 = vmul.f32 %v3134_v28, %v1101_v6  ;;  %v1316_v5 = vld [vmem:[#allocation4 + $0x90] sm:$0xff] }
 0x49b   : > { %v1107_v33 = vadd.f32 %v2738_v55, %v1106_v7 }
 0x49c   : > { %v1152_v11 = vpack.c.bf16 %v1102_v44, %v1102_v44 }
 0x49d   : > { %v1111_v9 = vsel %vm1110_vm7, %v2738_v55, %v1107_v33 }
 0x49e   : > { %v1116_v10 = vsel %vm1113_vm8, %v1115_v2, %v1111_v9  ;;  %v1208_v18 = vunpack.c.l.b16 %v1152_v11  ;;  %v1315_v9 = vld [vmem:[#allocation4 + $0x88] sm:$0xff] }
 0x49f   : > { %v1117_v12 = vmul.f32 %v3138_v31, %v1116_v10  ;;  %v1317_v10 = vld [vmem:[#allocation4 + $0x98] sm:$0xff] }
 0x4a0   : > { %v1237_v13 = vpop.permute.xlu1 %1236  ;;  %v1359_v14 = vpop.permute.xlu0 %1358 }
 0x4a1   : > { %v1153_v15 = vpack.c.bf16 %v1117_v12, %v1117_v12  ;;  %1249 = vmatpush.bf16.msrb.mxu3 %v1237_v13  ;;  %v1364_v16 = vsel %vm403_vm2, %v1359_v14, 0 }
 0x4a2   : > { %1373 = vmatpush.bf16.xpose.msra.mxu1 %v1364_v16 }
 0x4a3   : > { %v1209_v20 = vunpack.c.l.b16 %v1153_v15 }
 0x4a5   : > { %v1210_v28 = vpack.c.b16 %v1209_v20, %v1208_v18 }
 0x4a7   : > { %2528 = vmatmul.msk.bf16.vlgmr.msrb.gmra.mxu2 %vm505_vm3, %v1210_v28  ;;  %v1318_v28 = vld [vmem:[#allocation4 + $0xa0] sm:$0xff] }
 0x4a8   : > { %v1357_v21 = vpop.permute.xlu0 %1356 }
 0x4a9   : > { %2534 = vmatmul.msk.bf16.vlgmr.msra.gmra.mxu0 %vm403_vm2, %v3168_v47 }
 0x4aa   : > { %2539 = vmatmul.msk.bf16.vlgmr.msra.gmra.mxu1 %vm403_vm2, %v1357_v21 }
 0x4b0   : > { %v1812_v50 = vpop.permute.xlu0 %1811 }
 0x4b1   : > { %v1817_v54 = vsel %vm403_vm2, %v1812_v50, 0 }
 0x4c0   : > { %v1024_v23 = vpop.xlane.xlu2 %1023 }
 0x4c1   : > { %2739 = vrcp.f32 %v1024_v23  ;;  %v1129_v40 = vand.u32 2147483648, %v1024_v23  ;;  %vm1123_vm10 = vweird.f32 %v1024_v23  ;;  %v1127_v43 = vand.u32 2147483647, %v1024_v23 }
 0x4c3   : > { %v1130_v39 = vor.u32 1.1754944e-38, %v1129_v40  ;;  %vm1128_vm12 = vcmp.eq.f32.partialorder %v1127_v43, 8.507059e+37  ;;  %v1320_v40 = vld [vmem:[#allocation4 + $0xb0] sm:$0xff] }
 0x4c7   : > { %v2740_v31 = vpop.eup %2739 }
 0x4c8   : > { %v1119_v24 = vmul.f32 %v2740_v31, %v1024_v23  ;;  %v1386_v25 = vpop.permute.xlu2 %1385  ;;  %vm1124_vm9 = vweird.f32 %v2740_v31 }
 0x4c9   : > { %2544 = vmatmul.msk.bf16.vlgmr.msra.gmra.mxu2 %vm403_vm2, %v1386_v25  ;;  %vm1125_vm11 = vmor %vm1123_vm10, %vm1124_vm9 }
 0x4ca   : > { %v1120_v29 = vsub.f32 1.0, %v1119_v24  ;;  %v1319_v24 = vld [vmem:[#allocation4 + $0xa8] sm:$0xff] }
 0x4cb   : > { %v1027_v32 = vpop.xlane.xlu1 %1026 }
 0x4cc   : > { %v1121_v37 = vmul.f32 %v2740_v31, %v1120_v29  ;;  %2741 = vrcp.f32 %v1027_v32  ;;  %v1144_v30 = vand.u32 2147483648, %v1027_v32  ;;  %v1142_v59 = vand.u32 2147483647, %v1027_v32 }
 0x4cd   : > { %vm1138_vm14 = vweird.f32 %v1027_v32 }
 0x4ce   : > { %v1122_v27 = vadd.f32 %v2740_v31, %v1121_v37  ;;  %v1145_v57 = vor.u32 1.1754944e-38, %v1144_v30  ;;  %vm1143_vm1 = vcmp.eq.f32.partialorder %v1142_v59, 8.507059e+37 }
 0x4d0   : > { %v1415_v41 = vpop.permute.xlu2 %1414  ;;  %v1126_v45 = vsel %vm1125_vm11, %v2740_v31, %v1122_v27 }
 0x4d1   : > { %v1131_v34 = vsel %vm1128_vm12, %v1130_v39, %v1126_v45  ;;  %v1321_v45 = vld [vmem:[#allocation4 + $0xb8] sm:$0xff] }
 0x4d2   : > { %v2742_v47 = vpop.eup %2741  ;;  %v1132_v22 = vmul.f32 %v3160_v51, %v1131_v34 }
 0x4d3   : > { %v1134_v46 = vmul.f32 %v2742_v47, %v1027_v32  ;;  %vm1139_vm13 = vweird.f32 %v2742_v47 }
 0x4d4   : > { %vm1140_vm15 = vmor %vm1138_vm14, %vm1139_vm13  ;;  %v1154_v62 = vpack.c.bf16 %v1132_v22, %v1132_v22 }
 0x4d5   : > { %v1135_v49 = vsub.f32 1.0, %v1134_v46 }
 0x4d6   : > { %v1233_v58 = vunpack.c.l.b16 %v1154_v62 }
 0x4d7   : > { %v1136_v52 = vmul.f32 %v2742_v47, %v1135_v49 }
 0x4d8   : > { %v1644_v53 = vpop.permute.xlu2 %1643 }
 0x4d9   : > { %v1137_v55 = vadd.f32 %v2742_v47, %v1136_v52  ;;  %1656 = vmatpush.bf16.msrb.mxu0 %v1644_v53 }
 0x4db   : > { %v1141_v60 = vsel %vm1140_vm15, %v2742_v47, %v1137_v55 }
 0x4dc   : > { %v1146_v61 = vsel %vm1143_vm1, %v1145_v57, %v1141_v60 }
 0x4dd   : > { %1826 = vmatpush.bf16.xpose.msra.mxu0 %v1817_v54  ;;  %v1147_v26 = vmul.f32 %v3164_v42, %v1146_v61  ;;  %v1314_v42 = vld [vmem:[#allocation4 + $0x80] sm:$0xff] }
 0x4df   : > { %v1155_v63 = vpack.c.bf16 %v1147_v26, %v1147_v26  ;;  %v3256_v26 = vld [vmem:[#allocation2 + $0x8] sm:$0xff] }
 0x4e1   : > { %v1234_v0 = vunpack.c.l.b16 %v1155_v63 }
 0x4e3   : > { %v1417_v1 = vpop.permute.xlu1 %1416  ;;  %v1235_v17 = vpack.c.b16 %v1234_v0, %v1233_v58 }
 0x4e4   : > { %v1422_v3 = vsel %vm403_vm2, %v1417_v1, 0 }
 0x4e5   : > { %2529 = vmatmul.msk.bf16.vlgmr.msrb.gmra.mxu3 %vm505_vm3, %v1235_v17 }
 0x4e6   : > { %1431 = vmatpush.bf16.xpose.msra.mxu3 %v1422_v3 }
 0x4f5   : > { %2549 = vmatmul.msk.bf16.vlgmr.msra.gmra.mxu3 %vm403_vm2, %v1415_v41 }
 0x516   : > { %v3214_v51 = vpop.f32.mrf.mxu0 }
 0x517   : > { %v3216_v56 = vpop.f32.mrf.mxu1 }
 0x51e   : > { %v3218_v19 = vpop.f32.mrf.mxu0 }
 0x51f   : > { %v3220_v4 = vpop.f32.mrf.mxu1 }
 0x526   : > { %v1346_v6 = vpop.f32.mrf.mxu0 }
 0x527   : > { %v1347_v7 = vadd.f32 %v1346_v6, %v1314_v42  ;;  %v1375_v8 = vpop.f32.mrf.mxu1 }
 0x528   : > { %v1376_v44 = vadd.f32 %v1375_v8, %v1316_v5 }
 0x529   : > { %v1438_v33 = vsel %vm505_vm3, %v1347_v7, -inf }
 0x52a   : > { %1439 = vmax.xlane.f32.xlu0 %v1438_v33  ;;  %v1444_v2 = vsel %vm505_vm3, %v1376_v44, -inf  ;;  %v3226_v18 = vpop.f32.mrf.mxu2 }
 0x52b   : > { %1445 = vmax.xlane.f32.xlu2 %v1444_v2 }
 0x52e   : > { %v1348_v11 = vpop.f32.mrf.mxu0 }
 0x52f   : > { %v1349_v12 = vadd.f32 %v1348_v11, %v1315_v9  ;;  %v1377_v13 = vpop.f32.mrf.mxu1 }
 0x530   : > { %v1378_v14 = vadd.f32 %v1377_v13, %v1317_v10 }
 0x531   : > { %v1441_v15 = vsel %vm505_vm3, %v1349_v12, -inf }
 0x532   : > { %1442 = vmax.xlane.f32.xlu1 %v1441_v15  ;;  %v1447_v16 = vsel %vm505_vm3, %v1378_v14, -inf  ;;  %v3228_v20 = vpop.f32.mrf.mxu2 }
 0x533   : > { %1448 = vmax.xlane.f32.xlu0 %v1447_v16  ;;  %v3274_v16 = vld [vmem:[#allocation2 + $0x10] sm:$0xff] }
 0x54c   : > { %v1404_v21 = vpop.f32.mrf.mxu2 }
 0x54d   : > { %v1405_v23 = vadd.f32 %v1404_v21, %v1318_v28 }
 0x54f   : > { %v1450_v31 = vsel %vm505_vm3, %v1405_v23, -inf }
 0x550   : > { %1451 = vmax.xlane.f32.xlu1 %v1450_v31 }
 0x554   : > { %v1406_v25 = vpop.f32.mrf.mxu2 }
 0x555   : > { %v1407_v29 = vadd.f32 %v1406_v25, %v1319_v24  ;;  %v3288_v24 = vld [vmem:[#allocation2 + $0x18] sm:$0xff] }
 0x557   : > { %v1453_v32 = vsel %vm505_vm3, %v1407_v29, -inf }
 0x558   : > { %1454 = vmax.xlane.f32.xlu2 %v1453_v32 }
 0x568   : > { %v3232_v37 = vpop.f32.mrf.mxu3 }
 0x570   : > { %v3234_v27 = vpop.f32.mrf.mxu3 }
 0x578   : > { %v1433_v41 = vpop.f32.mrf.mxu3 }
 0x579   : > { %v1434_v43 = vadd.f32 %v1433_v41, %v1320_v40 }
 0x57b   : > { %v1456_v47 = vsel %vm505_vm3, %v1434_v43, -inf }
 0x57c   : > { %1457 = vmax.xlane.f32.xlu0 %v1456_v47 }
 0x580   : > { %v1435_v46 = vpop.f32.mrf.mxu3 }
 0x581   : > { %v1436_v39 = vadd.f32 %v1435_v46, %v1321_v45 }
 0x583   : > { %v1459_v49 = vsel %vm505_vm3, %v1436_v39, -inf }
 0x584   : > { %1460 = vmax.xlane.f32.xlu1 %v1459_v49 }
 0x590   : > { %1809 = vrot.lane.b32.xlu0 %v3155_v38, %s2862_s27 }
 0x59d   : > { %1668 = vrot.lane.b32.xlu1 %v3146_v36, %s2861_s26  ;;  %v1440_v50 = vpop.xlane.xlu0 %1439 }
 0x59e   : > { %v1462_v34 = vsub.f32 %v1347_v7, %v1440_v50  ;;  %v1446_v55 = vpop.xlane.xlu2 %1445 }
 0x59f   : > { %v1464_v57 = vsub.f32 %v1376_v44, %v1446_v55 }
 0x5a0   : > { %v1470_v30 = vmul.f32 1.442695, %v1462_v34 }
 0x5a1   : > { %v1474_v60 = vmul.f32 1.442695, %v1464_v57 }
 0x5a2   : > { %2743 = vpow2.f32 %v1470_v30 }
 0x5a5   : > { %v1443_v52 = vpop.xlane.xlu1 %1442 }
 0x5a6   : > { %v1463_v53 = vsub.f32 %v1349_v12, %v1443_v52  ;;  %v1449_v63 = vpop.xlane.xlu0 %1448 }
 0x5a7   : > { %v1465_v58 = vsub.f32 %v1378_v14, %v1449_v63 }
 0x5a8   : > { %v3242_v59 = vpop.eup %2743  ;;  %v1472_v22 = vmul.f32 1.442695, %v1463_v53 }
 0x5a9   : > { %v1486_v54 = vsel %vm505_vm3, %v3242_v59, 0.0  ;;  %v1476_v0 = vmul.f32 1.442695, %v1465_v58 }
 0x5aa   : > { %1487 = vadd.xlane.f32.xlu2 %v1486_v54  ;;  %2745 = vpow2.f32 %v1472_v22 }
 0x5ab   : > { %2747 = vpow2.f32 %v1474_v60 }
 0x5ac   : > { %2749 = vpow2.f32 %v1476_v0 }
 0x5b0   : > { %v3246_v38 = vpop.eup %2745 }
 0x5b1   : > { %v1489_v36 = vsel %vm505_vm3, %v3246_v38, 0.0  ;;  %v3252_v61 = vpop.eup %2747 }
 0x5b2   : > { %v1492_v62 = vsel %vm505_vm3, %v3252_v61, 0.0  ;;  %v3260_v3 = vpop.eup %2749 }
 0x5b3   : > { %v1495_v42 = vsel %vm505_vm3, %v3260_v3, 0.0 }
 0x5ba   : > { %1490 = vadd.xlane.f32.xlu0 %v1489_v36 }
 0x5c2   : > { %1693 = vrot.lane.b32.xlu2 %v3142_v35, %s2861_s26 }
 0x5c3   : > { %v1452_v1 = vpop.xlane.xlu1 %1451 }
 0x5c4   : > { %v1466_v17 = vsub.f32 %v1405_v23, %v1452_v1 }
 0x5c6   : > { %v1478_v35 = vmul.f32 1.442695, %v1466_v17 }
 0x5c7   : > { %1493 = vadd.xlane.f32.xlu1 %v1492_v62 }
 0x5c8   : > { %2751 = vpow2.f32 %v1478_v35 }
 0x5cb   : > { %v1455_v5 = vpop.xlane.xlu2 %1454 }
 0x5cc   : > { %v1467_v8 = vsub.f32 %v1407_v29, %v1455_v5 }
 0x5ce   : > { %1840 = vrot.lane.b32.xlu0 %v3256_v26, %s2860_s25  ;;  %v3264_v33 = vpop.eup %2751  ;;  %v1480_v2 = vmul.f32 1.442695, %v1467_v8 }
 0x5cf   : > { %v1498_v10 = vsel %vm505_vm3, %v3264_v33, 0.0 }
 0x5eb   : > { %1496 = vadd.xlane.f32.xlu2 %v1495_v42 }
 0x5ef   : > { %v1458_v6 = vpop.xlane.xlu0 %1457 }
 0x5f0   : > { %v1468_v7 = vsub.f32 %v1434_v43, %v1458_v6 }
 0x5f2   : > { %v1482_v44 = vmul.f32 1.442695, %v1468_v7 }
 0x5f4   : > { %2753 = vpow2.f32 %v1482_v44 }
 0x5f5   : > { %2755 = vpow2.f32 %v1480_v2 }
 0x5f7   : > { %v1461_v9 = vpop.xlane.xlu1 %1460 }
 0x5f8   : > { %1499 = vadd.xlane.f32.xlu0 %v1498_v10  ;;  %v1469_v12 = vsub.f32 %v1436_v39, %v1461_v9 }
 0x5fa   : > { %v3268_v11 = vpop.eup %2753  ;;  %v1484_v14 = vmul.f32 1.442695, %v1469_v12 }
 0x5fb   : > { %v1504_v13 = vsel %vm505_vm3, %v3268_v11, 0.0  ;;  %v3272_v15 = vpop.eup %2755 }
 0x5fc   : > { %1505 = vadd.xlane.f32.xlu1 %v1504_v13  ;;  %2757 = vpow2.f32 %v1484_v14  ;;  %v1501_v28 = vsel %vm505_vm3, %v3272_v15, 0.0 }
 0x602   : > { %v3280_v21 = vpop.eup %2757  ;;  %v1810_v29 = vpop.permute.xlu0 %1809 }
 0x603   : > { %1869 = vrot.lane.b32.xlu2 %v3274_v16, %s2860_s25  ;;  %v1507_v23 = vsel %vm505_vm3, %v3280_v21, 0.0 }
 0x604   : > { %1502 = vadd.xlane.f32.xlu1 %v1501_v28 }
 0x60b   : > { %1718 = vrot.lane.b32.xlu2 %v3172_v48, %s2861_s26 }
 0x60c   : > { %1838 = vrot.lane.b32.xlu0 %v3256_v26, %s2862_s27  ;;  %1508 = vadd.xlane.f32.xlu1 %v1507_v23 }
 0x60f   : > { %v1669_v31 = vpop.permute.xlu1 %1668 }
 0x610   : > { %1681 = vmatpush.bf16.msrb.mxu1 %v1669_v31 }
 0x613   : > { %1896 = vrot.lane.b32.xlu2 %v3288_v24, %s2862_s27 }
 0x614   : > { %1898 = vrot.lane.b32.xlu0 %v3288_v24, %s2860_s25 }
 0x61d   : > { %v1488_v25 = vpop.xlane.xlu2 %1487 }
 0x61e   : > { %2759 = vrcp.f32 %v1488_v25  ;;  %v1521_v46 = vand.u32 2147483648, %v1488_v25  ;;  %vm1515_vm5 = vweird.f32 %v1488_v25  ;;  %v1519_v39 = vand.u32 2147483647, %v1488_v25 }
 0x620   : > { %v1522_v30 = vor.u32 1.1754944e-38, %v1521_v46  ;;  %vm1520_vm7 = vcmp.eq.f32.partialorder %v1519_v39, 8.507059e+37 }
 0x624   : > { %v2760_v48 = vpop.eup %2759 }
 0x625   : > { %v1511_v32 = vmul.f32 %v2760_v48, %v1488_v25  ;;  %1867 = vrot.lane.b32.xlu1 %v3274_v16, %s2862_s27  ;;  %v1694_v40 = vpop.permute.xlu2 %1693  ;;  %vm1516_vm4 = vweird.f32 %v2760_v48 }
 0x626   : > { %1706 = vmatpush.bf16.msrb.mxu2 %v1694_v40  ;;  %vm1517_vm6 = vmor %vm1515_vm5, %vm1516_vm4 }
 0x627   : > { %v1512_v41 = vsub.f32 1.0, %v1511_v32 }
 0x629   : > { %v1513_v43 = vmul.f32 %v2760_v48, %v1512_v41 }
 0x62b   : > { %v1514_v45 = vadd.f32 %v2760_v48, %v1513_v43 }
 0x62d   : > { %v1491_v47 = vpop.xlane.xlu0 %1490  ;;  %v1518_v50 = vsel %vm1517_vm6, %v2760_v48, %v1514_v45 }
 0x62e   : > { %2761 = vrcp.f32 %v1491_v47  ;;  %v1523_v53 = vsel %vm1520_vm7, %v1522_v30, %v1518_v50  ;;  %v1536_v54 = vand.u32 2147483648, %v1491_v47  ;;  %v1534_v55 = vand.u32 2147483647, %v1491_v47 }
 0x62f   : > { %v1524_v57 = vmul.f32 %v3242_v59, %v1523_v53  ;;  %vm1530_vm9 = vweird.f32 %v1491_v47 }
 0x630   : > { %v1537_v36 = vor.u32 1.1754944e-38, %v1536_v54  ;;  %vm1535_vm11 = vcmp.eq.f32.partialorder %v1534_v55, 8.507059e+37 }
 0x631   : > { %v1630_v58 = vpack.c.bf16 %v1524_v57, %v1524_v57 }
 0x633   : > { %v1640_v42 = vunpack.c.l.b16 %v1630_v58 }
 0x634   : > { %v2762_v49 = vpop.eup %2761 }
 0x635   : > { %v1526_v34 = vmul.f32 %v2762_v49, %v1491_v47  ;;  %vm1531_vm8 = vweird.f32 %v2762_v49 }
 0x636   : > { %vm1532_vm10 = vmor %vm1530_vm9, %vm1531_vm8 }
 0x637   : > { %v1527_v52 = vsub.f32 1.0, %v1526_v34 }
 0x639   : > { %v1528_v22 = vmul.f32 %v2762_v49, %v1527_v52 }
 0x63a   : > { %v1494_v59 = vpop.xlane.xlu1 %1493 }
 0x63b   : > { %v1529_v60 = vadd.f32 %v2762_v49, %v1528_v22  ;;  %2763 = vrcp.f32 %v1494_v59  ;;  %v1551_v10 = vand.u32 2147483648, %v1494_v59  ;;  %vm1545_vm13 = vweird.f32 %v1494_v59 }
 0x63c   : > { %v1549_v12 = vand.u32 2147483647, %v1494_v59 }
 0x63d   : > { %v1533_v62 = vsel %vm1532_vm10, %v2762_v49, %v1529_v60  ;;  %v1552_v31 = vor.u32 1.1754944e-38, %v1551_v10 }
 0x63e   : > { %v1538_v63 = vsel %vm1535_vm11, %v1537_v36, %v1533_v62  ;;  %vm1550_vm15 = vcmp.eq.f32.partialorder %v1549_v12, 8.507059e+37 }
 0x63f   : > { %v1539_v0 = vmul.f32 %v3246_v38, %v1538_v63 }
 0x640   : > { %v1841_v1 = vpop.permute.xlu0 %1840 }
 0x641   : > { %v1631_v17 = vpack.c.bf16 %v1539_v0, %v1539_v0  ;;  %v1846_v35 = vsel %vm403_vm2, %v1841_v1, 0  ;;  %v2764_v7 = vpop.eup %2763 }
 0x642   : > { %1855 = vmatpush.bf16.xpose.msra.mxu1 %v1846_v35  ;;  %v1541_v8 = vmul.f32 %v2764_v7, %v1494_v59  ;;  %vm1546_vm12 = vweird.f32 %v2764_v7 }
 0x643   : > { %v1641_v5 = vunpack.c.l.b16 %v1631_v17  ;;  %vm1547_vm14 = vmor %vm1545_vm13, %vm1546_vm12 }
 0x644   : > { %v1542_v44 = vsub.f32 1.0, %v1541_v8 }
 0x645   : > { %v1642_v6 = vpack.c.b16 %v1641_v5, %v1640_v42 }
 0x646   : > { %v1543_v2 = vmul.f32 %v2764_v7, %v1542_v44 }
 0x647   : > { %2550 = vmatmul.msk.bf16.vlgmr.msrb.gmra.mxu0 %vm505_vm3, %v1642_v6 }
 0x648   : > { %v1544_v38 = vadd.f32 %v2764_v7, %v1543_v2 }
 0x64a   : > { %v1548_v14 = vsel %vm1547_vm14, %v2764_v7, %v1544_v38 }
 0x657   : > { %2558 = vmatmul.msk.bf16.vlgmr.msra.gmra.mxu0 %vm403_vm2, %v1810_v29  ;;  %v1553_v29 = vsel %vm1550_vm15, %v1552_v31, %v1548_v14 }
 0x658   : > { %v1554_v47 = vmul.f32 %v3252_v61, %v1553_v29 }
 0x65a   : > { %v1632_v30 = vpack.c.bf16 %v1554_v47, %v1554_v47 }
 0x65c   : > { %v1665_v22 = vunpack.c.l.b16 %v1632_v30 }
 0x65e   : > { %v1497_v9 = vpop.xlane.xlu2 %1496 }
 0x65f   : > { %2765 = vrcp.f32 %v1497_v9  ;;  %v1566_v32 = vand.u32 2147483648, %v1497_v9  ;;  %v1564_v41 = vand.u32 2147483647, %v1497_v9  ;;  %vm1560_vm4 = vweird.f32 %v1497_v9 }
 0x661   : > { %v1567_v46 = vor.u32 1.1754944e-38, %v1566_v32  ;;  %vm1565_vm6 = vcmp.eq.f32.partialorder %v1564_v41, 8.507059e+37 }
 0x665   : > { %v2766_v13 = vpop.eup %2765 }
 0x666   : > { %v1556_v28 = vmul.f32 %v2766_v13, %v1497_v9  ;;  %v1870_v23 = vpop.permute.xlu2 %1869  ;;  %vm1561_vm1 = vweird.f32 %v2766_v13 }
 0x667   : > { %v1875_v25 = vsel %vm403_vm2, %v1870_v23, 0  ;;  %vm1562_vm5 = vmor %vm1560_vm4, %vm1561_vm1 }
 0x668   : > { %v1557_v48 = vsub.f32 1.0, %v1556_v28  ;;  %1884 = vmatpush.bf16.xpose.msra.mxu2 %v1875_v25 }
 0x66a   : > { %v1558_v40 = vmul.f32 %v2766_v13, %v1557_v48 }
 0x66b   : > { %v1500_v43 = vpop.xlane.xlu0 %1499 }
 0x66c   : > { %v1559_v45 = vadd.f32 %v2766_v13, %v1558_v40  ;;  %2767 = vrcp.f32 %v1500_v43  ;;  %v1581_v1 = vand.u32 2147483648, %v1500_v43  ;;  %vm1575_vm8 = vweird.f32 %v1500_v43 }
 0x66d   : > { %v1579_v17 = vand.u32 2147483647, %v1500_v43 }
 0x66e   : > { %v1563_v39 = vsel %vm1562_vm5, %v2766_v13, %v1559_v45  ;;  %v1719_v49 = vpop.permute.xlu2 %1718  ;;  %v1582_v8 = vor.u32 1.1754944e-38, %v1581_v1 }
 0x66f   : > { %v1568_v50 = vsel %vm1565_vm6, %v1567_v46, %v1563_v39  ;;  %v3303_v34 = vpop.xlane.xlu1 %1505  ;;  %1731 = vmatpush.bf16.msrb.mxu3 %v1719_v49  ;;  %vm1580_vm10 = vcmp.eq.f32.partialorder %v1579_v17, 8.507059e+37 }
 0x670   : > { %v1569_v52 = vmul.f32 %v3260_v3, %v1568_v50  ;;  %2769 = vrcp.f32 %v3303_v34  ;;  %vm1605_vm13 = vweird.f32 %v3303_v34  ;;  %v1611_v13 = vand.u32 2147483648, %v3303_v34 }
 0x671   : > { %v1609_v23 = vand.u32 2147483647, %v3303_v34 }
 0x672   : > { %v2768_v53 = vpop.eup %2767  ;;  %v1633_v54 = vpack.c.bf16 %v1569_v52, %v1569_v52 }
 0x673   : > { %v1571_v61 = vmul.f32 %v2768_v53, %v1500_v43  ;;  %vm1576_vm7 = vweird.f32 %v2768_v53  ;;  %v1612_v43 = vor.u32 1.1754944e-38, %v1611_v13  ;;  %vm1610_vm5 = vcmp.eq.f32.partialorder %v1609_v23, 8.507059e+37 }
 0x674   : > { %v1666_v55 = vunpack.c.l.b16 %v1633_v54  ;;  %vm1577_vm9 = vmor %vm1575_vm8, %vm1576_vm7 }
 0x675   : > { %v1572_v57 = vsub.f32 1.0, %v1571_v61 }
 0x676   : > { %v2770_v60 = vpop.eup %2769  ;;  %v1667_v36 = vpack.c.b16 %v1666_v55, %v1665_v22  ;;  %v1897_v1 = vpop.permute.xlu2 %1896 }
 0x677   : > { %v1573_v62 = vmul.f32 %v2768_v53, %v1572_v57  ;;  %v1601_v63 = vmul.f32 %v2770_v60, %v3303_v34  ;;  %v1503_v58 = vpop.xlane.xlu1 %1502  ;;  %vm1606_vm11 = vweird.f32 %v2770_v60 }
 0x678   : > { %2771 = vrcp.f32 %v1503_v58  ;;  %2551 = vmatmul.msk.bf16.vlgmr.msrb.gmra.mxu1 %vm505_vm3, %v1667_v36  ;;  %v1594_v9 = vand.u32 2147483647, %v1503_v58  ;;  %v1596_v38 = vand.u32 2147483648, %v1503_v58  ;;  %vm3312_vm14 = vmor %vm1605_vm13, %vm1606_vm11  ;;  %vm1590_vm15 = vweird.f32 %v1503_v58 }
 0x679   : > { %v1574_v0 = vadd.f32 %v2768_v53, %v1573_v62  ;;  %v1602_v3 = vsub.f32 1.0, %v1601_v63 }
 0x67a   : > { %vm1595_vm4 = vcmp.eq.f32.partialorder %v1594_v9, 8.507059e+37  ;;  %v1597_v48 = vor.u32 1.1754944e-38, %v1596_v38  ;;  %v1798_v38 = vld [vmem:[#allocation4 + $0xd0] sm:$0xff] }
 0x67b   : > { %v1578_v5 = vsel %vm1577_vm9, %v2768_v53, %v1574_v0  ;;  %v1603_v6 = vmul.f32 %v2770_v60, %v1602_v3 }
 0x67c   : > { %v1583_v2 = vsel %vm1580_vm10, %v1582_v8, %v1578_v5 }
 0x67d   : > { %v1604_v10 = vadd.f32 %v2770_v60, %v1603_v6  ;;  %v1584_v14 = vmul.f32 %v3264_v33, %v1583_v2 }
 0x67e   : > { %v2772_v35 = vpop.eup %2771  ;;  %v1839_v42 = vpop.permute.xlu0 %1838 }
 0x67f   : > { %v1586_v59 = vmul.f32 %v2772_v35, %v1503_v58  ;;  %v1509_v7 = vpop.xlane.xlu1 %1508  ;;  %vm1591_vm12 = vweird.f32 %v2772_v35  ;;  %v1608_v32 = vsel %vm3312_vm14, %v2770_v60, %v1604_v10  ;;  %v1634_v45 = vpack.c.bf16 %v1584_v14, %v1584_v14  ;;  %v1799_v14 = vld [vmem:[#allocation4 + $0xd8] sm:$0xff] }
 0x680   : > { %2773 = vrcp.f32 %v1509_v7  ;;  %vm1592_vm1 = vmor %vm1590_vm15, %vm1591_vm12  ;;  %v1613_v49 = vsel %vm1610_vm5, %v1612_v43, %v1608_v32  ;;  %v1626_v50 = vand.u32 2147483648, %v1509_v7  ;;  %v1624_v52 = vand.u32 2147483647, %v1509_v7  ;;  %v1800_v32 = vld [vmem:[#allocation4 + $0xe0] sm:$0xff] }
 0x681   : > { %v1587_v44 = vsub.f32 1.0, %v1586_v59  ;;  %vm1620_vm7 = vweird.f32 %v1509_v7  ;;  %v1690_v53 = vunpack.c.l.b16 %v1634_v45  ;;  %v1614_v54 = vmul.f32 %v3268_v11, %v1613_v49  ;;  %v1797_v59 = vld [vmem:[#allocation4 + $0xc8] sm:$0xff]  ;;  %v1802_v45 = vld [vmem:[#allocation4 + $0xf0] sm:$0xff] }
 0x682   : > { %v1627_v55 = vor.u32 1.1754944e-38, %v1626_v50  ;;  %vm1625_vm9 = vcmp.eq.f32.partialorder %v1624_v52, 8.507059e+37  ;;  %v1803_v52 = vld [vmem:[#allocation4 + $0xf8] sm:$0xff]  ;;  %vm1778_vm5 = vcmask 191616  }
 0x683   : > { %v1588_v12 = vmul.f32 %v2772_v35, %v1587_v44 }
 0x685   : > { %v1589_v31 = vadd.f32 %v2772_v35, %v1588_v12 }
 0x686   : > { %v2774_v25 = vpop.eup %2773  ;;  %v1899_v29 = vpop.permute.xlu0 %1898 }
 0x687   : > { %v1593_v40 = vsel %vm1592_vm1, %v2772_v35, %v1589_v31  ;;  %v1616_v41 = vmul.f32 %v2774_v25, %v1509_v7  ;;  %v1904_v33 = vsel %vm403_vm2, %v1899_v29, 0  ;;  %vm1621_vm6 = vweird.f32 %v2774_v25 }
 0x688   : > { %v1598_v47 = vsel %vm1595_vm4, %v1597_v48, %v1593_v40  ;;  %1913 = vmatpush.bf16.xpose.msra.mxu3 %v1904_v33  ;;  %2563 = vmatmul.msk.bf16.vlgmr.msra.gmra.mxu1 %vm403_vm2, %v1839_v42  ;;  %vm1622_vm8 = vmor %vm1620_vm7, %vm1621_vm6  ;;  %v1796_v42 = vld [vmem:[#allocation4 + $0xc0] sm:$0xff]  ;;  %vm1296_vm4 = vcmask 126016  }
 0x689   : > { %v1599_v46 = vmul.f32 %v3272_v15, %v1598_v47  ;;  %v1617_v39 = vsub.f32 1.0, %v1616_v41  ;;  %v1636_v15 = vpack.c.bf16 %v1614_v54, %v1614_v54  ;;  %v1801_v47 = vld [vmem:[#allocation4 + $0xe8] sm:$0xff] }
 0x68b   : > { %v1635_v34 = vpack.c.bf16 %v1599_v46, %v1599_v46  ;;  %v1618_v30 = vmul.f32 %v2774_v25, %v1617_v39  ;;  %v1715_v58 = vunpack.c.l.b16 %v1636_v15 }
 0x68d   : > { %v1691_v61 = vunpack.c.l.b16 %v1635_v34  ;;  %v1619_v22 = vadd.f32 %v2774_v25, %v1618_v30 }
 0x68f   : > { %v1623_v57 = vsel %vm1622_vm8, %v2774_v25, %v1619_v22  ;;  %v1692_v60 = vpack.c.b16 %v1691_v61, %v1690_v53 }
 0x690   : > { %v1628_v36 = vsel %vm1625_vm9, %v1627_v55, %v1623_v57 }
 0x691   : > { %v1629_v62 = vmul.f32 %v3280_v21, %v1628_v36  ;;  %2552 = vmatmul.msk.bf16.vlgmr.msrb.gmra.mxu2 %vm505_vm3, %v1692_v60 }
 0x693   : > { %v1637_v63 = vpack.c.bf16 %v1629_v62, %v1629_v62 }
 0x695   : > { %v1716_v0 = vunpack.c.l.b16 %v1637_v63 }
 0x697   : > { %v1717_v3 = vpack.c.b16 %v1716_v0, %v1715_v58  ;;  %v1868_v11 = vpop.permute.xlu1 %1867 }
 0x699   : > { %2553 = vmatmul.msk.bf16.vlgmr.msrb.gmra.mxu3 %vm505_vm3, %v1717_v3  ;;  %v2807_v3 = vld [vmem:[#allocation2] sm:$0xff] }
 0x6a1   : > { %2568 = vmatmul.msk.bf16.vlgmr.msra.gmra.mxu2 %vm403_vm2, %v1868_v11 }
 0x6a9   : > { %2573 = vmatmul.msk.bf16.vlgmr.msra.gmra.mxu3 %vm403_vm2, %v1897_v1 }
 0x6c4   : > { %v3328_v17 = vpop.f32.mrf.mxu0 }
 0x6cc   : > { %v3330_v35 = vpop.f32.mrf.mxu0 }
 0x6d4   : > { %v1828_v21 = vpop.f32.mrf.mxu0 }
 0x6d5   : > { %v1829_v5 = vadd.f32 %v1828_v21, %v1796_v42 }
 0x6d7   : > { %v1920_v6 = vsel %vm505_vm3, %v1829_v5, -inf }
 0x6d8   : > { %1921 = vmax.xlane.f32.xlu1 %v1920_v6 }
 0x6dc   : > { %v1830_v7 = vpop.f32.mrf.mxu0 }
 0x6dd   : > { %v1831_v8 = vadd.f32 %v1830_v7, %v1797_v59  ;;  %v1257_v59 = vpack.c.bf16 %v3218_v19, %v3218_v19  ;;  %v1258_v19 = vpack.c.bf16 %v3216_v56, %v3216_v56  ;;  %v1260_v56 = vpack.c.bf16 %v3226_v18, %v3226_v18 }
 0x6df   : > { %v1923_v44 = vsel %vm505_vm3, %v1831_v8, -inf }
 0x6e0   : > { %1924 = vmax.xlane.f32.xlu0 %v1923_v44 }
 0x6f5   : > { %v3334_v2 = vpop.f32.mrf.mxu1 }
 0x6fd   : > { %v3336_v9 = vpop.f32.mrf.mxu1 }
 0x705   : > { %v1857_v10 = vpop.f32.mrf.mxu1 }
 0x706   : > { %v1858_v12 = vadd.f32 %v1857_v10, %v1798_v38 }
 0x708   : > { %v1926_v13 = vsel %vm505_vm3, %v1858_v12, -inf }
 0x709   : > { %1927 = vmax.xlane.f32.xlu2 %v1926_v13 }
 0x70d   : > { %v1859_v28 = vpop.f32.mrf.mxu1 }
 0x70e   : > { %v1860_v23 = vadd.f32 %v1859_v28, %v1799_v14  ;;  %v1741_v14 = vpack.c.bf16 %v3336_v9, %v3336_v9 }
 0x710   : > { %v1929_v31 = vsel %vm505_vm3, %v1860_v23, -inf }
 0x711   : > { %1930 = vmax.xlane.f32.xlu1 %v1929_v31 }
 0x714   : > { %v3340_v25 = vpop.f32.mrf.mxu2 }
 0x71c   : > { %v3342_v48 = vpop.f32.mrf.mxu2  ;;  %v3344_v29 = vpop.f32.mrf.mxu3 }
 0x724   : > { %v3346_v40 = vpop.f32.mrf.mxu3  ;;  %v1886_v41 = vpop.f32.mrf.mxu2 }
 0x725   : > { %v1887_v33 = vadd.f32 %v1886_v41, %v1800_v32 }
 0x727   : > { %v1932_v43 = vsel %vm505_vm3, %v1887_v33, -inf }
 0x728   : > { %1933 = vmax.xlane.f32.xlu2 %v1932_v43 }
 0x72c   : > { %v1888_v46 = vpop.f32.mrf.mxu2  ;;  %v1915_v39 = vpop.f32.mrf.mxu3 }
 0x72d   : > { %v3349_v49 = vadd.f32 %v1888_v46, %v1801_v47  ;;  %v1916_v50 = vadd.f32 %v1915_v39, %v1802_v45  ;;  %v1743_v46 = vpack.c.bf16 %v3342_v48, %v3342_v48 }
 0x72f   : > { %v1935_v34 = vsel %vm505_vm3, %v3349_v49, -inf  ;;  %v1938_v30 = vsel %vm505_vm3, %v1916_v50, -inf }
 0x730   : > { %1936 = vmax.xlane.f32.xlu0 %v1935_v34  ;;  %1939 = vmax.xlane.f32.xlu1 %v1938_v30  ;;  %v1745_v30 = vpack.c.bf16 %v3346_v40, %v3346_v40 }
 0x734   : > { %v1917_v53 = vpop.f32.mrf.mxu3 }
 0x735   : > { %v3354_v54 = vadd.f32 %v1917_v53, %v1803_v52 }
 0x737   : > { %v1941_v61 = vsel %vm505_vm3, %v3354_v54, -inf }
 0x738   : > { %1942 = vmax.xlane.f32.xlu2 %v1941_v61 }
 0x74b   : > { %v1922_v22 = vpop.xlane.xlu1 %1921 }
 0x74c   : > { %v1944_v55 = vsub.f32 %v1829_v5, %v1922_v22 }
 0x74e   : > { %v1952_v57 = vmul.f32 1.442695, %v1944_v55 }
 0x750   : > { %2775 = vpow2.f32 %v1952_v57 }
 0x753   : > { %v1925_v60 = vpop.xlane.xlu0 %1924 }
 0x754   : > { %v1945_v36 = vsub.f32 %v1831_v8, %v1925_v60 }
 0x756   : > { %v3358_v15 = vpop.eup %2775  ;;  %v1954_v62 = vmul.f32 1.442695, %v1945_v36 }
 0x757   : > { %v1968_v63 = vsel %vm505_vm3, %v3358_v15, 0.0 }
 0x758   : > { %2777 = vpow2.f32 %v1954_v62  ;;  %1969 = vadd.xlane.f32.xlu0 %v1968_v63 }
 0x75e   : > { %v3362_v58 = vpop.eup %2777 }
 0x75f   : > { %v1971_v0 = vsel %vm505_vm3, %v3362_v58, 0.0 }
 0x760   : > { %1972 = vadd.xlane.f32.xlu1 %v1971_v0 }
 0x779   : > { %2125 = vrot.lane.b32.xlu1 %v2807_v3, %s2863_s28 }
 0x77c   : > { %v1928_v11 = vpop.xlane.xlu2 %1927 }
 0x77d   : > { %v1946_v1 = vsub.f32 %v1858_v12, %v1928_v11 }
 0x77f   : > { %v1956_v42 = vmul.f32 1.442695, %v1946_v1 }
 0x781   : > { %2779 = vpow2.f32 %v1956_v42  ;;  %2200 = vrot.lane.b32.xlu1 %v3288_v24, %s2863_s28  ;;  %v1739_v24 = vpack.c.bf16 %v3330_v35, %v3330_v35 }
 0x784   : > { %v1931_v21 = vpop.xlane.xlu1 %1930 }
 0x785   : > { %v1947_v5 = vsub.f32 %v1860_v23, %v1931_v21 }
 0x787   : > { %v3369_v6 = vpop.eup %2779  ;;  %v1958_v7 = vmul.f32 1.442695, %v1947_v5 }
 0x788   : > { %v1974_v8 = vsel %vm505_vm3, %v3369_v6, 0.0 }
 0x789   : > { %2781 = vpow2.f32 %v1958_v7  ;;  %1274 = vrot.lane.b32.xlu1 %v1257_v59, %s2864_s29  ;;  %1975 = vadd.xlane.f32.xlu2 %v1974_v8 }
 0x78f   : > { %v3376_v44 = vpop.eup %2781 }
 0x790   : > { %v1977_v38 = vsel %vm505_vm3, %v3376_v44, 0.0 }
 0x791   : > { %1756 = vrot.lane.b32.xlu1 %v1739_v24, %s2865_s8  ;;  %1978 = vadd.xlane.f32.xlu0 %v1977_v38 }
 0x799   : > { %1276 = vrot.lane.b32.xlu1 %v1258_v19, %s2864_s29 }
 0x79b   : > { %v1934_v10 = vpop.xlane.xlu2 %1933 }
 0x79c   : > { %v1948_v12 = vsub.f32 %v1887_v33, %v1934_v10 }
 0x79e   : > { %v1960_v13 = vmul.f32 1.442695, %v1948_v12 }
 0x7a0   : > { %2783 = vpow2.f32 %v1960_v13 }
 0x7a1   : > { %1760 = vrot.lane.b32.xlu1 %v1741_v14, %s2865_s8 }
 0x7a3   : > { %v1940_v35 = vpop.xlane.xlu1 %1939  ;;  %v1937_v28 = vpop.xlane.xlu0 %1936 }
 0x7a4   : > { %v1950_v23 = vsub.f32 %v1916_v50, %v1940_v35  ;;  %v1949_v41 = vsub.f32 %v3349_v49, %v1937_v28  ;;  %v1262_v50 = vpack.c.bf16 %v3232_v37, %v3232_v37  ;;  %v1256_v37 = vpack.c.bf16 %v3214_v51, %v3214_v51 }
 0x7a6   : > { %v3389_v31 = vpop.eup %2783  ;;  %v1964_v32 = vmul.f32 1.442695, %v1950_v23  ;;  %v1962_v9 = vmul.f32 1.442695, %v1949_v41 }
 0x7a7   : > { %v1980_v33 = vsel %vm505_vm3, %v3389_v31, 0.0 }
 0x7a8   : > { %2785 = vpow2.f32 %v1964_v32  ;;  %1981 = vadd.xlane.f32.xlu2 %v1980_v33 }
 0x7a9   : > { %1280 = vrot.lane.b32.xlu1 %v1260_v56, %s2864_s29  ;;  %2787 = vpow2.f32 %v1962_v9 }
 0x7ab   : > { %v1943_v43 = vpop.xlane.xlu2 %1942 }
 0x7ac   : > { %v1951_v45 = vsub.f32 %v3354_v54, %v1943_v43  ;;  %v1738_v54 = vpack.c.bf16 %v3328_v17, %v3328_v17 }
 0x7ae   : > { %v3397_v47 = vpop.eup %2785  ;;  %v1966_v39 = vmul.f32 1.442695, %v1951_v45 }
 0x7af   : > { %v1986_v18 = vsel %vm505_vm3, %v3397_v47, 0.0  ;;  %v3405_v49 = vpop.eup %2787 }
 0x7b0   : > { %1987 = vadd.xlane.f32.xlu0 %v1986_v18  ;;  %2789 = vpow2.f32 %v1966_v39  ;;  %v1983_v34 = vsel %vm505_vm3, %v3405_v49, 0.0 }
 0x7b1   : > { %1764 = vrot.lane.b32.xlu1 %v1743_v46, %s2865_s8 }
 0x7b6   : > { %v3412_v48 = vpop.eup %2789 }
 0x7b7   : > { %v1989_v52 = vsel %vm505_vm3, %v3412_v48, 0.0 }
 0x7b8   : > { %1984 = vadd.xlane.f32.xlu0 %v1983_v34 }
 0x7b9   : > { %1284 = vrot.lane.b32.xlu1 %v1262_v50, %s2864_s29 }
 0x7c0   : > { %2150 = vrot.lane.b32.xlu2 %v3256_v26, %s2863_s28  ;;  %1990 = vadd.xlane.f32.xlu0 %v1989_v52 }
 0x7c1   : > { %1768 = vrot.lane.b32.xlu1 %v1745_v30, %s2865_s8 }
 0x7c8   : > { %1272 = vrot.lane.b32.xlu2 %v1256_v37, %s2864_s29 }
 0x7cb   : > { %v1970_v53 = vpop.xlane.xlu0 %1969 }
 0x7cc   : > { %2791 = vrcp.f32 %v1970_v53  ;;  %v2003_v60 = vand.u32 2147483648, %v1970_v53  ;;  %vm1997_vm10 = vweird.f32 %v1970_v53  ;;  %v2001_v36 = vand.u32 2147483647, %v1970_v53 }
 0x7ce   : > { %v2004_v0 = vor.u32 1.1754944e-38, %v2003_v60  ;;  %vm2002_vm12 = vcmp.eq.f32.partialorder %v2001_v36, 8.507059e+37 }
 0x7d0   : > { %1754 = vrot.lane.b32.xlu2 %v1738_v54, %s2865_s8 }
 0x7d2   : > { %v2792_v40 = vpop.eup %2791 }
 0x7d3   : > { %v1993_v61 = vmul.f32 %v2792_v40, %v1970_v53  ;;  %v1973_v22 = vpop.xlane.xlu1 %1972  ;;  %vm1998_vm2 = vweird.f32 %v2792_v40 }
 0x7d4   : > { %2793 = vrcp.f32 %v1973_v22  ;;  %2175 = vrot.lane.b32.xlu0 %v3274_v16, %s2863_s28  ;;  %vm1999_vm11 = vmor %vm1997_vm10, %vm1998_vm2  ;;  %v2018_v3 = vand.u32 2147483648, %v1973_v22  ;;  %v2016_v1 = vand.u32 2147483647, %v1973_v22  ;;  %vm2012_vm14 = vweird.f32 %v1973_v22 }
 0x7d5   : > { %v1994_v26 = vsub.f32 1.0, %v1993_v61 }
 0x7d6   : > { %v2019_v21 = vor.u32 1.1754944e-38, %v2018_v3  ;;  %vm2017_vm1 = vcmp.eq.f32.partialorder %v2016_v1, 8.507059e+37 }
 0x7d7   : > { %v1995_v55 = vmul.f32 %v2792_v40, %v1994_v26 }
 0x7d9   : > { %v1996_v57 = vadd.f32 %v2792_v40, %v1995_v55 }
 0x7da   : > { %v2794_v51 = vpop.eup %2793 }
 0x7db   : > { %v2008_v62 = vmul.f32 %v2794_v51, %v1973_v22  ;;  %v2000_v17 = vsel %vm1999_vm11, %v2792_v40, %v1996_v57  ;;  %vm2013_vm13 = vweird.f32 %v2794_v51 }
 0x7dc   : > { %v2005_v42 = vsel %vm2002_vm12, %v2004_v0, %v2000_v17  ;;  %vm2014_vm15 = vmor %vm2012_vm14, %vm2013_vm13 }
 0x7dd   : > { %v2009_v63 = vsub.f32 1.0, %v2008_v62  ;;  %v2006_v5 = vmul.f32 %v3358_v15, %v2005_v42 }
 0x7df   : > { %v2010_v11 = vmul.f32 %v2794_v51, %v2009_v63  ;;  %v2112_v24 = vpack.c.bf16 %v2006_v5, %v2006_v5 }
 0x7e1   : > { %v2011_v16 = vadd.f32 %v2794_v51, %v2010_v11  ;;  %v2122_v10 = vunpack.c.l.b16 %v2112_v24 }
 0x7e3   : > { %v2015_v59 = vsel %vm2014_vm15, %v2794_v51, %v2011_v16 }
 0x7e4   : > { %v2020_v7 = vsel %vm2017_vm1, %v2019_v21, %v2015_v59 }
 0x7e5   : > { %v2021_v8 = vmul.f32 %v3362_v58, %v2020_v7 }
 0x7e7   : > { %v2113_v38 = vpack.c.bf16 %v2021_v8, %v2021_v8 }
 0x7e9   : > { %v2123_v19 = vunpack.c.l.b16 %v2113_v38 }
 0x7eb   : > { %v2126_v12 = vpop.permute.xlu1 %2125  ;;  %v2124_v13 = vpack.c.b16 %v2123_v19, %v2122_v10 }
 0x7ec   : > { %2138 = vmatpush.bf16.msrb.mxu0 %v2126_v12 }
 0x7ef   : > { %2574 = vmatmul.msk.bf16.vlgmr.msrb.gmra.mxu0 %vm505_vm3, %v2124_v13 }
 0x7f3   : > { %v2201_v14 = vpop.permute.xlu1 %2200 }
 0x7f4   : > { %2213 = vmatpush.bf16.msrb.mxu3 %v2201_v14 }
 0x7fb   : > { %v1275_v35 = vpop.permute.xlu1 %1274 }
 0x7fc   : > { %1298 = vst.msk [vmem:[#allocation3 + $0x4] sm:$0xf] %vm1296_vm4, %v1275_v35  ;;  %v1976_v15 = vpop.xlane.xlu2 %1975 }
 0x7fd   : > { %2795 = vrcp.f32 %v1976_v15  ;;  %v2033_v34 = vand.u32 2147483648, %v1976_v15  ;;  %vm2027_vm9 = vweird.f32 %v1976_v15  ;;  %v2031_v52 = vand.u32 2147483647, %v1976_v15 }
 0x7ff   : > { %v2034_v61 = vor.u32 1.1754944e-38, %v2033_v34  ;;  %vm2032_vm12 = vcmp.eq.f32.partialorder %v2031_v52, 8.507059e+37 }
 0x803   : > { %v2796_v28 = vpop.eup %2795  ;;  %v1757_v58 = vpop.permute.xlu1 %1756 }
 0x804   : > { %1780 = vst.msk [vmem:[#allocation3 + $0x4] sm:$0xf] %vm1778_vm5, %v1757_v58  ;;  %v1979_v23 = vpop.xlane.xlu0 %1978  ;;  %v2023_v32 = vmul.f32 %v2796_v28, %v1976_v15  ;;  %vm2028_vm7 = vweird.f32 %v2796_v28  ;;  %v2634_v15 = vld [vmem:[%s3552_s4] sm:$0xff] }
 0x805   : > { %2797 = vrcp.f32 %v1979_v23  ;;  %v2048_v18 = vand.u32 2147483648, %v1979_v23  ;;  %v2046_v50 = vand.u32 2147483647, %v1979_v23  ;;  %vm2042_vm8 = vweird.f32 %v1979_v23  ;;  %vm2029_vm10 = vmor %vm2027_vm9, %vm2028_vm7 }
 0x806   : > { %v2024_v41 = vsub.f32 1.0, %v2023_v32 }
 0x807   : > { %v2049_v54 = vor.u32 1.1754944e-38, %v2048_v18  ;;  %vm2047_vm11 = vcmp.eq.f32.partialorder %v2046_v50, 8.507059e+37 }
 0x808   : > { %v2025_v43 = vmul.f32 %v2796_v28, %v2024_v41 }
 0x80a   : > { %v2026_v39 = vadd.f32 %v2796_v28, %v2025_v43 }
 0x80b   : > { %v2798_v56 = vpop.eup %2797  ;;  %v1277_v33 = vpop.permute.xlu1 %1276 }
 0x80c   : > { %v2038_v9 = vmul.f32 %v2798_v56, %v1979_v23  ;;  %1299 = vst.msk [vmem:[#allocation3 + $0x8] sm:$0xf] %vm1296_vm4, %v1277_v33  ;;  %vm2043_vm6 = vweird.f32 %v2798_v56  ;;  %v2030_v40 = vsel %vm2029_vm10, %v2796_v28, %v2026_v39 }
 0x80d   : > { %vm2044_vm2 = vmor %vm2042_vm8, %vm2043_vm6  ;;  %v2035_v26 = vsel %vm2032_vm12, %v2034_v61, %v2030_v40 }
 0x80e   : > { %v2039_v45 = vsub.f32 1.0, %v2038_v9  ;;  %v2036_v57 = vmul.f32 %v3369_v6, %v2035_v26 }
 0x810   : > { %v2040_v46 = vmul.f32 %v2798_v56, %v2039_v45  ;;  %v2114_v62 = vpack.c.bf16 %v2036_v57, %v2036_v57 }
 0x812   : > { %v2041_v30 = vadd.f32 %v2798_v56, %v2040_v46  ;;  %v2147_v63 = vunpack.c.l.b16 %v2114_v62 }
 0x813   : > { %v3435_v37 = vpop.permute.xlu1 %1760 }
 0x814   : > { %v2045_v53 = vsel %vm2044_vm2, %v2798_v56, %v2041_v30 }
 0x815   : > { %v2050_v22 = vsel %vm2047_vm11, %v2049_v54, %v2045_v53 }
 0x816   : > { %v2051_v55 = vmul.f32 %v3376_v44, %v2050_v22 }
 0x818   : > { %v2115_v36 = vpack.c.bf16 %v2051_v55, %v2051_v55 }
 0x81a   : > { %v2148_v17 = vunpack.c.l.b16 %v2115_v36 }
 0x81b   : > { %v1982_v51 = vpop.xlane.xlu2 %1981  ;;  %v1281_v60 = vpop.permute.xlu1 %1280 }
 0x81c   : > { %1301 = vst.msk [vmem:[#allocation3 + $0x10] sm:$0xf] %vm1296_vm4, %v1281_v60  ;;  %2799 = vrcp.f32 %v1982_v51  ;;  %v2149_v42 = vpack.c.b16 %v2148_v17, %v2147_v63  ;;  %vm2057_vm14 = vweird.f32 %v1982_v51  ;;  %v2063_v35 = vand.u32 2147483648, %v1982_v51 }
 0x81d   : > { %v2061_v28 = vand.u32 2147483647, %v1982_v51 }
 0x81e   : > { %v2064_v9 = vor.u32 1.1754944e-38, %v2063_v35 }
 0x81f   : > { %vm2062_vm8 = vcmp.eq.f32.partialorder %v2061_v28, 8.507059e+37 }
 0x822   : > { %v2800_v11 = vpop.eup %2799 }
 0x823   : > { %v2151_v0 = vpop.permute.xlu2 %2150  ;;  %v3440_v3 = vpop.permute.xlu1 %1764  ;;  %v2053_v44 = vmul.f32 %v2800_v11, %v1982_v51  ;;  %vm2058_vm13 = vweird.f32 %v2800_v11 }
 0x824   : > { %v1988_v1 = vpop.xlane.xlu0 %1987  ;;  %2163 = vmatpush.bf16.msrb.mxu1 %v2151_v0  ;;  %vm3446_vm15 = vmor %vm2057_vm14, %vm2058_vm13 }
 0x825   : > { %2801 = vrcp.f32 %v1988_v1  ;;  %v2054_v16 = vsub.f32 1.0, %v2053_v44  ;;  %vm2087_vm7 = vweird.f32 %v1988_v1  ;;  %v2093_v43 = vand.u32 2147483648, %v1988_v1 }
 0x826   : > { %v2091_v46 = vand.u32 2147483647, %v1988_v1 }
 0x827   : > { %2575 = vmatmul.msk.bf16.vlgmr.msrb.gmra.mxu1 %vm505_vm3, %v2149_v42  ;;  %v2055_v8 = vmul.f32 %v2800_v11, %v2054_v16  ;;  %v2094_v54 = vor.u32 1.1754944e-38, %v2093_v43 }
 0x828   : > { %vm2092_vm12 = vcmp.eq.f32.partialorder %v2091_v46, 8.507059e+37 }
 0x829   : > { %v2056_v19 = vadd.f32 %v2800_v11, %v2055_v8 }
 0x82b   : > { %v2802_v6 = vpop.eup %2801  ;;  %v1273_v21 = vpop.permute.xlu2 %1272  ;;  %v2060_v23 = vsel %vm3446_vm15, %v2800_v11, %v2056_v19  ;;  %v1740_v19 = vpack.c.bf16 %v3334_v2, %v3334_v2  ;;  %v2635_v2 = vld [vmem:[%s3552_s4 + $0x8] sm:$0xff] }
 0x82c   : > { %v1285_v5 = vpop.permute.xlu1 %1284  ;;  %v2083_v59 = vmul.f32 %v2802_v6, %v1988_v1  ;;  %1297 = vst.msk [vmem:[#allocation3] sm:$0xf] %vm1296_vm4, %v1273_v21  ;;  %v1985_v7 = vpop.xlane.xlu0 %1984  ;;  %vm2088_vm1 = vweird.f32 %v2802_v6  ;;  %v2065_v50 = vsel %vm2062_vm8, %v2064_v9, %v2060_v23  ;;  %2335 = vmatpush.bf16.msra.mxu0 %v2635_v2  ;;  %v1263_v23 = vpack.c.bf16 %v3234_v27, %v3234_v27 }
 0x82d   : > { %1303 = vst.msk [vmem:[#allocation3 + $0x18] sm:$0xf] %vm1296_vm4, %v1285_v5  ;;  %2803 = vrcp.f32 %v1985_v7  ;;  %v2078_v32 = vand.u32 2147483648, %v1985_v7  ;;  %v2076_v33 = vand.u32 2147483647, %v1985_v7  ;;  %vm3452_vm9 = vmor %vm2087_vm7, %vm2088_vm1  ;;  %vm2072_vm2 = vweird.f32 %v1985_v7 }
 0x82e   : > { %v2084_v24 = vsub.f32 1.0, %v2083_v59  ;;  %v2066_v61 = vmul.f32 %v3389_v31, %v2065_v50 }
 0x82f   : > { %v2079_v34 = vor.u32 1.1754944e-38, %v2078_v32  ;;  %vm2077_vm11 = vcmp.eq.f32.partialorder %v2076_v33, 8.507059e+37  ;;  %v1744_v33 = vpack.c.bf16 %v3344_v29, %v3344_v29 }
 0x830   : > { %v2085_v12 = vmul.f32 %v2802_v6, %v2084_v24  ;;  %v2116_v62 = vpack.c.bf16 %v2066_v61, %v2066_v61  ;;  %2336 = vmatpush.bf16.msra.mxu0 %v2634_v15 }
 0x832   : > { %v2086_v41 = vadd.f32 %v2802_v6, %v2085_v12  ;;  %v2172_v42 = vunpack.c.l.b16 %v2116_v62 }
 0x833   : > { %v2804_v38 = vpop.eup %2803  ;;  %v1755_v10 = vpop.permute.xlu2 %1754 }
 0x834   : > { %v2068_v13 = vmul.f32 %v2804_v38, %v1985_v7  ;;  %1779 = vst.msk [vmem:[#allocation3] sm:$0xf] %vm1778_vm5, %v1755_v10  ;;  %v1991_v14 = vpop.xlane.xlu0 %1990  ;;  %vm2073_vm6 = vweird.f32 %v2804_v38  ;;  %v2090_v30 = vsel %vm3452_vm9, %v2802_v6, %v2086_v41  ;;  %v1769_v61 = vpop.permute.xlu1 %1768 }
 0x835   : > { %2805 = vrcp.f32 %v1991_v14  ;;  %vm2074_vm10 = vmor %vm2072_vm2, %vm2073_vm6  ;;  %v2095_v55 = vsel %vm2092_vm12, %v2094_v54, %v2090_v30  ;;  %v2108_v57 = vand.u32 2147483648, %v1991_v14  ;;  %v2106_v36 = vand.u32 2147483647, %v1991_v14 }
 0x836   : > { %v2069_v58 = vsub.f32 1.0, %v2068_v13  ;;  %v2096_v17 = vmul.f32 %v3397_v47, %v2095_v55  ;;  %vm2102_vm14 = vweird.f32 %v1991_v14  ;;  %v2678_v55 = vld [vmem:[%s3553_s5] ss:$0 sm:$0xff] }
 0x837   : > { %v2109_v0 = vor.u32 1.1754944e-38, %v2108_v57  ;;  %vm2107_vm1 = vcmp.eq.f32.partialorder %v2106_v36, 8.507059e+37 }
 0x838   : > { %v2070_v56 = vmul.f32 %v2804_v38, %v2069_v58 }
 0x83a   : > { %v2071_v18 = vadd.f32 %v2804_v38, %v2070_v56 }
 0x83b   : > { %v2806_v39 = vpop.eup %2805 }
 0x83c   : > { %v2075_v52 = vsel %vm2074_vm10, %v2804_v38, %v2071_v18  ;;  %v2098_v53 = vmul.f32 %v2806_v39, %v1991_v14  ;;  %vm2103_vm13 = vweird.f32 %v2806_v39  ;;  %v1261_v14 = vpack.c.bf16 %v3228_v20, %v3228_v20 }
 0x83d   : > { %v2080_v40 = vsel %vm2077_vm11, %v2079_v34, %v2075_v52  ;;  %vm2104_vm15 = vmor %vm2102_vm14, %vm2103_vm13 }
 0x83e   : > { %v2081_v22 = vmul.f32 %v3405_v49, %v2080_v40  ;;  %v2099_v26 = vsub.f32 1.0, %v2098_v53  ;;  %v2118_v49 = vpack.c.bf16 %v2096_v17, %v2096_v17 }
 0x840   : > { %v2117_v51 = vpack.c.bf16 %v2081_v22, %v2081_v22  ;;  %v2100_v60 = vmul.f32 %v2806_v39, %v2099_v26  ;;  %v2197_v5 = vunpack.c.l.b16 %v2118_v49 }
 0x842   : > { %v2101_v63 = vadd.f32 %v2806_v39, %v2100_v60  ;;  %v2173_v11 = vunpack.c.l.b16 %v2117_v51 }
 0x844   : > { %v2105_v1 = vsel %vm2104_vm15, %v2806_v39, %v2101_v63  ;;  %v2174_v21 = vpack.c.b16 %v2173_v11, %v2172_v42 }
 0x845   : > { %v2110_v31 = vsel %vm2107_vm1, %v2109_v0, %v2105_v1 }
 0x846   : > { %v2111_v44 = vmul.f32 %v3412_v48, %v2110_v31  ;;  %v2176_v6 = vpop.permute.xlu0 %2175  ;;  %v1259_v48 = vpack.c.bf16 %v3220_v4, %v3220_v4  ;;  %v1742_v4 = vpack.c.bf16 %v3340_v25, %v3340_v25 }
 0x847   : > { %2188 = vmatpush.bf16.msrb.mxu2 %v2176_v6 }
 0x848   : > { %v2119_v16 = vpack.c.bf16 %v2111_v44, %v2111_v44 }
 0x84a   : > { %v2198_v59 = vunpack.c.l.b16 %v2119_v16  ;;  %2576 = vmatmul.msk.bf16.vlgmr.msrb.gmra.mxu2 %vm505_vm3, %v2174_v21 }
 0x84c   : > { %v2199_v47 = vpack.c.b16 %v2198_v59, %v2197_v5 }
 0x84e   : > { %2577 = vmatmul.msk.bf16.vlgmr.msrb.gmra.mxu3 %vm505_vm3, %v2199_v47  ;;  %vm2260_vm3 = vcmask 257216  }
 0x86c   : > { %v2140_v7 = vpop.f32.mrf.mxu0 }
 0x86d   : > { %v2220_v8 = vpack.c.bf16 %v2140_v7, %v2140_v7 }
 0x86f   : > { %2236 = vrot.lane.b32.xlu0 %v2220_v8, %s2866_s9 }
 0x874   : > { %v2142_v24 = vpop.f32.mrf.mxu0 }
 0x875   : > { %v2221_v38 = vpack.c.bf16 %v2142_v24, %v2142_v24 }
 0x877   : > { %1278 = vrot.lane.b32.xlu0 %v1259_v48, %s2864_s29  ;;  %2238 = vrot.lane.b32.xlu2 %v2221_v38, %s2866_s9 }
 0x87f   : > { %1758 = vrot.lane.b32.xlu2 %v1740_v19, %s2865_s8 }
 0x8a4   : > { %v2165_v10 = vpop.f32.mrf.mxu1 }
 0x8a5   : > { %v2222_v12 = vpack.c.bf16 %v2165_v10, %v2165_v10 }
 0x8a7   : > { %2240 = vrot.lane.b32.xlu0 %v2222_v12, %s2866_s9 }
 0x8ac   : > { %v2167_v13 = vpop.f32.mrf.mxu1 }
 0x8ad   : > { %v2223_v35 = vpack.c.bf16 %v2167_v13, %v2167_v13 }
 0x8af   : > { %1282 = vrot.lane.b32.xlu0 %v1261_v14, %s2864_s29  ;;  %2242 = vrot.lane.b32.xlu2 %v2223_v35, %s2866_s9 }
 0x8b7   : > { %1762 = vrot.lane.b32.xlu2 %v1742_v4, %s2865_s8 }
 0x8cd   : > { %v2190_v20 = vpop.f32.mrf.mxu2 }
 0x8ce   : > { %v2224_v28 = vpack.c.bf16 %v2190_v20, %v2190_v20 }
 0x8d0   : > { %2244 = vrot.lane.b32.xlu0 %v2224_v28, %s2866_s9 }
 0x8d1   : > { %v2239_v58 = vpop.permute.xlu2 %2238  ;;  %v2215_v41 = vpop.f32.mrf.mxu3 }
 0x8d2   : > { %2262 = vst.msk [vmem:[#allocation3 + $0x4] sm:$0xf] %vm2260_vm3, %v2239_v58  ;;  %v2226_v9 = vpack.c.bf16 %v2215_v41, %v2215_v41 }
 0x8d5   : > { %v2192_v25 = vpop.f32.mrf.mxu2 }
 0x8d6   : > { %v2225_v32 = vpack.c.bf16 %v2192_v25, %v2192_v25 }
 0x8d8   : > { %1286 = vrot.lane.b32.xlu0 %v1263_v23, %s2864_s29  ;;  %2246 = vrot.lane.b32.xlu2 %v2225_v32, %s2866_s9 }
 0x8d9   : > { %v1759_v56 = vpop.permute.xlu2 %1758  ;;  %v2217_v27 = vpop.f32.mrf.mxu3 }
 0x8da   : > { %1781 = vst.msk [vmem:[#allocation3 + $0x8] sm:$0xf] %vm1778_vm5, %v1759_v56  ;;  %v2227_v45 = vpack.c.bf16 %v2217_v27, %v2217_v27 }
 0x8e0   : > { %2248 = vrot.lane.b32.xlu0 %v2226_v9, %s2866_s9  ;;  %1766 = vrot.lane.b32.xlu2 %v1744_v33, %s2865_s8 }
 0x8e1   : > { %v2237_v43 = vpop.permute.xlu0 %2236 }
 0x8e2   : > { %2261 = vst.msk [vmem:[#allocation3] sm:$0xf] %vm2260_vm3, %v2237_v43 }
 0x8e8   : > { %2250 = vrot.lane.b32.xlu2 %v2227_v45, %s2866_s9 }
 0x8e9   : > { %v1279_v46 = vpop.permute.xlu0 %1278  ;;  %v2630_v18 = vld [vmem:[#allocation3] sm:$0xff] }
 0x8ea   : > { %1300 = vst.msk [vmem:[#allocation3 + $0xc] sm:$0xf] %vm1296_vm4, %v1279_v46  ;;  %2602 = vmatmul.msk.bf16.vlgmr.msra.gmra.mxu0 %vm321_vm0, %v2630_v18 }
 0x8eb   : > { %1782 = vst.msk [vmem:[#allocation3 + $0xc] sm:$0xf] %vm1778_vm5, %v3435_v37 }
 0x909   : > { %v2243_v29 = vpop.permute.xlu2 %2242 }
 0x90a   : > { %2264 = vst.msk [vmem:[#allocation3 + $0xc] sm:$0xf] %vm2260_vm3, %v2243_v29 }
 0x911   : > { %v1763_v39 = vpop.permute.xlu2 %1762 }
 0x912   : > { %1783 = vst.msk [vmem:[#allocation3 + $0x10] sm:$0xf] %vm1778_vm5, %v1763_v39 }
 0x919   : > { %v2241_v50 = vpop.permute.xlu0 %2240 }
 0x91a   : > { %2263 = vst.msk [vmem:[#allocation3 + $0x8] sm:$0xf] %vm2260_vm3, %v2241_v50 }
 0x921   : > { %v1283_v34 = vpop.permute.xlu0 %1282  ;;  %v2631_v30 = vld [vmem:[#allocation3 + $0x8] sm:$0xff] }
 0x922   : > { %1302 = vst.msk [vmem:[#allocation3 + $0x14] sm:$0xf] %vm1296_vm4, %v1283_v34  ;;  %2603 = vmatmul.msk.bf16.gmra.mxu0 %vm321_vm0, %v2631_v30 }
 0x923   : > { %1784 = vst.msk [vmem:[#allocation3 + $0x14] sm:$0xf] %vm1778_vm5, %v3440_v3 }
 0x932   : > { %v2247_v37 = vpop.permute.xlu2 %2246 }
 0x933   : > { %2266 = vst.msk [vmem:[#allocation3 + $0x14] sm:$0xf] %vm2260_vm3, %v2247_v37 }
 0x93a   : > { %v1767_v52 = vpop.permute.xlu2 %1766 }
 0x93b   : > { %1785 = vst.msk [vmem:[#allocation3 + $0x18] sm:$0xf] %vm1778_vm5, %v1767_v52 }
 0x942   : > { %v2245_v53 = vpop.permute.xlu0 %2244  ;;  %v2251_v22 = vpop.permute.xlu2 %2250 }
 0x943   : > { %2265 = vst.msk [vmem:[#allocation3 + $0x10] sm:$0xf] %vm2260_vm3, %v2245_v53 }
 0x94a   : > { %v1287_v54 = vpop.permute.xlu0 %1286  ;;  %v2632_v40 = vld [vmem:[#allocation3 + $0x10] sm:$0xff] }
 0x94b   : > { %1304 = vst.msk [vmem:[#allocation3 + $0x1c] sm:$0xf] %vm1296_vm4, %v1287_v54  ;;  %2604 = vmatmul.msk.bf16.gmra.mxu0 %vm321_vm0, %v2632_v40  ;;  %vm2366_vm4 = vcmask 257024  }
 0x94c   : > { %1786 = vst.msk [vmem:[#allocation3 + $0x1c] sm:$0xf] %vm1778_vm5, %v1769_v61 }
 0x94d   : > { %2268 = vst.msk [vmem:[#allocation3 + $0x1c] sm:$0xf] %vm2260_vm3, %v2251_v22 }
 0x952   : > { %v2249_v3 = vpop.permute.xlu0 %2248 }
 0x953   : > { %2267 = vst.msk [vmem:[#allocation3 + $0x18] sm:$0xf] %vm2260_vm3, %v2249_v3 }
 0x95a   : > { %v2633_v26 = vld [vmem:[#allocation3 + $0x18] sm:$0xff] }
 0x95b   : > { %2605 = vmatmul.msk.bf16.gmra.mxu0 %vm321_vm0, %v2633_v26 }
 0x967   : > { %v2338_v57 = vpop.f32.mrf.mxu0 }
 0x968   : > { %v2339_v51 = vadd.f32 %v2678_v55, %v2338_v57 }
 0x96a   : > { %v2358_v60 = vpack.c.bf16 %v2339_v51, %v2339_v51 }
 0x96c   : > { %2367 = vst.msk [vmem:[%s3527_s18] sm:$0xf] %vm2366_vm4, %v2358_v60 }
 0x96f   : > { %v2340_v36 = vpop.f32.mrf.mxu0 }
 0x970   : > { %v2341_v62 = vadd.f32 %v2678_v55, %v2340_v36 }
 0x972   : > { %v2359_v17 = vpack.c.bf16 %v2341_v62, %v2341_v62 }
 0x974   : > { %2368 = vst.msk [vmem:[%s3527_s18 + $0x4] sm:$0xf] %vm2366_vm4, %v2359_v17 }
 0x99f   : > { %v2343_v63 = vpop.f32.mrf.mxu0 }
 0x9a0   : > { %v2344_v0 = vadd.f32 %v2678_v55, %v2343_v63 }
 0x9a2   : > { %v2360_v11 = vpack.c.bf16 %v2344_v0, %v2344_v0 }
 0x9a4   : > { %2369 = vst.msk [vmem:[%s3527_s18 + $0x8] sm:$0xf] %vm2366_vm4, %v2360_v11 }
 0x9a7   : > { %v2345_v1 = vpop.f32.mrf.mxu0 }
 0x9a8   : > { %v2346_v31 = vadd.f32 %v2678_v55, %v2345_v1 }
 0x9aa   : > { %v2361_v42 = vpack.c.bf16 %v2346_v31, %v2346_v31 }
 0x9ac   : > { %2370 = vst.msk [vmem:[%s3527_s18 + $0xc] sm:$0xf] %vm2366_vm4, %v2361_v42 }
 0x9c8   : > { %v2348_v49 = vpop.f32.mrf.mxu0 }
 0x9c9   : > { %v2349_v44 = vadd.f32 %v2678_v55, %v2348_v49 }
 0x9cb   : > { %v2362_v6 = vpack.c.bf16 %v2349_v44, %v2349_v44 }
 0x9cd   : > { %2371 = vst.msk [vmem:[%s3527_s18 + $0x10] sm:$0xf] %vm2366_vm4, %v2362_v6 }
 0x9d0   : > { %v2350_v16 = vpop.f32.mrf.mxu0 }
 0x9d1   : > { %v2351_v21 = vadd.f32 %v2678_v55, %v2350_v16 }
 0x9d3   : > { %v2363_v5 = vpack.c.bf16 %v2351_v21, %v2351_v21 }
 0x9d5   : > { %2372 = vst.msk [vmem:[%s3527_s18 + $0x14] sm:$0xf] %vm2366_vm4, %v2363_v5 }
 0x9d8   : > { %v2353_v59 = vpop.f32.mrf.mxu0 }
 0x9d9   : > { %v2354_v47 = vadd.f32 %v2678_v55, %v2353_v59 }
 0x9db   : > { %v2364_v7 = vpack.c.bf16 %v2354_v47, %v2354_v47 }
 0x9dd   : > { %2373 = vst.msk [vmem:[%s3527_s18 + $0x18] sm:$0xf] %vm2366_vm4, %v2364_v7 }
 0x9e0   : > { %v2355_v8 = vpop.f32.mrf.mxu0 }
 0x9e1   : > { %v2356_v24 = vadd.f32 %v2678_v55, %v2355_v8 }
 0x9e3   : > { %v2365_v48 = vpack.c.bf16 %v2356_v24, %v2356_v24 }
 0x9e5   : > { %2374 = vst.msk [vmem:[%s3527_s18 + $0x1c] sm:$0xf] %vm2366_vm4, %v2365_v48 }
 0x9e6 PF: > { %s17_s21 = sadd.s32 1, %s2848_s21  }
 0x9e7   : > { %p14_p7 = scmp.ge.s32.totalorder %s17_s21, 4  }
 0x9e9   :  { %16 = sbr.rel (!%p14_p7) target bundleno = 1 (0x1), region = 82 }
 0x9ee   :  { %2397 = vsyncpa [#allocation5], 1 }
 0x9ef   :  { %2399 = vsyncpa [#allocation5 + $0x1], 1 }

// kernel: tpu_custom_call.1
= control target key start
LH: loop header
LB: loop body
LE: loop exit
PB: predicated region body
PF: predicated region fallthrough
CT: control target
= control target key end

     0   :  { %11 = vsyncpa [#allocation5], 0  ;;  %s2902_s21 = smov 0   ;;  %s3548_s0 = inlined_call_operand.vmem [shape: bf16[128,32], index: 0, kind: input, shape index: {}]   ;;  %s3549_s1 = inlined_call_operand.vmem [shape: bf16[32,96], index: 1, kind: input, shape index: {}]   ;;  %s3550_s2 = inlined_call_operand.vmem [shape: f32[1,96], index: 2, kind: input, shape index: {}]   ;;  %s3551_s3 = inlined_call_operand.hbm [shape: f32[1,4,4,16,16], index: 3, kind: input, shape index: {}]   ;;  %s3552_s4 = inlined_call_operand.vmem [shape: bf16[32,32], index: 4, kind: input, shape index: {}]   ;;  %s3553_s5 = inlined_call_operand.vmem [shape: f32[1,32], index: 5, kind: input, shape index: {}]   ;;  %s3554_s6 = inlined_call_operand.vmem [shape: bf16[128,32], index: 6, kind: output, shape index: {}]  }
   0x1 LB: > { %s196_s24 = sshll.u32 %s3551_s3, 4  ;;  %s2443_s25 = sadd.s32 4294967295, %s2848_s21   ;;  %s2848_s21 = sphi %s2902_s21, %s17_s21   ;;  %s197_s24 = int_to_ptr.hbm [resolvable:$true] %s196_s24 }
   0x2   : > { %p2445_p0 = scmp.ge.s32.totalorder %s2848_s21, 1  ;;  %p179_p1 = scmp.lt.s32.totalorder %s2848_s21, 3 }
   0x3   : > { %p2650_p2 = scmp.eq.s32.totalorder %s2443_s25, 0  ;;  %s2850_s26 = smov [#allocation4]  }
   0x4   : > { %p180_p3 = pnand %p2445_p0, %p179_p1  ;;  %s198_s27 = sshll.u32 %s2850_s26, 4  ;;  %s199_s27 = int_to_ptr.vmem [resolvable:$true] %s198_s27 }
   0x5   : > { %s2851_s28 = smov 128   ;;  %s2852_s29 = smov 8  }
   0x6   : > { %p2646_p4 = pneg %p180_p3  ;;  %229 = sbr.rel (%p180_p3) target bundleno = 2534 (0x9e6), region = 44 }
   0x8   : > { %p2647_p5 = pnand %p2650_p2, %p2646_p4 }
   0xa   : > { %2649 = dma.hbm_to_vmem [thread:$0]  (!%p2647_p5), %s197_s24, 4096, %s199_s27, [#allocation5], %s2851_s28, %s2851_s28, %s2852_s29  }
   0xb   : > { %2843 = dma.done.wait (%p2650_p2), [#allocation5], 4096  }
   0xc   : > { %2845 = vsyncadd (%p2650_p2), [#allocation5], 4294963200  ;;  %s2450_s30 = sshll.u32 %s2443_s25, 3  ;;  %v2613_v0 = vld [vmem:[%s3549_s1 + $0x8] sm:$0xff]  ;;  %v2612_v1 = vld [vmem:[%s3549_s1] sm:$0xff]  ;;  %vm321_vm0 = vcmask 261120  }
   0xd   : > { %p261_p6 = scmp.lt.s32.totalorder %s2450_s30, 15  ;;  %2636 = vmatpush.bf16.msra.mxu1 %v2613_v0  ;;  %2638 = vmatpush.bf16.msra.mxu3 %v2613_v0  ;;  %v2677_v6 = vld [vmem:[%s3550_s2] ss:$0 sm:$0xff]  ;;  %vm371_vm1 = vcmask 781312   ;;  %s2853_s17 = smov 96   ;;  %vm403_vm2 = vcmask 64512  }
   0xe   : > { %340 = vmatpush.bf16.msra.mxu0 %v2613_v0  ;;  %2637 = vmatpush.bf16.msra.mxu2 %v2613_v0  ;;  %s2854_s18 = smov 64   ;;  %v390_v44 = vld [vmem:[#allocation4 + $0x10] sm:$0xff]  ;;  %v388_v46 = vld [vmem:[#allocation4] sm:$0xff]  ;;  %vm505_vm3 = vcmask 130048   ;;  %v391_v52 = vld [vmem:[#allocation4 + $0x18] sm:$0xff]  ;;  %s2855_s19 = smov 88  }
   0xf   : > { %s3572_s30 = smov (!%p261_p6, %s2450_s30), 15  ;;  %v389_v54 = vld [vmem:[#allocation4 + $0x8] sm:$0xff]  ;;  %v392_v60 = vld [vmem:[#allocation4 + $0x20] sm:$0xff]  ;;  %v394_v0 = vld [vmem:[#allocation4 + $0x30] sm:$0xff]  ;;  %s2856_s20 = smov 120  }
  0x10   : > { %s2451_s7 = sshll.u32 %s3572_s30, 2  ;;  %s2857_s22 = smov 56  }
  0x11   : > { %s264_s14 = scalar_lea.vmem %s3548_s0, %s2451_s7  ;;  %2639 = vmatpush.bf16.msra.mxu1 %v2612_v1  ;;  %2641 = vmatpush.bf16.msra.mxu3 %v2612_v1  ;;  %s2858_s23 = smov 80  }
  0x12   : > { %v2609_v2 = vld [vmem:[%s264_s14 + $0x8] sm:$0xff]  ;;  %v2611_v3 = vld [vmem:[%s264_s14 + $0x18] sm:$0xff]  ;;  %v2608_v4 = vld [vmem:[%s264_s14] sm:$0xff]  ;;  %341 = vmatpush.bf16.msra.mxu0 %v2612_v1  ;;  %2640 = vmatpush.bf16.msra.mxu2 %v2612_v1  ;;  %s2859_s24 = smov 112   ;;  %s2860_s25 = smov 72  }
  0x13   : > { %v2610_v5 = vld [vmem:[%s264_s14 + $0x10] sm:$0xff]  ;;  %s2861_s26 = smov 48   ;;  %s2862_s27 = smov 104  }
  0x14   : > { %2479 = vmatmul.msk.bf16.vlgmr.msra.gmra.mxu1 %vm321_vm0, %v2609_v2  ;;  %2481 = vmatmul.msk.bf16.vlgmr.msra.gmra.mxu3 %vm321_vm0, %v2611_v3  ;;  %s2863_s28 = smov 40   ;;  %s2864_s29 = smov 8  }
  0x15   : > { %2478 = vmatmul.msk.bf16.vlgmr.msra.gmra.mxu0 %vm321_vm0, %v2608_v4  ;;  %2480 = vmatmul.msk.bf16.vlgmr.msra.gmra.mxu2 %vm321_vm0, %v2610_v5  ;;  %v393_v5 = vld [vmem:[#allocation4 + $0x28] sm:$0xff]  ;;  %s2865_s8 = smov 16   ;;  %s2866_s9 = smov 24  }
  0x91   : > { %v348_v7 = vpop.f32.mrf.mxu1 }
  0x92   : > { %v349_v8 = vadd.f32 %v2677_v6, %v348_v7  ;;  %v343_v9 = vpop.f32.mrf.mxu0 }
  0x93   : > { %v344_v10 = vadd.f32 %v2677_v6, %v343_v9  ;;  %v395_v9 = vld [vmem:[#allocation4 + $0x38] sm:$0xff] }
  0x94   : > { %v365_v11 = vpack.c.bf16 %v349_v8, %v349_v8 }
  0x95   : > { %v363_v12 = vpack.c.bf16 %v344_v10, %v344_v10 }
  0x96   : > { %374 = vst.msk [vmem:[#allocation2 + $0x8] sm:$0xf] %vm371_vm1, %v365_v11 }
  0x97   : > { %v358_v13 = vpop.f32.mrf.mxu3  ;;  %372 = vst.msk [vmem:[#allocation2] sm:$0xf] %vm371_vm1, %v363_v12 }
  0x98   : > { %v359_v14 = vadd.f32 %v2677_v6, %v358_v13  ;;  %v353_v15 = vpop.f32.mrf.mxu2 }
  0x99   : > { %v350_v16 = vpop.f32.mrf.mxu1  ;;  %v354_v17 = vadd.f32 %v2677_v6, %v353_v15 }
  0x9a   : > { %v369_v18 = vpack.c.bf16 %v359_v14, %v359_v14  ;;  %v351_v19 = vadd.f32 %v2677_v6, %v350_v16  ;;  %v345_v20 = vpop.f32.mrf.mxu0 }
  0x9b   : > { %v367_v21 = vpack.c.bf16 %v354_v17, %v354_v17  ;;  %v346_v22 = vadd.f32 %v2677_v6, %v345_v20 }
  0x9c   : > { %378 = vst.msk [vmem:[#allocation2 + $0x18] sm:$0xf] %vm371_vm1, %v369_v18  ;;  %v366_v23 = vpack.c.bf16 %v351_v19, %v351_v19 }
  0x9d   : > { %376 = vst.msk [vmem:[#allocation2 + $0x10] sm:$0xf] %vm371_vm1, %v367_v21  ;;  %v364_v24 = vpack.c.bf16 %v346_v22, %v346_v22 }
  0x9e   : > { %375 = vst.msk [vmem:[#allocation2 + $0xc] sm:$0xf] %vm371_vm1, %v366_v23 }
  0x9f   : > { %v360_v25 = vpop.f32.mrf.mxu3  ;;  %373 = vst.msk [vmem:[#allocation2 + $0x4] sm:$0xf] %vm371_vm1, %v364_v24 }
  0xa0   : > { %v361_v26 = vadd.f32 %v2677_v6, %v360_v25  ;;  %v355_v27 = vpop.f32.mrf.mxu2 }
  0xa1   : > { %v356_v28 = vadd.f32 %v2677_v6, %v355_v27 }
  0xa2   : > { %v370_v29 = vpack.c.bf16 %v361_v26, %v361_v26 }
  0xa3   : > { %v368_v30 = vpack.c.bf16 %v356_v28, %v356_v28 }
  0xa4   : > { %379 = vst.msk [vmem:[#allocation2 + $0x1c] sm:$0xf] %vm371_vm1, %v370_v29 }
  0xa5   : > { %377 = vst.msk [vmem:[#allocation2 + $0x14] sm:$0xf] %vm371_vm1, %v368_v30  ;;  %v2942_v31 = vld [vmem:[#allocation2 + $0x8] sm:$0xff] }
  0xa6   : > { %429 = vrot.lane.b32.xlu0 %v2942_v31, %s2853_s17  ;;  %v2614_v33 = vld [vmem:[#allocation2] sm:$0xff] }
  0xa7   : > { %v2968_v2 = vld [vmem:[#allocation2] sm:$0xff] }
  0xab   : > { %v2945_v32 = vld [vmem:[#allocation2 + $0x18] sm:$0xff] }
  0xac   : > { %483 = vrot.lane.b32.xlu1 %v2945_v32, %s2853_s17  ;;  %v2948_v34 = vld [vmem:[#allocation2 + $0x10] sm:$0xff] }
  0xae   : > { %401 = vrot.lane.b32.xlu0 %v2614_v33, %s2853_s17 }
  0xb4   : > { %456 = vrot.lane.b32.xlu1 %v2948_v34, %s2853_s17 }
  0xbc   : > { %711 = vrot.lane.b32.xlu1 %v2614_v33, %s2854_s18 }
 0x118   : > { %v430_v35 = vpop.permute.xlu0 %429 }
 0x119   : > { %v435_v36 = vsel %vm403_vm2, %v430_v35, 0 }
 0x11a   : > { %444 = vmatpush.bf16.xpose.msrb.mxu2 %v435_v36 }
 0x11e   : > { %v484_v37 = vpop.permute.xlu1 %483 }
 0x11f   : > { %v489_v38 = vsel %vm403_vm2, %v484_v37, 0 }
 0x120   : > { %v402_v39 = vpop.permute.xlu0 %401 }
 0x121   : > { %2491 = vmatmul.msk.bf16.vlgmr.msrb.gmra.mxu2 %vm403_vm2, %v2942_v31  ;;  %v408_v40 = vsel %vm403_vm2, %v402_v39, 0 }
 0x122   : > { %417 = vmatpush.bf16.xpose.msrb.mxu1 %v408_v40 }
 0x126   : > { %v457_v41 = vpop.permute.xlu1 %456 }
 0x127   : > { %v462_v42 = vsel %vm403_vm2, %v457_v41, 0 }
 0x128   : > { %471 = vmatpush.bf16.xpose.msrb.mxu3 %v462_v42 }
 0x129   : > { %2486 = vmatmul.msk.bf16.vlgmr.msrb.gmra.mxu1 %vm403_vm2, %v2614_v33 }
 0x12a   : > { %498 = vmatpush.bf16.xpose.msra.mxu1 %v489_v38 }
 0x12e   : > { %v712_v43 = vpop.permute.xlu1 %711 }
 0x12f   : > { %2496 = vmatmul.msk.bf16.vlgmr.msrb.gmra.mxu3 %vm403_vm2, %v2948_v34  ;;  %724 = vmatpush.bf16.msra.mxu2 %v712_v43 }
 0x139   : > { %2501 = vmatmul.msk.bf16.vlgmr.msra.gmra.mxu1 %vm403_vm2, %v2945_v32 }
 0x1a4   : > { %v446_v45 = vpop.f32.mrf.mxu2 }
 0x1a5   : > { %v447_v47 = vadd.f32 %v446_v45, %v390_v44 }
 0x1a6   : > { %v419_v48 = vpop.f32.mrf.mxu1 }
 0x1a7   : > { %v420_v49 = vadd.f32 %v419_v48, %v388_v46  ;;  %v512_v50 = vsel %vm505_vm3, %v447_v47, -inf }
 0x1a8   : > { %513 = vmax.xlane.f32.xlu0 %v512_v50  ;;  %v2619_v50 = vld [vmem:[#allocation2 + $0x8] sm:$0xff] }
 0x1a9   : > { %v506_v51 = vsel %vm505_vm3, %v420_v49, -inf }
 0x1aa   : > { %507 = vmax.xlane.f32.xlu2 %v506_v51  ;;  %v3016_v51 = vld [vmem:[#allocation2 + $0x18] sm:$0xff] }
 0x1ac   : > { %v448_v53 = vpop.f32.mrf.mxu2 }
 0x1ad   : > { %v449_v55 = vadd.f32 %v448_v53, %v391_v52  ;;  %v2620_v53 = vld [vmem:[#allocation2 + $0x10] sm:$0xff] }
 0x1ae   : > { %v421_v56 = vpop.f32.mrf.mxu1 }
 0x1af   : > { %v422_v57 = vadd.f32 %v421_v56, %v389_v54  ;;  %v515_v58 = vsel %vm505_vm3, %v449_v55, -inf }
 0x1b0   : > { %516 = vmax.xlane.f32.xlu1 %v515_v58  ;;  %v3028_v58 = vld [vmem:[#allocation2] sm:$0xff] }
 0x1b1   : > { %v509_v59 = vsel %vm505_vm3, %v422_v57, -inf }
 0x1b2   : > { %v473_v61 = vpop.f32.mrf.mxu3  ;;  %510 = vmax.xlane.f32.xlu2 %v509_v59 }
 0x1b3   : > { %v474_v62 = vadd.f32 %v473_v61, %v392_v60 }
 0x1b5   : > { %v518_v63 = vsel %vm505_vm3, %v474_v62, -inf }
 0x1b6   : > { %v500_v1 = vpop.f32.mrf.mxu1 }
 0x1b7   : > { %v501_v3 = vadd.f32 %v500_v1, %v394_v0 }
 0x1b9   : > { %v524_v4 = vsel %vm505_vm3, %v501_v3, -inf }
 0x1ba   : > { %519 = vmax.xlane.f32.xlu2 %v518_v63  ;;  %v475_v6 = vpop.f32.mrf.mxu3 }
 0x1bb   : > { %v2973_v7 = vadd.f32 %v475_v6, %v393_v5 }
 0x1bc   : > { %847 = vrot.lane.b32.xlu0 %v2968_v2, %s2855_s19 }
 0x1bd   : > { %v521_v8 = vsel %vm505_vm3, %v2973_v7, -inf }
 0x1be   : > { %v502_v10 = vpop.f32.mrf.mxu1 }
 0x1bf   : > { %v2979_v11 = vadd.f32 %v502_v10, %v395_v9 }
 0x1c1   : > { %v527_v12 = vsel %vm505_vm3, %v2979_v11, -inf }
 0x1c2   : > { %525 = vmax.xlane.f32.xlu2 %v524_v4 }
 0x1c9   : > { %786 = vrot.lane.b32.xlu1 %v2945_v32, %s2854_s18 }
 0x1ca   : > { %522 = vmax.xlane.f32.xlu2 %v521_v8 }
 0x1d2   : > { %528 = vmax.xlane.f32.xlu2 %v527_v12 }
 0x1ea   : > { %736 = vrot.lane.b32.xlu2 %v2942_v31, %s2854_s18 }
 0x21b   : > { %v514_v13 = vpop.xlane.xlu0 %513 }
 0x21c   : > { %v532_v14 = vsub.f32 %v447_v47, %v514_v13 }
 0x21d   : > { %v508_v15 = vpop.xlane.xlu2 %507 }
 0x21e   : > { %v542_v16 = vmul.f32 1.442695, %v532_v14  ;;  %v530_v17 = vsub.f32 %v420_v49, %v508_v15 }
 0x220   : > { %2679 = vpow2.f32 %v542_v16  ;;  %v538_v18 = vmul.f32 1.442695, %v530_v17 }
 0x222   : > { %2681 = vpow2.f32 %v538_v18 }
 0x223   : > { %v517_v19 = vpop.xlane.xlu1 %516 }
 0x224   : > { %v533_v20 = vsub.f32 %v449_v55, %v517_v19 }
 0x225   : > { %v511_v21 = vpop.xlane.xlu2 %510 }
 0x226   : > { %v2985_v22 = vpop.eup %2679  ;;  %v544_v23 = vmul.f32 1.442695, %v533_v20  ;;  %v531_v24 = vsub.f32 %v422_v57, %v511_v21 }
 0x227   : > { %v560_v25 = vsel %vm505_vm3, %v2985_v22, 0.0 }
 0x228   : > { %v2989_v26 = vpop.eup %2681  ;;  %2683 = vpow2.f32 %v544_v23  ;;  %v540_v27 = vmul.f32 1.442695, %v531_v24  ;;  %561 = vadd.xlane.f32.xlu0 %v560_v25 }
 0x229   : > { %v554_v28 = vsel %vm505_vm3, %v2989_v26, 0.0 }
 0x22a   : > { %2685 = vpow2.f32 %v540_v27  ;;  %555 = vadd.xlane.f32.xlu2 %v554_v28 }
 0x22d   : > { %v520_v29 = vpop.xlane.xlu2 %519 }
 0x22e   : > { %v2993_v30 = vpop.eup %2683  ;;  %v534_v31 = vsub.f32 %v474_v62, %v520_v29  ;;  %v848_v47 = vpop.permute.xlu0 %847 }
 0x22f   : > { %v563_v32 = vsel %vm505_vm3, %v2993_v30, 0.0  ;;  %v853_v49 = vsel %vm403_vm2, %v848_v47, 0 }
 0x230   : > { %v2997_v33 = vpop.eup %2685  ;;  %v546_v35 = vmul.f32 1.442695, %v534_v31  ;;  %564 = vadd.xlane.f32.xlu1 %v563_v32 }
 0x231   : > { %v557_v36 = vsel %vm505_vm3, %v2997_v33, 0.0 }
 0x232   : > { %2687 = vpow2.f32 %v546_v35  ;;  %558 = vadd.xlane.f32.xlu2 %v557_v36 }
 0x235   : > { %v526_v37 = vpop.xlane.xlu2 %525 }
 0x236   : > { %v536_v38 = vsub.f32 %v501_v3, %v526_v37 }
 0x238   : > { %v3001_v39 = vpop.eup %2687  ;;  %v550_v40 = vmul.f32 1.442695, %v536_v38 }
 0x239   : > { %v566_v41 = vsel %vm505_vm3, %v3001_v39, 0.0 }
 0x23a   : > { %2689 = vpow2.f32 %v550_v40  ;;  %567 = vadd.xlane.f32.xlu2 %v566_v41 }
 0x23b   : > { %v787_v42 = vpop.permute.xlu1 %786 }
 0x23c   : > { %799 = vmatpush.bf16.msrb.mxu2 %v787_v42  ;;  %761 = vrot.lane.b32.xlu0 %v2948_v34, %s2854_s18  ;;  %s3527_s18 = scalar_lea.vmem %s3554_s6, %s2451_s7 }
 0x23d   : > { %v523_v43 = vpop.xlane.xlu2 %522 }
 0x23e   : > { %v535_v34 = vsub.f32 %v2973_v7, %v523_v43 }
 0x240   : > { %v3007_v44 = vpop.eup %2689  ;;  %v548_v52 = vmul.f32 1.442695, %v535_v34 }
 0x241   : > { %v572_v45 = vsel %vm505_vm3, %v3007_v44, 0.0 }
 0x242   : > { %573 = vadd.xlane.f32.xlu2 %v572_v45  ;;  %2691 = vpow2.f32 %v548_v52 }
 0x245   : > { %v529_v46 = vpop.xlane.xlu2 %528 }
 0x246   : > { %v537_v54 = vsub.f32 %v2979_v11, %v529_v46 }
 0x248   : > { %v552_v55 = vmul.f32 1.442695, %v537_v54  ;;  %v3023_v56 = vpop.eup %2691 }
 0x249   : > { %845 = vrot.lane.b32.xlu1 %v2968_v2, %s2856_s20  ;;  %v569_v57 = vsel %vm505_vm3, %v3023_v56, 0.0 }
 0x24a   : > { %2693 = vpow2.f32 %v552_v55 }
 0x24d   : > { %v737_v48 = vpop.permute.xlu2 %736 }
 0x24e   : > { %749 = vmatpush.bf16.msra.mxu3 %v737_v48 }
 0x250   : > { %v3030_v59 = vpop.eup %2693 }
 0x251   : > { %876 = vrot.lane.b32.xlu1 %v2619_v50, %s2855_s19  ;;  %v575_v60 = vsel %vm505_vm3, %v3030_v59, 0.0 }
 0x252   : > { %862 = vmatpush.bf16.xpose.msrb.mxu3 %v853_v49 }
 0x259   : > { %934 = vrot.lane.b32.xlu1 %v3016_v51, %s2855_s19 }
 0x25a   : > { %905 = vrot.lane.b32.xlu2 %v2620_v53, %s2855_s19 }
 0x261   : > { %1211 = vrot.lane.b32.xlu1 %v2620_v53, %s2857_s22 }
 0x262   : > { %874 = vrot.lane.b32.xlu2 %v2619_v50, %s2856_s20 }
 0x266   : > { %570 = vadd.xlane.f32.xlu0 %v569_v57 }
 0x26a   : > { %1329 = vrot.lane.b32.xlu2 %v3028_v58, %s2858_s23 }
 0x26e   : > { %576 = vadd.xlane.f32.xlu0 %v575_v60 }
 0x282   : > { %903 = vrot.lane.b32.xlu0 %v2620_v53, %s2856_s20 }
 0x28a   : > { %932 = vrot.lane.b32.xlu0 %v3016_v51, %s2856_s20 }
 0x292   : > { %1161 = vrot.lane.b32.xlu0 %v2968_v2, %s2857_s22 }
 0x29a   : > { %1186 = vrot.lane.b32.xlu0 %v2619_v50, %s2857_s22 }
 0x29b   : > { %v562_v61 = vpop.xlane.xlu0 %561 }
 0x29c   : > { %2695 = vrcp.f32 %v562_v61  ;;  %vm613_vm5 = vweird.f32 %v562_v61  ;;  %v619_v2 = vand.u32 2147483648, %v562_v61  ;;  %v617_v10 = vand.u32 2147483647, %v562_v61 }
 0x29d   : > { %v556_v62 = vpop.xlane.xlu2 %555 }
 0x29e   : > { %2697 = vrcp.f32 %v556_v62  ;;  %vm583_vm8 = vweird.f32 %v556_v62  ;;  %v589_v14 = vand.u32 2147483648, %v556_v62  ;;  %v587_v17 = vand.u32 2147483647, %v556_v62 }
 0x29f   : > { %v620_v20 = vor.u32 1.1754944e-38, %v619_v2  ;;  %vm618_vm10 = vcmp.eq.f32.partialorder %v617_v10, 8.507059e+37 }
 0x2a0   : > { %v590_v29 = vor.u32 1.1754944e-38, %v589_v14  ;;  %vm588_vm11 = vcmp.eq.f32.partialorder %v587_v17, 8.507059e+37 }
 0x2a2   : > { %v2696_v63 = vpop.eup %2695 }
 0x2a3   : > { %v609_v0 = vmul.f32 %v2696_v63, %v562_v61  ;;  %v565_v1 = vpop.xlane.xlu1 %564  ;;  %vm614_vm4 = vweird.f32 %v2696_v63 }
 0x2a4   : > { %v2698_v3 = vpop.eup %2697  ;;  %2699 = vrcp.f32 %v565_v1  ;;  %vm3042_vm7 = vmor %vm613_vm5, %vm614_vm4  ;;  %v632_v31 = vand.u32 2147483647, %v565_v1  ;;  %v634_v32 = vand.u32 2147483648, %v565_v1  ;;  %vm628_vm13 = vweird.f32 %v565_v1 }
 0x2a5   : > { %v610_v4 = vsub.f32 1.0, %v609_v0  ;;  %v579_v5 = vmul.f32 %v2698_v3, %v556_v62  ;;  %v559_v6 = vpop.xlane.xlu2 %558  ;;  %vm584_vm6 = vweird.f32 %v2698_v3 }
 0x2a6   : > { %2701 = vrcp.f32 %v559_v6  ;;  %vm3048_vm9 = vmor %vm583_vm8, %vm584_vm6  ;;  %v602_v40 = vand.u32 2147483647, %v559_v6  ;;  %v604_v41 = vand.u32 2147483648, %v559_v6  ;;  %vm633_vm1 = vcmp.eq.f32.partialorder %v632_v31, 8.507059e+37 }
 0x2a7   : > { %v611_v7 = vmul.f32 %v2696_v63, %v610_v4  ;;  %v580_v8 = vsub.f32 1.0, %v579_v5  ;;  %v635_v46 = vor.u32 1.1754944e-38, %v634_v32  ;;  %vm598_vm4 = vweird.f32 %v559_v6 }
 0x2a8   : > { %v605_v34 = vor.u32 1.1754944e-38, %v604_v41  ;;  %vm603_vm6 = vcmp.eq.f32.partialorder %v602_v40, 8.507059e+37 }
 0x2a9   : > { %v612_v9 = vadd.f32 %v2696_v63, %v611_v7  ;;  %v581_v11 = vmul.f32 %v2698_v3, %v580_v8 }
 0x2aa   : > { %v2700_v12 = vpop.eup %2699 }
 0x2ab   : > { %v616_v15 = vsel %vm3042_vm7, %v2696_v63, %v612_v9  ;;  %v582_v16 = vadd.f32 %v2698_v3, %v581_v11  ;;  %v624_v18 = vmul.f32 %v2700_v12, %v565_v1  ;;  %vm629_vm12 = vweird.f32 %v2700_v12 }
 0x2ac   : > { %v2702_v19 = vpop.eup %2701  ;;  %v621_v28 = vsel %vm618_vm10, %v620_v20, %v616_v15  ;;  %vm630_vm15 = vmor %vm628_vm13, %vm629_vm12 }
 0x2ad   : > { %v586_v23 = vsel %vm3048_vm9, %v2698_v3, %v582_v16  ;;  %v625_v24 = vsub.f32 1.0, %v624_v18  ;;  %v594_v25 = vmul.f32 %v2702_v19, %v559_v6  ;;  %v3054_v27 = vpop.xlane.xlu2 %567  ;;  %v622_v42 = vmul.f32 %v2985_v22, %v621_v28 }
 0x2ae   : > { %v762_v35 = vpop.permute.xlu0 %761  ;;  %v591_v38 = vsel %vm588_vm11, %v590_v29, %v586_v23  ;;  %vm599_vm14 = vweird.f32 %v2702_v19  ;;  %2703 = vrcp.f32 %v3054_v27  ;;  %v649_v17 = vand.u32 2147483648, %v3054_v27 }
 0x2af   : > { %v626_v36 = vmul.f32 %v2700_v12, %v625_v24  ;;  %v595_v37 = vsub.f32 1.0, %v594_v25  ;;  %774 = vmatpush.bf16.msrb.mxu1 %v762_v35  ;;  %v592_v47 = vmul.f32 %v2989_v26, %v591_v38  ;;  %vm600_vm5 = vmor %vm598_vm4, %vm599_vm14  ;;  %v700_v52 = vpack.c.bf16 %v622_v42, %v622_v42 }
 0x2b0   : > { %vm643_vm8 = vweird.f32 %v3054_v27  ;;  %v650_v23 = vor.u32 1.1754944e-38, %v649_v17 }
 0x2b1   : > { %v627_v43 = vadd.f32 %v2700_v12, %v626_v36  ;;  %v596_v45 = vmul.f32 %v2702_v19, %v595_v37  ;;  %v698_v57 = vpack.c.bf16 %v592_v47, %v592_v47  ;;  %v733_v62 = vunpack.c.l.b16 %v700_v52 }
 0x2b3   : > { %v631_v48 = vsel %vm630_vm15, %v2700_v12, %v627_v43  ;;  %v597_v49 = vadd.f32 %v2702_v19, %v596_v45  ;;  %v708_v0 = vunpack.c.l.b16 %v698_v57 }
 0x2b4   : > { %v636_v50 = vsel %vm633_vm1, %v635_v46, %v631_v48  ;;  %v2704_v9 = vpop.eup %2703 }
 0x2b5   : > { %v637_v53 = vmul.f32 %v2993_v30, %v636_v50  ;;  %v601_v54 = vsel %vm600_vm5, %v2702_v19, %v597_v49  ;;  %v3059_v22 = vpop.xlane.xlu2 %573  ;;  %v639_v10 = vmul.f32 %v2704_v9, %v3054_v27  ;;  %vm644_vm7 = vweird.f32 %v2704_v9 }
 0x2b6   : > { %v606_v55 = vsel %vm603_vm6, %v605_v34, %v601_v54  ;;  %2705 = vrcp.f32 %v3059_v22  ;;  %v647_v19 = vand.u32 2147483647, %v3054_v27  ;;  %vm645_vm9 = vmor %vm643_vm8, %vm644_vm7  ;;  %vm673_vm13 = vweird.f32 %v3059_v22 }
 0x2b7   : > { %v701_v60 = vpack.c.bf16 %v637_v53, %v637_v53  ;;  %v607_v61 = vmul.f32 %v2997_v33, %v606_v55  ;;  %v640_v11 = vsub.f32 1.0, %v639_v10  ;;  %v679_v27 = vand.u32 2147483648, %v3059_v22 }
 0x2b8   : > { %vm648_vm10 = vcmp.eq.f32.partialorder %v647_v19, 8.507059e+37  ;;  %v677_v41 = vand.u32 2147483647, %v3059_v22 }
 0x2b9   : > { %v734_v26 = vunpack.c.l.b16 %v701_v60  ;;  %v699_v63 = vpack.c.bf16 %v607_v61, %v607_v61  ;;  %v641_v13 = vmul.f32 %v2704_v9, %v640_v11  ;;  %v680_v49 = vor.u32 1.1754944e-38, %v679_v27 }
 0x2ba   : > { %vm678_vm5 = vcmp.eq.f32.partialorder %v677_v41, 8.507059e+37 }
 0x2bb   : > { %v709_v1 = vunpack.c.l.b16 %v699_v63  ;;  %v846_v3 = vpop.permute.xlu1 %845  ;;  %v735_v4 = vpack.c.b16 %v734_v26, %v733_v62  ;;  %v642_v16 = vadd.f32 %v2704_v9, %v641_v13 }
 0x2bc   : > { %v2706_v12 = vpop.eup %2705 }
 0x2bd   : > { %v906_v5 = vpop.permute.xlu2 %905  ;;  %2503 = vmatmul.msk.bf16.vlgmr.msra.gmra.mxu3 %vm505_vm3, %v735_v4  ;;  %v710_v30 = vpack.c.b16 %v709_v1, %v708_v0  ;;  %v669_v14 = vmul.f32 %v2706_v12, %v3059_v22  ;;  %v646_v21 = vsel %vm645_vm9, %v2704_v9, %v642_v16  ;;  %vm674_vm11 = vweird.f32 %v2706_v12 }
 0x2be   : > { %v911_v6 = vsel %vm403_vm2, %v906_v5, 0  ;;  %v651_v29 = vsel %vm648_vm10, %v650_v23, %v646_v21  ;;  %vm3078_vm14 = vmor %vm673_vm13, %vm674_vm11  ;;  %vm814_vm10 = vcmask 60416  }
 0x2bf   : > { %2502 = vmatmul.msk.bf16.vlgmr.msra.gmra.mxu2 %vm505_vm3, %v710_v30  ;;  %v670_v18 = vsub.f32 1.0, %v669_v14  ;;  %v652_v38 = vmul.f32 %v3001_v39, %v651_v29 }
 0x2c0   : > { %920 = vmatpush.bf16.xpose.msra.mxu2 %v911_v6 }
 0x2c1   : > { %v671_v24 = vmul.f32 %v2706_v12, %v670_v18  ;;  %v702_v48 = vpack.c.bf16 %v652_v38, %v652_v38 }
 0x2c3   : > { %v877_v7 = vpop.permute.xlu1 %876  ;;  %v672_v35 = vadd.f32 %v2706_v12, %v671_v24  ;;  %v758_v60 = vunpack.c.l.b16 %v702_v48 }
 0x2c4   : > { %v882_v8 = vsel %vm403_vm2, %v877_v7, 0 }
 0x2c5   : > { %891 = vmatpush.bf16.xpose.msra.mxu1 %v882_v8  ;;  %v676_v46 = vsel %vm3078_vm14, %v2706_v12, %v672_v35  ;;  %v875_v8 = vpop.permute.xlu2 %874 }
 0x2c6   : > { %v681_v53 = vsel %vm678_vm5, %v680_v49, %v676_v46  ;;  %v833_v46 = vld [vmem:[#allocation4 + $0x48] sm:$0xff] }
 0x2c7   : > { %v682_v61 = vmul.f32 %v3007_v44, %v681_v53 }
 0x2cb   : > { %v935_v33 = vpop.permute.xlu1 %934 }
 0x2cc   : > { %v940_v2 = vsel %vm403_vm2, %v935_v33, 0 }
 0x2cd   : > { %2510 = vmatmul.msk.bf16.vlgmr.msrb.gmra.mxu3 %vm403_vm2, %v846_v3  ;;  %v1330_v9 = vpop.permute.xlu2 %1329 }
 0x2ce   : > { %949 = vmatpush.bf16.xpose.msra.mxu3 %v940_v2 }
 0x2d3   : > { %v1212_v33 = vpop.permute.xlu1 %1211 }
 0x2d9   : > { %v571_v15 = vpop.xlane.xlu0 %570 }
 0x2da   : > { %2707 = vrcp.f32 %v571_v15  ;;  %v664_v32 = vand.u32 2147483648, %v571_v15  ;;  %v662_v37 = vand.u32 2147483647, %v571_v15  ;;  %vm658_vm15 = vweird.f32 %v571_v15 }
 0x2dc   : > { %v665_v45 = vor.u32 1.1754944e-38, %v664_v32  ;;  %vm663_vm4 = vcmp.eq.f32.partialorder %v662_v37, 8.507059e+37  ;;  %v838_v37 = vld [vmem:[#allocation4 + $0x70] sm:$0xff] }
 0x2e0   : > { %v2708_v20 = vpop.eup %2707 }
 0x2e1   : > { %v654_v25 = vmul.f32 %v2708_v20, %v571_v15  ;;  %v577_v28 = vpop.xlane.xlu0 %576  ;;  %vm659_vm12 = vweird.f32 %v2708_v20 }
 0x2e2   : > { %2709 = vrcp.f32 %v577_v28  ;;  %vm660_vm1 = vmor %vm658_vm15, %vm659_vm12  ;;  %v694_v54 = vand.u32 2147483648, %v577_v28  ;;  %v692_v57 = vand.u32 2147483647, %v577_v28  ;;  %vm688_vm7 = vweird.f32 %v577_v28 }
 0x2e3   : > { %v655_v31 = vsub.f32 1.0, %v654_v25 }
 0x2e4   : > { %v695_v63 = vor.u32 1.1754944e-38, %v694_v54  ;;  %vm693_vm9 = vcmp.eq.f32.partialorder %v692_v57, 8.507059e+37  ;;  %v839_v54 = vld [vmem:[#allocation4 + $0x78] sm:$0xff] }
 0x2e5   : > { %v656_v36 = vmul.f32 %v2708_v20, %v655_v31 }
 0x2e7   : > { %v657_v42 = vadd.f32 %v2708_v20, %v656_v36  ;;  %v834_v36 = vld [vmem:[#allocation4 + $0x50] sm:$0xff] }
 0x2e8   : > { %v2710_v43 = vpop.eup %2709 }
 0x2e9   : > { %v661_v47 = vsel %vm660_vm1, %v2708_v20, %v657_v42  ;;  %v684_v39 = vmul.f32 %v2710_v43, %v577_v28  ;;  %vm689_vm6 = vweird.f32 %v2710_v43  ;;  %v832_v20 = vld [vmem:[#allocation4 + $0x40] sm:$0xff] }
 0x2ea   : > { %v666_v50 = vsel %vm663_vm4, %v665_v45, %v661_v47  ;;  %vm690_vm8 = vmor %vm688_vm7, %vm689_vm6 }
 0x2eb   : > { %v667_v34 = vmul.f32 %v3023_v56, %v666_v50  ;;  %v685_v52 = vsub.f32 1.0, %v684_v39  ;;  %v704_v56 = vpack.c.bf16 %v682_v61, %v682_v61  ;;  %v835_v39 = vld [vmem:[#allocation4 + $0x58] sm:$0xff] }
 0x2ed   : > { %v703_v22 = vpack.c.bf16 %v667_v34, %v667_v34  ;;  %v686_v55 = vmul.f32 %v2710_v43, %v685_v52  ;;  %v783_v6 = vunpack.c.l.b16 %v704_v56 }
 0x2ef   : > { %v759_v62 = vunpack.c.l.b16 %v703_v22  ;;  %v687_v26 = vadd.f32 %v2710_v43, %v686_v55  ;;  %v836_v55 = vld [vmem:[#allocation4 + $0x60] sm:$0xff] }
 0x2f1   : > { %v691_v0 = vsel %vm690_vm8, %v2710_v43, %v687_v26  ;;  %v760_v1 = vpack.c.b16 %v759_v62, %v758_v60 }
 0x2f2   : > { %v696_v3 = vsel %vm693_vm9, %v695_v63, %v691_v0  ;;  %v837_v63 = vld [vmem:[#allocation4 + $0x68] sm:$0xff] }
 0x2f3   : > { %v697_v4 = vmul.f32 %v3030_v59, %v696_v3  ;;  %2504 = vmatmul.msk.bf16.vlgmr.msrb.gmra.mxu1 %vm505_vm3, %v760_v1  ;;  %v1335_v59 = vsel %vm403_vm2, %v1330_v9, 0 }
 0x2f4   : > { %v904_v5 = vpop.permute.xlu0 %903 }
 0x2f5   : > { %v705_v30 = vpack.c.bf16 %v697_v4, %v697_v4 }
 0x2f7   : > { %v784_v7 = vunpack.c.l.b16 %v705_v30 }
 0x2f9   : > { %v785_v44 = vpack.c.b16 %v784_v7, %v783_v6 }
 0x2fb   : > { %2505 = vmatmul.msk.bf16.vlgmr.msrb.gmra.mxu2 %vm505_vm3, %v785_v44 }
 0x2fc   : > { %1224 = vmatpush.bf16.msrb.mxu2 %v1212_v33  ;;  %v933_v2 = vpop.permute.xlu0 %932 }
 0x2fd   : > { %2525 = vmatmul.msk.bf16.vlgmr.msra.gmra.mxu3 %vm403_vm2, %v933_v2 }
 0x303   : > { %2515 = vmatmul.msk.bf16.vlgmr.msra.gmra.mxu1 %vm403_vm2, %v875_v8 }
 0x304   : > { %v1162_v10 = vpop.permute.xlu0 %1161 }
 0x305   : > { %1174 = vmatpush.bf16.msrb.mxu0 %v1162_v10 }
 0x309   : > { %1344 = vmatpush.bf16.xpose.msra.mxu0 %v1335_v59 }
 0x30b   : > { %2520 = vmatmul.msk.bf16.vlgmr.msra.gmra.mxu2 %vm403_vm2, %v904_v5 }
 0x30c   : > { %v1187_v11 = vpop.permute.xlu0 %1186 }
 0x30d   : > { %1199 = vmatpush.bf16.msrb.mxu1 %v1187_v11 }
 0x340   : > { %v751_v12 = vpop.f32.mrf.mxu3 }
 0x341   : > { %v808_v13 = vpack.c.bf16 %v751_v12, %v751_v12 }
 0x342   : > { %v726_v14 = vpop.f32.mrf.mxu2 }
 0x343   : > { %817 = vst.msk [vmem:[#allocation3 + $0x8] sm:$0xf] %vm814_vm10, %v808_v13  ;;  %v806_v15 = vpack.c.bf16 %v726_v14, %v726_v14 }
 0x345   : > { %815 = vst.msk [vmem:[#allocation3] sm:$0xf] %vm814_vm10, %v806_v15 }
 0x348   : > { %v753_v16 = vpop.f32.mrf.mxu3 }
 0x349   : > { %v809_v17 = vpack.c.bf16 %v753_v16, %v753_v16 }
 0x34a   : > { %v728_v18 = vpop.f32.mrf.mxu2 }
 0x34b   : > { %818 = vst.msk [vmem:[#allocation3 + $0xc] sm:$0xf] %vm814_vm10, %v809_v17  ;;  %v807_v19 = vpack.c.bf16 %v728_v18, %v728_v18 }
 0x34d   : > { %816 = vst.msk [vmem:[#allocation3 + $0x4] sm:$0xf] %vm814_vm10, %v807_v19 }
 0x350   : > { %v864_v21 = vpop.f32.mrf.mxu3 }
 0x351   : > { %v865_v23 = vadd.f32 %v864_v21, %v832_v20 }
 0x353   : > { %v956_v24 = vsel %vm505_vm3, %v865_v23, -inf }
 0x354   : > { %957 = vmax.xlane.f32.xlu2 %v956_v24 }
 0x358   : > { %v866_v29 = vpop.f32.mrf.mxu3 }
 0x359   : > { %v867_v48 = vadd.f32 %v866_v29, %v833_v46 }
 0x35b   : > { %v959_v53 = vsel %vm505_vm3, %v867_v48, -inf }
 0x370   : > { %v776_v25 = vpop.f32.mrf.mxu1 }
 0x371   : > { %v810_v28 = vpack.c.bf16 %v776_v25, %v776_v25 }
 0x373   : > { %819 = vst.msk [vmem:[#allocation3 + $0x10] sm:$0xf] %vm814_vm10, %v810_v28 }
 0x378   : > { %v778_v31 = vpop.f32.mrf.mxu1 }
 0x379   : > { %v811_v32 = vpack.c.bf16 %v778_v31, %v778_v31 }
 0x37b   : > { %820 = vst.msk [vmem:[#allocation3 + $0x14] sm:$0xf] %vm814_vm10, %v811_v32 }
 0x37e   : > { %v801_v35 = vpop.f32.mrf.mxu2 }
 0x37f   : > { %v812_v38 = vpack.c.bf16 %v801_v35, %v801_v35  ;;  %v3142_v35 = vld [vmem:[#allocation2 + $0x10] sm:$0xff] }
 0x380   : > { %v893_v27 = vpop.f32.mrf.mxu1  ;;  %v951_v40 = vpop.f32.mrf.mxu3 }
 0x381   : > { %821 = vst.msk [vmem:[#allocation3 + $0x18] sm:$0xf] %vm814_vm10, %v812_v38  ;;  %v894_v41 = vadd.f32 %v893_v27, %v834_v36  ;;  %v3102_v42 = vadd.f32 %v951_v40, %v838_v37  ;;  %v3146_v36 = vld [vmem:[#allocation2 + $0x8] sm:$0xff]  ;;  %v3155_v38 = vld [vmem:[#allocation2] sm:$0xff] }
 0x383   : > { %v962_v43 = vsel %vm505_vm3, %v894_v41, -inf  ;;  %v974_v45 = vsel %vm505_vm3, %v3102_v42, -inf }
 0x384   : > { %963 = vmax.xlane.f32.xlu1 %v962_v43  ;;  %975 = vmax.xlane.f32.xlu2 %v974_v45 }
 0x386   : > { %v803_v47 = vpop.f32.mrf.mxu2 }
 0x387   : > { %v813_v49 = vpack.c.bf16 %v803_v47, %v803_v47 }
 0x388   : > { %v895_v50 = vpop.f32.mrf.mxu1  ;;  %v953_v22 = vpop.f32.mrf.mxu3 }
 0x389   : > { %822 = vst.msk [vmem:[#allocation3 + $0x1c] sm:$0xf] %vm814_vm10, %v813_v49  ;;  %v896_v34 = vadd.f32 %v895_v50, %v835_v39  ;;  %v3110_v60 = vadd.f32 %v953_v22, %v839_v54 }
 0x38b   : > { %v965_v52 = vsel %vm505_vm3, %v896_v34, -inf  ;;  %v977_v26 = vsel %vm505_vm3, %v3110_v60, -inf }
 0x38c   : > { %966 = vmax.xlane.f32.xlu0 %v965_v52  ;;  %960 = vmax.xlane.f32.xlu1 %v959_v53 }
 0x38e   : > { %v922_v57 = vpop.f32.mrf.mxu2 }
 0x38f   : > { %v923_v61 = vadd.f32 %v922_v57, %v836_v55 }
 0x391   : > { %v968_v62 = vsel %vm505_vm3, %v923_v61, -inf }
 0x394   : > { %969 = vmax.xlane.f32.xlu0 %v968_v62  ;;  %978 = vmax.xlane.f32.xlu1 %v977_v26 }
 0x396   : > { %v924_v0 = vpop.f32.mrf.mxu2 }
 0x397   : > { %v925_v1 = vadd.f32 %v924_v0, %v837_v63 }
 0x399   : > { %v971_v3 = vsel %vm505_vm3, %v925_v1, -inf }
 0x39a   : > { %972 = vmax.xlane.f32.xlu2 %v971_v3 }
 0x3a8   : > { %1327 = vrot.lane.b32.xlu0 %v3028_v58, %s2859_s24 }
 0x3c7   : > { %v958_v56 = vpop.xlane.xlu2 %957 }
 0x3c8   : > { %v980_v4 = vsub.f32 %v865_v23, %v958_v56 }
 0x3ca   : > { %v988_v5 = vmul.f32 1.442695, %v980_v4 }
 0x3cc   : > { %2711 = vpow2.f32 %v988_v5 }
 0x3d2   : > { %v3118_v30 = vpop.eup %2711 }
 0x3d3   : > { %v1004_v6 = vsel %vm505_vm3, %v3118_v30, 0.0 }
 0x3d4   : > { %1005 = vadd.xlane.f32.xlu0 %v1004_v6 }
 0x3f7   : > { %v964_v7 = vpop.xlane.xlu1 %963  ;;  %v976_v14 = vpop.xlane.xlu2 %975 }
 0x3f8   : > { %v982_v8 = vsub.f32 %v894_v41, %v964_v7  ;;  %v986_v37 = vsub.f32 %v3102_v42, %v976_v14 }
 0x3fa   : > { %v992_v44 = vmul.f32 1.442695, %v982_v8  ;;  %v1000_v27 = vmul.f32 1.442695, %v986_v37 }
 0x3fc   : > { %2713 = vpow2.f32 %v992_v44 }
 0x3ff   : > { %v961_v33 = vpop.xlane.xlu1 %960  ;;  %v967_v2 = vpop.xlane.xlu0 %966 }
 0x400   : > { %v981_v9 = vsub.f32 %v867_v48, %v961_v33  ;;  %v983_v10 = vsub.f32 %v896_v34, %v967_v2  ;;  %v3172_v48 = vld [vmem:[#allocation2 + $0x18] sm:$0xff] }
 0x402   : > { %v3122_v59 = vpop.eup %2713  ;;  %v990_v11 = vmul.f32 1.442695, %v981_v9  ;;  %v994_v12 = vmul.f32 1.442695, %v983_v10 }
 0x403   : > { %v1010_v13 = vsel %vm505_vm3, %v3122_v59, 0.0 }
 0x404   : > { %2715 = vpow2.f32 %v990_v11  ;;  %1011 = vadd.xlane.f32.xlu2 %v1010_v13 }
 0x405   : > { %2717 = vpow2.f32 %v994_v12 }
 0x407   : > { %v970_v15 = vpop.xlane.xlu0 %969  ;;  %v979_v40 = vpop.xlane.xlu1 %978 }
 0x408   : > { %v984_v16 = vsub.f32 %v923_v61, %v970_v15  ;;  %v987_v41 = vsub.f32 %v3110_v60, %v979_v40 }
 0x40a   : > { %v3126_v17 = vpop.eup %2715  ;;  %v996_v18 = vmul.f32 1.442695, %v984_v16  ;;  %v1002_v43 = vmul.f32 1.442695, %v987_v41 }
 0x40b   : > { %v3128_v19 = vpop.eup %2717  ;;  %v1007_v20 = vsel %vm505_vm3, %v3126_v17, 0.0 }
 0x40c   : > { %1008 = vadd.xlane.f32.xlu2 %v1007_v20  ;;  %v1013_v21 = vsel %vm505_vm3, %v3128_v19, 0.0  ;;  %2719 = vpow2.f32 %v996_v18 }
 0x40d   : > { %1014 = vadd.xlane.f32.xlu1 %v1013_v21  ;;  %v973_v23 = vpop.xlane.xlu2 %972 }
 0x40e   : > { %v985_v24 = vsub.f32 %v925_v1, %v973_v23 }
 0x410   : > { %v998_v25 = vmul.f32 1.442695, %v985_v24 }
 0x412   : > { %2721 = vpow2.f32 %v998_v25  ;;  %v3134_v28 = vpop.eup %2719 }
 0x413   : > { %v1016_v29 = vsel %vm505_vm3, %v3134_v28, 0.0  ;;  %2723 = vpow2.f32 %v1000_v27 }
 0x414   : > { %2725 = vpow2.f32 %v1002_v43 }
 0x415   : > { %1017 = vadd.xlane.f32.xlu1 %v1016_v29 }
 0x418   : > { %v3138_v31 = vpop.eup %2721 }
 0x419   : > { %v1019_v32 = vsel %vm505_vm3, %v3138_v31, 0.0 }
 0x41a   : > { %1020 = vadd.xlane.f32.xlu0 %v1019_v32  ;;  %v3168_v47 = vpop.permute.xlu0 %1327 }
 0x424   : > { %1387 = vrot.lane.b32.xlu2 %v3142_v35, %s2858_s23 }
 0x42e   : > { %1236 = vrot.lane.b32.xlu1 %v3016_v51, %s2857_s22  ;;  %1358 = vrot.lane.b32.xlu0 %v3146_v36, %s2858_s23  ;;  %v3160_v51 = vpop.eup %2723 }
 0x42f   : > { %v1022_v45 = vsel %vm505_vm3, %v3160_v51, 0.0  ;;  %v3164_v42 = vpop.eup %2725 }
 0x430   : > { %v1025_v46 = vsel %vm505_vm3, %v3164_v42, 0.0 }
 0x436   : > { %1356 = vrot.lane.b32.xlu0 %v3146_v36, %s2859_s24 }
 0x43e   : > { %1811 = vrot.lane.b32.xlu0 %v3155_v38, %s2860_s25 }
 0x447   : > { %v1006_v39 = vpop.xlane.xlu0 %1005 }
 0x448   : > { %2727 = vrcp.f32 %v1006_v39  ;;  %v1039_v62 = vand.u32 2147483648, %v1006_v39  ;;  %vm1033_vm12 = vweird.f32 %v1006_v39  ;;  %v1037_v63 = vand.u32 2147483647, %v1006_v39 }
 0x44a   : > { %v1040_v6 = vor.u32 1.1754944e-38, %v1039_v62  ;;  %vm1038_vm4 = vcmp.eq.f32.partialorder %v1037_v63, 8.507059e+37 }
 0x44d   : > { %1023 = vadd.xlane.f32.xlu2 %v1022_v45 }
 0x44e   : > { %v2728_v49 = vpop.eup %2727 }
 0x44f   : > { %v1029_v50 = vmul.f32 %v2728_v49, %v1006_v39  ;;  %vm1034_vm11 = vweird.f32 %v2728_v49 }
 0x450   : > { %vm3180_vm14 = vmor %vm1033_vm12, %vm1034_vm11 }
 0x451   : > { %v1030_v52 = vsub.f32 1.0, %v1029_v50 }
 0x453   : > { %v1031_v54 = vmul.f32 %v2728_v49, %v1030_v52 }
 0x455   : > { %v1032_v61 = vadd.f32 %v2728_v49, %v1031_v54 }
 0x457   : > { %v1036_v56 = vsel %vm3180_vm14, %v2728_v49, %v1032_v61 }
 0x458   : > { %1026 = vadd.xlane.f32.xlu1 %v1025_v46  ;;  %v1041_v11 = vsel %vm1038_vm4, %v1040_v6, %v1036_v56 }
 0x459   : > { %v1042_v32 = vmul.f32 %v3118_v30, %v1041_v11 }
 0x45b   : > { %v1148_v30 = vpack.c.bf16 %v1042_v32, %v1042_v32 }
 0x465   : > { %1385 = vrot.lane.b32.xlu2 %v3142_v35, %s2859_s24 }
 0x46d   : > { %1414 = vrot.lane.b32.xlu2 %v3172_v48, %s2859_s24 }
 0x471   : > { %1416 = vrot.lane.b32.xlu1 %v3172_v48, %s2858_s23 }
 0x475   : > { %1643 = vrot.lane.b32.xlu2 %v3028_v58, %s2861_s26 }
 0x477   : > { %v1012_v34 = vpop.xlane.xlu2 %1011 }
 0x478   : > { %2729 = vrcp.f32 %v1012_v34  ;;  %v1069_v1 = vand.u32 2147483648, %v1012_v34  ;;  %vm1063_vm15 = vweird.f32 %v1012_v34  ;;  %v1067_v4 = vand.u32 2147483647, %v1012_v34 }
 0x47a   : > { %v1070_v12 = vor.u32 1.1754944e-38, %v1069_v1  ;;  %vm1068_vm5 = vcmp.eq.f32.partialorder %v1067_v4, 8.507059e+37 }
 0x47e   : > { %v2730_v53 = vpop.eup %2729 }
 0x47f   : > { %v1059_v22 = vmul.f32 %v2730_v53, %v1012_v34  ;;  %v1009_v55 = vpop.xlane.xlu2 %1008  ;;  %vm1064_vm13 = vweird.f32 %v2730_v53 }
 0x480   : > { %2731 = vrcp.f32 %v1009_v55  ;;  %v1015_v57 = vpop.xlane.xlu1 %1014  ;;  %vm3186_vm1 = vmor %vm1063_vm15, %vm1064_vm13  ;;  %v1052_v14 = vand.u32 2147483647, %v1009_v55  ;;  %v1054_v15 = vand.u32 2147483648, %v1009_v55  ;;  %vm1048_vm8 = vweird.f32 %v1009_v55 }
 0x481   : > { %v1060_v60 = vsub.f32 1.0, %v1059_v22  ;;  %2733 = vrcp.f32 %v1015_v57  ;;  %v1084_v21 = vand.u32 2147483648, %v1015_v57  ;;  %v1082_v24 = vand.u32 2147483647, %v1015_v57 }
 0x482   : > { %vm1078_vm9 = vweird.f32 %v1015_v57  ;;  %v1055_v27 = vor.u32 1.1754944e-38, %v1054_v15  ;;  %vm1053_vm11 = vcmp.eq.f32.partialorder %v1052_v14, 8.507059e+37 }
 0x483   : > { %v1061_v26 = vmul.f32 %v2730_v53, %v1060_v60  ;;  %v1085_v45 = vor.u32 1.1754944e-38, %v1084_v21  ;;  %vm1083_vm13 = vcmp.eq.f32.partialorder %v1082_v24, 8.507059e+37 }
 0x485   : > { %v1062_v0 = vadd.f32 %v2730_v53, %v1061_v26  ;;  %v1158_v26 = vunpack.c.l.b16 %v1148_v30 }
 0x486   : > { %v2732_v3 = vpop.eup %2731 }
 0x487   : > { %v2734_v5 = vpop.eup %2733  ;;  %v1044_v8 = vmul.f32 %v2732_v3, %v1009_v55  ;;  %v1388_v44 = vpop.permute.xlu2 %1387  ;;  %v1066_v33 = vsel %vm3186_vm1, %v2730_v53, %v1062_v0  ;;  %vm1049_vm6 = vweird.f32 %v2732_v3 }
 0x488   : > { %v1074_v2 = vmul.f32 %v2734_v5, %v1015_v57  ;;  %v1393_v9 = vsel %vm403_vm2, %v1388_v44, 0  ;;  %v1018_v10 = vpop.xlane.xlu1 %1017  ;;  %v1071_v18 = vsel %vm1068_vm5, %v1070_v12, %v1066_v33  ;;  %vm1079_vm7 = vweird.f32 %v2734_v5  ;;  %vm1050_vm10 = vmor %vm1048_vm8, %vm1049_vm6 }
 0x489   : > { %v1045_v13 = vsub.f32 1.0, %v1044_v8  ;;  %2735 = vrcp.f32 %v1018_v10  ;;  %1402 = vmatpush.bf16.xpose.msra.mxu2 %v1393_v9  ;;  %v1072_v37 = vmul.f32 %v3122_v59, %v1071_v18  ;;  %vm1080_vm12 = vmor %vm1078_vm9, %vm1079_vm7  ;;  %v1099_v54 = vand.u32 2147483648, %v1018_v10 }
 0x48a   : > { %v1075_v16 = vsub.f32 1.0, %v1074_v2  ;;  %v1097_v61 = vand.u32 2147483647, %v1018_v10  ;;  %vm1093_vm15 = vweird.f32 %v1018_v10 }
 0x48b   : > { %v1046_v20 = vmul.f32 %v2732_v3, %v1045_v13  ;;  %v1150_v52 = vpack.c.bf16 %v1072_v37, %v1072_v37 }
 0x48c   : > { %v1076_v23 = vmul.f32 %v2734_v5, %v1075_v16  ;;  %vm1098_vm4 = vcmp.eq.f32.partialorder %v1097_v61, 8.507059e+37 }
 0x48d   : > { %v1047_v25 = vadd.f32 %v2732_v3, %v1046_v20  ;;  %v1021_v29 = vpop.xlane.xlu0 %1020  ;;  %v1183_v58 = vunpack.c.l.b16 %v1150_v52 }
 0x48e   : > { %v1077_v40 = vadd.f32 %v2734_v5, %v1076_v23  ;;  %2737 = vrcp.f32 %v1021_v29  ;;  %v1114_v4 = vand.u32 2147483648, %v1021_v29  ;;  %v1112_v8 = vand.u32 2147483647, %v1021_v29 }
 0x48f   : > { %v2736_v41 = vpop.eup %2735  ;;  %v1051_v43 = vsel %vm1050_vm10, %v2732_v3, %v1047_v25  ;;  %vm1108_vm6 = vweird.f32 %v1021_v29 }
 0x490   : > { %v1056_v46 = vsel %vm1053_vm11, %v1055_v27, %v1051_v43  ;;  %v1081_v39 = vsel %vm1080_vm12, %v2734_v5, %v1077_v40  ;;  %v1089_v49 = vmul.f32 %v2736_v41, %v1018_v10  ;;  %vm1094_vm14 = vweird.f32 %v2736_v41 }
 0x491   : > { %v1086_v50 = vsel %vm1083_vm13, %v1085_v45, %v1081_v39  ;;  %v1057_v34 = vmul.f32 %v3126_v17, %v1056_v46  ;;  %vm1095_vm1 = vmor %vm1093_vm15, %vm1094_vm14  ;;  %v1100_v17 = vor.u32 1.1754944e-38, %v1099_v54  ;;  %v1115_v2 = vor.u32 1.1754944e-38, %v1114_v4 }
 0x492   : > { %v1087_v59 = vmul.f32 %v3128_v19, %v1086_v50  ;;  %v1090_v53 = vsub.f32 1.0, %v1089_v49  ;;  %vm1113_vm8 = vcmp.eq.f32.partialorder %v1112_v8, 8.507059e+37 }
 0x493   : > { %v1149_v22 = vpack.c.bf16 %v1057_v34, %v1057_v34 }
 0x494   : > { %v2738_v55 = vpop.eup %2737  ;;  %v1151_v57 = vpack.c.bf16 %v1087_v59, %v1087_v59  ;;  %v1091_v60 = vmul.f32 %v2736_v41, %v1090_v53 }
 0x495   : > { %v1104_v62 = vmul.f32 %v2738_v55, %v1021_v29  ;;  %v1159_v63 = vunpack.c.l.b16 %v1149_v22  ;;  %vm1109_vm5 = vweird.f32 %v2738_v55 }
 0x496   : > { %v1184_v0 = vunpack.c.l.b16 %v1151_v57  ;;  %v1092_v1 = vadd.f32 %v2736_v41, %v1091_v60  ;;  %vm1110_vm7 = vmor %vm1108_vm6, %vm1109_vm5 }
 0x497   : > { %v1105_v3 = vsub.f32 1.0, %v1104_v62  ;;  %v1160_v56 = vpack.c.b16 %v1159_v63, %v1158_v26 }
 0x498   : > { %v1096_v19 = vsel %vm1095_vm1, %v2736_v41, %v1092_v1  ;;  %v1185_v5 = vpack.c.b16 %v1184_v0, %v1183_v58 }
 0x499   : > { %v1101_v6 = vsel %vm1098_vm4, %v1100_v17, %v1096_v19  ;;  %v1106_v7 = vmul.f32 %v2738_v55, %v1105_v3  ;;  %2526 = vmatmul.msk.bf16.vlgmr.msrb.gmra.mxu0 %vm505_vm3, %v1160_v56 }
 0x49a   : > { %2527 = vmatmul.msk.bf16.vlgmr.msrb.gmra.mxu1 %vm505_vm3, %v1185_v5  ;;  %v1102_v44 = vmul.f32 %v3134_v28, %v1101_v6  ;;  %v1316_v5 = vld [vmem:[#allocation4 + $0x90] sm:$0xff] }
 0x49b   : > { %v1107_v33 = vadd.f32 %v2738_v55, %v1106_v7 }
 0x49c   : > { %v1152_v11 = vpack.c.bf16 %v1102_v44, %v1102_v44 }
 0x49d   : > { %v1111_v9 = vsel %vm1110_vm7, %v2738_v55, %v1107_v33 }
 0x49e   : > { %v1116_v10 = vsel %vm1113_vm8, %v1115_v2, %v1111_v9  ;;  %v1208_v18 = vunpack.c.l.b16 %v1152_v11  ;;  %v1315_v9 = vld [vmem:[#allocation4 + $0x88] sm:$0xff] }
 0x49f   : > { %v1117_v12 = vmul.f32 %v3138_v31, %v1116_v10  ;;  %v1317_v10 = vld [vmem:[#allocation4 + $0x98] sm:$0xff] }
 0x4a0   : > { %v1237_v13 = vpop.permute.xlu1 %1236  ;;  %v1359_v14 = vpop.permute.xlu0 %1358 }
 0x4a1   : > { %v1153_v15 = vpack.c.bf16 %v1117_v12, %v1117_v12  ;;  %1249 = vmatpush.bf16.msrb.mxu3 %v1237_v13  ;;  %v1364_v16 = vsel %vm403_vm2, %v1359_v14, 0 }
 0x4a2   : > { %1373 = vmatpush.bf16.xpose.msra.mxu1 %v1364_v16 }
 0x4a3   : > { %v1209_v20 = vunpack.c.l.b16 %v1153_v15 }
 0x4a5   : > { %v1210_v28 = vpack.c.b16 %v1209_v20, %v1208_v18 }
 0x4a7   : > { %2528 = vmatmul.msk.bf16.vlgmr.msrb.gmra.mxu2 %vm505_vm3, %v1210_v28  ;;  %v1318_v28 = vld [vmem:[#allocation4 + $0xa0] sm:$0xff] }
 0x4a8   : > { %v1357_v21 = vpop.permute.xlu0 %1356 }
 0x4a9   : > { %2534 = vmatmul.msk.bf16.vlgmr.msra.gmra.mxu0 %vm403_vm2, %v3168_v47 }
 0x4aa   : > { %2539 = vmatmul.msk.bf16.vlgmr.msra.gmra.mxu1 %vm403_vm2, %v1357_v21 }
 0x4b0   : > { %v1812_v50 = vpop.permute.xlu0 %1811 }
 0x4b1   : > { %v1817_v54 = vsel %vm403_vm2, %v1812_v50, 0 }
 0x4c0   : > { %v1024_v23 = vpop.xlane.xlu2 %1023 }
 0x4c1   : > { %2739 = vrcp.f32 %v1024_v23  ;;  %v1129_v40 = vand.u32 2147483648, %v1024_v23  ;;  %vm1123_vm10 = vweird.f32 %v1024_v23  ;;  %v1127_v43 = vand.u32 2147483647, %v1024_v23 }
 0x4c3   : > { %v1130_v39 = vor.u32 1.1754944e-38, %v1129_v40  ;;  %vm1128_vm12 = vcmp.eq.f32.partialorder %v1127_v43, 8.507059e+37  ;;  %v1320_v40 = vld [vmem:[#allocation4 + $0xb0] sm:$0xff] }
 0x4c7   : > { %v2740_v31 = vpop.eup %2739 }
 0x4c8   : > { %v1119_v24 = vmul.f32 %v2740_v31, %v1024_v23  ;;  %v1386_v25 = vpop.permute.xlu2 %1385  ;;  %vm1124_vm9 = vweird.f32 %v2740_v31 }
 0x4c9   : > { %2544 = vmatmul.msk.bf16.vlgmr.msra.gmra.mxu2 %vm403_vm2, %v1386_v25  ;;  %vm1125_vm11 = vmor %vm1123_vm10, %vm1124_vm9 }
 0x4ca   : > { %v1120_v29 = vsub.f32 1.0, %v1119_v24  ;;  %v1319_v24 = vld [vmem:[#allocation4 + $0xa8] sm:$0xff] }
 0x4cb   : > { %v1027_v32 = vpop.xlane.xlu1 %1026 }
 0x4cc   : > { %v1121_v37 = vmul.f32 %v2740_v31, %v1120_v29  ;;  %2741 = vrcp.f32 %v1027_v32  ;;  %v1144_v30 = vand.u32 2147483648, %v1027_v32  ;;  %v1142_v59 = vand.u32 2147483647, %v1027_v32 }
 0x4cd   : > { %vm1138_vm14 = vweird.f32 %v1027_v32 }
 0x4ce   : > { %v1122_v27 = vadd.f32 %v2740_v31, %v1121_v37  ;;  %v1145_v57 = vor.u32 1.1754944e-38, %v1144_v30  ;;  %vm1143_vm1 = vcmp.eq.f32.partialorder %v1142_v59, 8.507059e+37 }
 0x4d0   : > { %v1415_v41 = vpop.permute.xlu2 %1414  ;;  %v1126_v45 = vsel %vm1125_vm11, %v2740_v31, %v1122_v27 }
 0x4d1   : > { %v1131_v34 = vsel %vm1128_vm12, %v1130_v39, %v1126_v45  ;;  %v1321_v45 = vld [vmem:[#allocation4 + $0xb8] sm:$0xff] }
 0x4d2   : > { %v2742_v47 = vpop.eup %2741  ;;  %v1132_v22 = vmul.f32 %v3160_v51, %v1131_v34 }
 0x4d3   : > { %v1134_v46 = vmul.f32 %v2742_v47, %v1027_v32  ;;  %vm1139_vm13 = vweird.f32 %v2742_v47 }
 0x4d4   : > { %vm1140_vm15 = vmor %vm1138_vm14, %vm1139_vm13  ;;  %v1154_v62 = vpack.c.bf16 %v1132_v22, %v1132_v22 }
 0x4d5   : > { %v1135_v49 = vsub.f32 1.0, %v1134_v46 }
 0x4d6   : > { %v1233_v58 = vunpack.c.l.b16 %v1154_v62 }
 0x4d7   : > { %v1136_v52 = vmul.f32 %v2742_v47, %v1135_v49 }
 0x4d8   : > { %v1644_v53 = vpop.permute.xlu2 %1643 }
 0x4d9   : > { %v1137_v55 = vadd.f32 %v2742_v47, %v1136_v52  ;;  %1656 = vmatpush.bf16.msrb.mxu0 %v1644_v53 }
 0x4db   : > { %v1141_v60 = vsel %vm1140_vm15, %v2742_v47, %v1137_v55 }
 0x4dc   : > { %v1146_v61 = vsel %vm1143_vm1, %v1145_v57, %v1141_v60 }
 0x4dd   : > { %1826 = vmatpush.bf16.xpose.msra.mxu0 %v1817_v54  ;;  %v1147_v26 = vmul.f32 %v3164_v42, %v1146_v61  ;;  %v1314_v42 = vld [vmem:[#allocation4 + $0x80] sm:$0xff] }
 0x4df   : > { %v1155_v63 = vpack.c.bf16 %v1147_v26, %v1147_v26  ;;  %v3256_v26 = vld [vmem:[#allocation2 + $0x8] sm:$0xff] }
 0x4e1   : > { %v1234_v0 = vunpack.c.l.b16 %v1155_v63 }
 0x4e3   : > { %v1417_v1 = vpop.permute.xlu1 %1416  ;;  %v1235_v17 = vpack.c.b16 %v1234_v0, %v1233_v58 }
 0x4e4   : > { %v1422_v3 = vsel %vm403_vm2, %v1417_v1, 0 }
 0x4e5   : > { %2529 = vmatmul.msk.bf16.vlgmr.msrb.gmra.mxu3 %vm505_vm3, %v1235_v17 }
 0x4e6   : > { %1431 = vmatpush.bf16.xpose.msra.mxu3 %v1422_v3 }
 0x4f5   : > { %2549 = vmatmul.msk.bf16.vlgmr.msra.gmra.mxu3 %vm403_vm2, %v1415_v41 }
 0x516   : > { %v3214_v51 = vpop.f32.mrf.mxu0 }
 0x517   : > { %v3216_v56 = vpop.f32.mrf.mxu1 }
 0x51e   : > { %v3218_v19 = vpop.f32.mrf.mxu0 }
 0x51f   : > { %v3220_v4 = vpop.f32.mrf.mxu1 }
 0x526   : > { %v1346_v6 = vpop.f32.mrf.mxu0 }
 0x527   : > { %v1347_v7 = vadd.f32 %v1346_v6, %v1314_v42  ;;  %v1375_v8 = vpop.f32.mrf.mxu1 }
 0x528   : > { %v1376_v44 = vadd.f32 %v1375_v8, %v1316_v5 }
 0x529   : > { %v1438_v33 = vsel %vm505_vm3, %v1347_v7, -inf }
 0x52a   : > { %1439 = vmax.xlane.f32.xlu0 %v1438_v33  ;;  %v1444_v2 = vsel %vm505_vm3, %v1376_v44, -inf  ;;  %v3226_v18 = vpop.f32.mrf.mxu2 }
 0x52b   : > { %1445 = vmax.xlane.f32.xlu2 %v1444_v2 }
 0x52e   : > { %v1348_v11 = vpop.f32.mrf.mxu0 }
 0x52f   : > { %v1349_v12 = vadd.f32 %v1348_v11, %v1315_v9  ;;  %v1377_v13 = vpop.f32.mrf.mxu1 }
 0x530   : > { %v1378_v14 = vadd.f32 %v1377_v13, %v1317_v10 }
 0x531   : > { %v1441_v15 = vsel %vm505_vm3, %v1349_v12, -inf }
 0x532   : > { %1442 = vmax.xlane.f32.xlu1 %v1441_v15  ;;  %v1447_v16 = vsel %vm505_vm3, %v1378_v14, -inf  ;;  %v3228_v20 = vpop.f32.mrf.mxu2 }
 0x533   : > { %1448 = vmax.xlane.f32.xlu0 %v1447_v16  ;;  %v3274_v16 = vld [vmem:[#allocation2 + $0x10] sm:$0xff] }
 0x54c   : > { %v1404_v21 = vpop.f32.mrf.mxu2 }
 0x54d   : > { %v1405_v23 = vadd.f32 %v1404_v21, %v1318_v28 }
 0x54f   : > { %v1450_v31 = vsel %vm505_vm3, %v1405_v23, -inf }
 0x550   : > { %1451 = vmax.xlane.f32.xlu1 %v1450_v31 }
 0x554   : > { %v1406_v25 = vpop.f32.mrf.mxu2 }
 0x555   : > { %v1407_v29 = vadd.f32 %v1406_v25, %v1319_v24  ;;  %v3288_v24 = vld [vmem:[#allocation2 + $0x18] sm:$0xff] }
 0x557   : > { %v1453_v32 = vsel %vm505_vm3, %v1407_v29, -inf }
 0x558   : > { %1454 = vmax.xlane.f32.xlu2 %v1453_v32 }
 0x568   : > { %v3232_v37 = vpop.f32.mrf.mxu3 }
 0x570   : > { %v3234_v27 = vpop.f32.mrf.mxu3 }
 0x578   : > { %v1433_v41 = vpop.f32.mrf.mxu3 }
 0x579   : > { %v1434_v43 = vadd.f32 %v1433_v41, %v1320_v40 }
 0x57b   : > { %v1456_v47 = vsel %vm505_vm3, %v1434_v43, -inf }
 0x57c   : > { %1457 = vmax.xlane.f32.xlu0 %v1456_v47 }
 0x580   : > { %v1435_v46 = vpop.f32.mrf.mxu3 }
 0x581   : > { %v1436_v39 = vadd.f32 %v1435_v46, %v1321_v45 }
 0x583   : > { %v1459_v49 = vsel %vm505_vm3, %v1436_v39, -inf }
 0x584   : > { %1460 = vmax.xlane.f32.xlu1 %v1459_v49 }
 0x590   : > { %1809 = vrot.lane.b32.xlu0 %v3155_v38, %s2862_s27 }
 0x59d   : > { %1668 = vrot.lane.b32.xlu1 %v3146_v36, %s2861_s26  ;;  %v1440_v50 = vpop.xlane.xlu0 %1439 }
 0x59e   : > { %v1462_v34 = vsub.f32 %v1347_v7, %v1440_v50  ;;  %v1446_v55 = vpop.xlane.xlu2 %1445 }
 0x59f   : > { %v1464_v57 = vsub.f32 %v1376_v44, %v1446_v55 }
 0x5a0   : > { %v1470_v30 = vmul.f32 1.442695, %v1462_v34 }
 0x5a1   : > { %v1474_v60 = vmul.f32 1.442695, %v1464_v57 }
 0x5a2   : > { %2743 = vpow2.f32 %v1470_v30 }
 0x5a5   : > { %v1443_v52 = vpop.xlane.xlu1 %1442 }
 0x5a6   : > { %v1463_v53 = vsub.f32 %v1349_v12, %v1443_v52  ;;  %v1449_v63 = vpop.xlane.xlu0 %1448 }
 0x5a7   : > { %v1465_v58 = vsub.f32 %v1378_v14, %v1449_v63 }
 0x5a8   : > { %v3242_v59 = vpop.eup %2743  ;;  %v1472_v22 = vmul.f32 1.442695, %v1463_v53 }
 0x5a9   : > { %v1486_v54 = vsel %vm505_vm3, %v3242_v59, 0.0  ;;  %v1476_v0 = vmul.f32 1.442695, %v1465_v58 }
 0x5aa   : > { %1487 = vadd.xlane.f32.xlu2 %v1486_v54  ;;  %2745 = vpow2.f32 %v1472_v22 }
 0x5ab   : > { %2747 = vpow2.f32 %v1474_v60 }
 0x5ac   : > { %2749 = vpow2.f32 %v1476_v0 }
 0x5b0   : > { %v3246_v38 = vpop.eup %2745 }
 0x5b1   : > { %v1489_v36 = vsel %vm505_vm3, %v3246_v38, 0.0  ;;  %v3252_v61 = vpop.eup %2747 }
 0x5b2   : > { %v1492_v62 = vsel %vm505_vm3, %v3252_v61, 0.0  ;;  %v3260_v3 = vpop.eup %2749 }
 0x5b3   : > { %v1495_v42 = vsel %vm505_vm3, %v3260_v3, 0.0 }
 0x5ba   : > { %1490 = vadd.xlane.f32.xlu0 %v1489_v36 }
 0x5c2   : > { %1693 = vrot.lane.b32.xlu2 %v3142_v35, %s2861_s26 }
 0x5c3   : > { %v1452_v1 = vpop.xlane.xlu1 %1451 }
 0x5c4   : > { %v1466_v17 = vsub.f32 %v1405_v23, %v1452_v1 }
 0x5c6   : > { %v1478_v35 = vmul.f32 1.442695, %v1466_v17 }
 0x5c7   : > { %1493 = vadd.xlane.f32.xlu1 %v1492_v62 }
 0x5c8   : > { %2751 = vpow2.f32 %v1478_v35 }
 0x5cb   : > { %v1455_v5 = vpop.xlane.xlu2 %1454 }
 0x5cc   : > { %v1467_v8 = vsub.f32 %v1407_v29, %v1455_v5 }
 0x5ce   : > { %1840 = vrot.lane.b32.xlu0 %v3256_v26, %s2860_s25  ;;  %v3264_v33 = vpop.eup %2751  ;;  %v1480_v2 = vmul.f32 1.442695, %v1467_v8 }
 0x5cf   : > { %v1498_v10 = vsel %vm505_vm3, %v3264_v33, 0.0 }
 0x5eb   : > { %1496 = vadd.xlane.f32.xlu2 %v1495_v42 }
 0x5ef   : > { %v1458_v6 = vpop.xlane.xlu0 %1457 }
 0x5f0   : > { %v1468_v7 = vsub.f32 %v1434_v43, %v1458_v6 }
 0x5f2   : > { %v1482_v44 = vmul.f32 1.442695, %v1468_v7 }
 0x5f4   : > { %2753 = vpow2.f32 %v1482_v44 }
 0x5f5   : > { %2755 = vpow2.f32 %v1480_v2 }
 0x5f7   : > { %v1461_v9 = vpop.xlane.xlu1 %1460 }
 0x5f8   : > { %1499 = vadd.xlane.f32.xlu0 %v1498_v10  ;;  %v1469_v12 = vsub.f32 %v1436_v39, %v1461_v9 }
 0x5fa   : > { %v3268_v11 = vpop.eup %2753  ;;  %v1484_v14 = vmul.f32 1.442695, %v1469_v12 }
 0x5fb   : > { %v1504_v13 = vsel %vm505_vm3, %v3268_v11, 0.0  ;;  %v3272_v15 = vpop.eup %2755 }
 0x5fc   : > { %1505 = vadd.xlane.f32.xlu1 %v1504_v13  ;;  %2757 = vpow2.f32 %v1484_v14  ;;  %v1501_v28 = vsel %vm505_vm3, %v3272_v15, 0.0 }
 0x602   : > { %v3280_v21 = vpop.eup %2757  ;;  %v1810_v29 = vpop.permute.xlu0 %1809 }
 0x603   : > { %1869 = vrot.lane.b32.xlu2 %v3274_v16, %s2860_s25  ;;  %v1507_v23 = vsel %vm505_vm3, %v3280_v21, 0.0 }
 0x604   : > { %1502 = vadd.xlane.f32.xlu1 %v1501_v28 }
 0x60b   : > { %1718 = vrot.lane.b32.xlu2 %v3172_v48, %s2861_s26 }
 0x60c   : > { %1838 = vrot.lane.b32.xlu0 %v3256_v26, %s2862_s27  ;;  %1508 = vadd.xlane.f32.xlu1 %v1507_v23 }
 0x60f   : > { %v1669_v31 = vpop.permute.xlu1 %1668 }
 0x610   : > { %1681 = vmatpush.bf16.msrb.mxu1 %v1669_v31 }
 0x613   : > { %1896 = vrot.lane.b32.xlu2 %v3288_v24, %s2862_s27 }
 0x614   : > { %1898 = vrot.lane.b32.xlu0 %v3288_v24, %s2860_s25 }
 0x61d   : > { %v1488_v25 = vpop.xlane.xlu2 %1487 }
 0x61e   : > { %2759 = vrcp.f32 %v1488_v25  ;;  %v1521_v46 = vand.u32 2147483648, %v1488_v25  ;;  %vm1515_vm5 = vweird.f32 %v1488_v25  ;;  %v1519_v39 = vand.u32 2147483647, %v1488_v25 }
 0x620   : > { %v1522_v30 = vor.u32 1.1754944e-38, %v1521_v46  ;;  %vm1520_vm7 = vcmp.eq.f32.partialorder %v1519_v39, 8.507059e+37 }
 0x624   : > { %v2760_v48 = vpop.eup %2759 }
 0x625   : > { %v1511_v32 = vmul.f32 %v2760_v48, %v1488_v25  ;;  %1867 = vrot.lane.b32.xlu1 %v3274_v16, %s2862_s27  ;;  %v1694_v40 = vpop.permute.xlu2 %1693  ;;  %vm1516_vm4 = vweird.f32 %v2760_v48 }
 0x626   : > { %1706 = vmatpush.bf16.msrb.mxu2 %v1694_v40  ;;  %vm1517_vm6 = vmor %vm1515_vm5, %vm1516_vm4 }
 0x627   : > { %v1512_v41 = vsub.f32 1.0, %v1511_v32 }
 0x629   : > { %v1513_v43 = vmul.f32 %v2760_v48, %v1512_v41 }
 0x62b   : > { %v1514_v45 = vadd.f32 %v2760_v48, %v1513_v43 }
 0x62d   : > { %v1491_v47 = vpop.xlane.xlu0 %1490  ;;  %v1518_v50 = vsel %vm1517_vm6, %v2760_v48, %v1514_v45 }
 0x62e   : > { %2761 = vrcp.f32 %v1491_v47  ;;  %v1523_v53 = vsel %vm1520_vm7, %v1522_v30, %v1518_v50  ;;  %v1536_v54 = vand.u32 2147483648, %v1491_v47  ;;  %v1534_v55 = vand.u32 2147483647, %v1491_v47 }
 0x62f   : > { %v1524_v57 = vmul.f32 %v3242_v59, %v1523_v53  ;;  %vm1530_vm9 = vweird.f32 %v1491_v47 }
 0x630   : > { %v1537_v36 = vor.u32 1.1754944e-38, %v1536_v54  ;;  %vm1535_vm11 = vcmp.eq.f32.partialorder %v1534_v55, 8.507059e+37 }
 0x631   : > { %v1630_v58 = vpack.c.bf16 %v1524_v57, %v1524_v57 }
 0x633   : > { %v1640_v42 = vunpack.c.l.b16 %v1630_v58 }
 0x634   : > { %v2762_v49 = vpop.eup %2761 }
 0x635   : > { %v1526_v34 = vmul.f32 %v2762_v49, %v1491_v47  ;;  %vm1531_vm8 = vweird.f32 %v2762_v49 }
 0x636   : > { %vm1532_vm10 = vmor %vm1530_vm9, %vm1531_vm8 }
 0x637   : > { %v1527_v52 = vsub.f32 1.0, %v1526_v34 }
 0x639   : > { %v1528_v22 = vmul.f32 %v2762_v49, %v1527_v52 }
 0x63a   : > { %v1494_v59 = vpop.xlane.xlu1 %1493 }
 0x63b   : > { %v1529_v60 = vadd.f32 %v2762_v49, %v1528_v22  ;;  %2763 = vrcp.f32 %v1494_v59  ;;  %v1551_v10 = vand.u32 2147483648, %v1494_v59  ;;  %vm1545_vm13 = vweird.f32 %v1494_v59 }
 0x63c   : > { %v1549_v12 = vand.u32 2147483647, %v1494_v59 }
 0x63d   : > { %v1533_v62 = vsel %vm1532_vm10, %v2762_v49, %v1529_v60  ;;  %v1552_v31 = vor.u32 1.1754944e-38, %v1551_v10 }
 0x63e   : > { %v1538_v63 = vsel %vm1535_vm11, %v1537_v36, %v1533_v62  ;;  %vm1550_vm15 = vcmp.eq.f32.partialorder %v1549_v12, 8.507059e+37 }
 0x63f   : > { %v1539_v0 = vmul.f32 %v3246_v38, %v1538_v63 }
 0x640   : > { %v1841_v1 = vpop.permute.xlu0 %1840 }
 0x641   : > { %v1631_v17 = vpack.c.bf16 %v1539_v0, %v1539_v0  ;;  %v1846_v35 = vsel %vm403_vm2, %v1841_v1, 0  ;;  %v2764_v7 = vpop.eup %2763 }
 0x642   : > { %1855 = vmatpush.bf16.xpose.msra.mxu1 %v1846_v35  ;;  %v1541_v8 = vmul.f32 %v2764_v7, %v1494_v59  ;;  %vm1546_vm12 = vweird.f32 %v2764_v7 }
 0x643   : > { %v1641_v5 = vunpack.c.l.b16 %v1631_v17  ;;  %vm1547_vm14 = vmor %vm1545_vm13, %vm1546_vm12 }
 0x644   : > { %v1542_v44 = vsub.f32 1.0, %v1541_v8 }
 0x645   : > { %v1642_v6 = vpack.c.b16 %v1641_v5, %v1640_v42 }
 0x646   : > { %v1543_v2 = vmul.f32 %v2764_v7, %v1542_v44 }
 0x647   : > { %2550 = vmatmul.msk.bf16.vlgmr.msrb.gmra.mxu0 %vm505_vm3, %v1642_v6 }
 0x648   : > { %v1544_v38 = vadd.f32 %v2764_v7, %v1543_v2 }
 0x64a   : > { %v1548_v14 = vsel %vm1547_vm14, %v2764_v7, %v1544_v38 }
 0x657   : > { %2558 = vmatmul.msk.bf16.vlgmr.msra.gmra.mxu0 %vm403_vm2, %v1810_v29  ;;  %v1553_v29 = vsel %vm1550_vm15, %v1552_v31, %v1548_v14 }
 0x658   : > { %v1554_v47 = vmul.f32 %v3252_v61, %v1553_v29 }
 0x65a   : > { %v1632_v30 = vpack.c.bf16 %v1554_v47, %v1554_v47 }
 0x65c   : > { %v1665_v22 = vunpack.c.l.b16 %v1632_v30 }
 0x65e   : > { %v1497_v9 = vpop.xlane.xlu2 %1496 }
 0x65f   : > { %2765 = vrcp.f32 %v1497_v9  ;;  %v1566_v32 = vand.u32 2147483648, %v1497_v9  ;;  %v1564_v41 = vand.u32 2147483647, %v1497_v9  ;;  %vm1560_vm4 = vweird.f32 %v1497_v9 }
 0x661   : > { %v1567_v46 = vor.u32 1.1754944e-38, %v1566_v32  ;;  %vm1565_vm6 = vcmp.eq.f32.partialorder %v1564_v41, 8.507059e+37 }
 0x665   : > { %v2766_v13 = vpop.eup %2765 }
 0x666   : > { %v1556_v28 = vmul.f32 %v2766_v13, %v1497_v9  ;;  %v1870_v23 = vpop.permute.xlu2 %1869  ;;  %vm1561_vm1 = vweird.f32 %v2766_v13 }
 0x667   : > { %v1875_v25 = vsel %vm403_vm2, %v1870_v23, 0  ;;  %vm1562_vm5 = vmor %vm1560_vm4, %vm1561_vm1 }
 0x668   : > { %v1557_v48 = vsub.f32 1.0, %v1556_v28  ;;  %1884 = vmatpush.bf16.xpose.msra.mxu2 %v1875_v25 }
 0x66a   : > { %v1558_v40 = vmul.f32 %v2766_v13, %v1557_v48 }
 0x66b   : > { %v1500_v43 = vpop.xlane.xlu0 %1499 }
 0x66c   : > { %v1559_v45 = vadd.f32 %v2766_v13, %v1558_v40  ;;  %2767 = vrcp.f32 %v1500_v43  ;;  %v1581_v1 = vand.u32 2147483648, %v1500_v43  ;;  %vm1575_vm8 = vweird.f32 %v1500_v43 }
 0x66d   : > { %v1579_v17 = vand.u32 2147483647, %v1500_v43 }
 0x66e   : > { %v1563_v39 = vsel %vm1562_vm5, %v2766_v13, %v1559_v45  ;;  %v1719_v49 = vpop.permute.xlu2 %1718  ;;  %v1582_v8 = vor.u32 1.1754944e-38, %v1581_v1 }
 0x66f   : > { %v1568_v50 = vsel %vm1565_vm6, %v1567_v46, %v1563_v39  ;;  %v3303_v34 = vpop.xlane.xlu1 %1505  ;;  %1731 = vmatpush.bf16.msrb.mxu3 %v1719_v49  ;;  %vm1580_vm10 = vcmp.eq.f32.partialorder %v1579_v17, 8.507059e+37 }
 0x670   : > { %v1569_v52 = vmul.f32 %v3260_v3, %v1568_v50  ;;  %2769 = vrcp.f32 %v3303_v34  ;;  %vm1605_vm13 = vweird.f32 %v3303_v34  ;;  %v1611_v13 = vand.u32 2147483648, %v3303_v34 }
 0x671   : > { %v1609_v23 = vand.u32 2147483647, %v3303_v34 }
 0x672   : > { %v2768_v53 = vpop.eup %2767  ;;  %v1633_v54 = vpack.c.bf16 %v1569_v52, %v1569_v52 }
 0x673   : > { %v1571_v61 = vmul.f32 %v2768_v53, %v1500_v43  ;;  %vm1576_vm7 = vweird.f32 %v2768_v53  ;;  %v1612_v43 = vor.u32 1.1754944e-38, %v1611_v13  ;;  %vm1610_vm5 = vcmp.eq.f32.partialorder %v1609_v23, 8.507059e+37 }
 0x674   : > { %v1666_v55 = vunpack.c.l.b16 %v1633_v54  ;;  %vm1577_vm9 = vmor %vm1575_vm8, %vm1576_vm7 }
 0x675   : > { %v1572_v57 = vsub.f32 1.0, %v1571_v61 }
 0x676   : > { %v2770_v60 = vpop.eup %2769  ;;  %v1667_v36 = vpack.c.b16 %v1666_v55, %v1665_v22  ;;  %v1897_v1 = vpop.permute.xlu2 %1896 }
 0x677   : > { %v1573_v62 = vmul.f32 %v2768_v53, %v1572_v57  ;;  %v1601_v63 = vmul.f32 %v2770_v60, %v3303_v34  ;;  %v1503_v58 = vpop.xlane.xlu1 %1502  ;;  %vm1606_vm11 = vweird.f32 %v2770_v60 }
 0x678   : > { %2771 = vrcp.f32 %v1503_v58  ;;  %2551 = vmatmul.msk.bf16.vlgmr.msrb.gmra.mxu1 %vm505_vm3, %v1667_v36  ;;  %v1594_v9 = vand.u32 2147483647, %v1503_v58  ;;  %v1596_v38 = vand.u32 2147483648, %v1503_v58  ;;  %vm3312_vm14 = vmor %vm1605_vm13, %vm1606_vm11  ;;  %vm1590_vm15 = vweird.f32 %v1503_v58 }
 0x679   : > { %v1574_v0 = vadd.f32 %v2768_v53, %v1573_v62  ;;  %v1602_v3 = vsub.f32 1.0, %v1601_v63 }
 0x67a   : > { %vm1595_vm4 = vcmp.eq.f32.partialorder %v1594_v9, 8.507059e+37  ;;  %v1597_v48 = vor.u32 1.1754944e-38, %v1596_v38  ;;  %v1798_v38 = vld [vmem:[#allocation4 + $0xd0] sm:$0xff] }
 0x67b   : > { %v1578_v5 = vsel %vm1577_vm9, %v2768_v53, %v1574_v0  ;;  %v1603_v6 = vmul.f32 %v2770_v60, %v1602_v3 }
 0x67c   : > { %v1583_v2 = vsel %vm1580_vm10, %v1582_v8, %v1578_v5 }
 0x67d   : > { %v1604_v10 = vadd.f32 %v2770_v60, %v1603_v6  ;;  %v1584_v14 = vmul.f32 %v3264_v33, %v1583_v2 }
 0x67e   : > { %v2772_v35 = vpop.eup %2771  ;;  %v1839_v42 = vpop.permute.xlu0 %1838 }
 0x67f   : > { %v1586_v59 = vmul.f32 %v2772_v35, %v1503_v58  ;;  %v1509_v7 = vpop.xlane.xlu1 %1508  ;;  %vm1591_vm12 = vweird.f32 %v2772_v35  ;;  %v1608_v32 = vsel %vm3312_vm14, %v2770_v60, %v1604_v10  ;;  %v1634_v45 = vpack.c.bf16 %v1584_v14, %v1584_v14  ;;  %v1799_v14 = vld [vmem:[#allocation4 + $0xd8] sm:$0xff] }
 0x680   : > { %2773 = vrcp.f32 %v1509_v7  ;;  %vm1592_vm1 = vmor %vm1590_vm15, %vm1591_vm12  ;;  %v1613_v49 = vsel %vm1610_vm5, %v1612_v43, %v1608_v32  ;;  %v1626_v50 = vand.u32 2147483648, %v1509_v7  ;;  %v1624_v52 = vand.u32 2147483647, %v1509_v7  ;;  %v1800_v32 = vld [vmem:[#allocation4 + $0xe0] sm:$0xff] }
 0x681   : > { %v1587_v44 = vsub.f32 1.0, %v1586_v59  ;;  %vm1620_vm7 = vweird.f32 %v1509_v7  ;;  %v1690_v53 = vunpack.c.l.b16 %v1634_v45  ;;  %v1614_v54 = vmul.f32 %v3268_v11, %v1613_v49  ;;  %v1797_v59 = vld [vmem:[#allocation4 + $0xc8] sm:$0xff]  ;;  %v1802_v45 = vld [vmem:[#allocation4 + $0xf0] sm:$0xff] }
 0x682   : > { %v1627_v55 = vor.u32 1.1754944e-38, %v1626_v50  ;;  %vm1625_vm9 = vcmp.eq.f32.partialorder %v1624_v52, 8.507059e+37  ;;  %v1803_v52 = vld [vmem:[#allocation4 + $0xf8] sm:$0xff]  ;;  %vm1778_vm5 = vcmask 191616  }
 0x683   : > { %v1588_v12 = vmul.f32 %v2772_v35, %v1587_v44 }
 0x685   : > { %v1589_v31 = vadd.f32 %v2772_v35, %v1588_v12 }
 0x686   : > { %v2774_v25 = vpop.eup %2773  ;;  %v1899_v29 = vpop.permute.xlu0 %1898 }
 0x687   : > { %v1593_v40 = vsel %vm1592_vm1, %v2772_v35, %v1589_v31  ;;  %v1616_v41 = vmul.f32 %v2774_v25, %v1509_v7  ;;  %v1904_v33 = vsel %vm403_vm2, %v1899_v29, 0  ;;  %vm1621_vm6 = vweird.f32 %v2774_v25 }
 0x688   : > { %v1598_v47 = vsel %vm1595_vm4, %v1597_v48, %v1593_v40  ;;  %1913 = vmatpush.bf16.xpose.msra.mxu3 %v1904_v33  ;;  %2563 = vmatmul.msk.bf16.vlgmr.msra.gmra.mxu1 %vm403_vm2, %v1839_v42  ;;  %vm1622_vm8 = vmor %vm1620_vm7, %vm1621_vm6  ;;  %v1796_v42 = vld [vmem:[#allocation4 + $0xc0] sm:$0xff]  ;;  %vm1296_vm4 = vcmask 126016  }
 0x689   : > { %v1599_v46 = vmul.f32 %v3272_v15, %v1598_v47  ;;  %v1617_v39 = vsub.f32 1.0, %v1616_v41  ;;  %v1636_v15 = vpack.c.bf16 %v1614_v54, %v1614_v54  ;;  %v1801_v47 = vld [vmem:[#allocation4 + $0xe8] sm:$0xff] }
 0x68b   : > { %v1635_v34 = vpack.c.bf16 %v1599_v46, %v1599_v46  ;;  %v1618_v30 = vmul.f32 %v2774_v25, %v1617_v39  ;;  %v1715_v58 = vunpack.c.l.b16 %v1636_v15 }
 0x68d   : > { %v1691_v61 = vunpack.c.l.b16 %v1635_v34  ;;  %v1619_v22 = vadd.f32 %v2774_v25, %v1618_v30 }
 0x68f   : > { %v1623_v57 = vsel %vm1622_vm8, %v2774_v25, %v1619_v22  ;;  %v1692_v60 = vpack.c.b16 %v1691_v61, %v1690_v53 }
 0x690   : > { %v1628_v36 = vsel %vm1625_vm9, %v1627_v55, %v1623_v57 }
 0x691   : > { %v1629_v62 = vmul.f32 %v3280_v21, %v1628_v36  ;;  %2552 = vmatmul.msk.bf16.vlgmr.msrb.gmra.mxu2 %vm505_vm3, %v1692_v60 }
 0x693   : > { %v1637_v63 = vpack.c.bf16 %v1629_v62, %v1629_v62 }
 0x695   : > { %v1716_v0 = vunpack.c.l.b16 %v1637_v63 }
 0x697   : > { %v1717_v3 = vpack.c.b16 %v1716_v0, %v1715_v58  ;;  %v1868_v11 = vpop.permute.xlu1 %1867 }
 0x699   : > { %2553 = vmatmul.msk.bf16.vlgmr.msrb.gmra.mxu3 %vm505_vm3, %v1717_v3  ;;  %v2807_v3 = vld [vmem:[#allocation2] sm:$0xff] }
 0x6a1   : > { %2568 = vmatmul.msk.bf16.vlgmr.msra.gmra.mxu2 %vm403_vm2, %v1868_v11 }
 0x6a9   : > { %2573 = vmatmul.msk.bf16.vlgmr.msra.gmra.mxu3 %vm403_vm2, %v1897_v1 }
 0x6c4   : > { %v3328_v17 = vpop.f32.mrf.mxu0 }
 0x6cc   : > { %v3330_v35 = vpop.f32.mrf.mxu0 }
 0x6d4   : > { %v1828_v21 = vpop.f32.mrf.mxu0 }
 0x6d5   : > { %v1829_v5 = vadd.f32 %v1828_v21, %v1796_v42 }
 0x6d7   : > { %v1920_v6 = vsel %vm505_vm3, %v1829_v5, -inf }
 0x6d8   : > { %1921 = vmax.xlane.f32.xlu1 %v1920_v6 }
 0x6dc   : > { %v1830_v7 = vpop.f32.mrf.mxu0 }
 0x6dd   : > { %v1831_v8 = vadd.f32 %v1830_v7, %v1797_v59  ;;  %v1257_v59 = vpack.c.bf16 %v3218_v19, %v3218_v19  ;;  %v1258_v19 = vpack.c.bf16 %v3216_v56, %v3216_v56  ;;  %v1260_v56 = vpack.c.bf16 %v3226_v18, %v3226_v18 }
 0x6df   : > { %v1923_v44 = vsel %vm505_vm3, %v1831_v8, -inf }
 0x6e0   : > { %1924 = vmax.xlane.f32.xlu0 %v1923_v44 }
 0x6f5   : > { %v3334_v2 = vpop.f32.mrf.mxu1 }
 0x6fd   : > { %v3336_v9 = vpop.f32.mrf.mxu1 }
 0x705   : > { %v1857_v10 = vpop.f32.mrf.mxu1 }
 0x706   : > { %v1858_v12 = vadd.f32 %v1857_v10, %v1798_v38 }
 0x708   : > { %v1926_v13 = vsel %vm505_vm3, %v1858_v12, -inf }
 0x709   : > { %1927 = vmax.xlane.f32.xlu2 %v1926_v13 }
 0x70d   : > { %v1859_v28 = vpop.f32.mrf.mxu1 }
 0x70e   : > { %v1860_v23 = vadd.f32 %v1859_v28, %v1799_v14  ;;  %v1741_v14 = vpack.c.bf16 %v3336_v9, %v3336_v9 }
 0x710   : > { %v1929_v31 = vsel %vm505_vm3, %v1860_v23, -inf }
 0x711   : > { %1930 = vmax.xlane.f32.xlu1 %v1929_v31 }
 0x714   : > { %v3340_v25 = vpop.f32.mrf.mxu2 }
 0x71c   : > { %v3342_v48 = vpop.f32.mrf.mxu2  ;;  %v3344_v29 = vpop.f32.mrf.mxu3 }
 0x724   : > { %v3346_v40 = vpop.f32.mrf.mxu3  ;;  %v1886_v41 = vpop.f32.mrf.mxu2 }
 0x725   : > { %v1887_v33 = vadd.f32 %v1886_v41, %v1800_v32 }
 0x727   : > { %v1932_v43 = vsel %vm505_vm3, %v1887_v33, -inf }
 0x728   : > { %1933 = vmax.xlane.f32.xlu2 %v1932_v43 }
 0x72c   : > { %v1888_v46 = vpop.f32.mrf.mxu2  ;;  %v1915_v39 = vpop.f32.mrf.mxu3 }
 0x72d   : > { %v3349_v49 = vadd.f32 %v1888_v46, %v1801_v47  ;;  %v1916_v50 = vadd.f32 %v1915_v39, %v1802_v45  ;;  %v1743_v46 = vpack.c.bf16 %v3342_v48, %v3342_v48 }
 0x72f   : > { %v1935_v34 = vsel %vm505_vm3, %v3349_v49, -inf  ;;  %v1938_v30 = vsel %vm505_vm3, %v1916_v50, -inf }
 0x730   : > { %1936 = vmax.xlane.f32.xlu0 %v1935_v34  ;;  %1939 = vmax.xlane.f32.xlu1 %v1938_v30  ;;  %v1745_v30 = vpack.c.bf16 %v3346_v40, %v3346_v40 }
 0x734   : > { %v1917_v53 = vpop.f32.mrf.mxu3 }
 0x735   : > { %v3354_v54 = vadd.f32 %v1917_v53, %v1803_v52 }
 0x737   : > { %v1941_v61 = vsel %vm505_vm3, %v3354_v54, -inf }
 0x738   : > { %1942 = vmax.xlane.f32.xlu2 %v1941_v61 }
 0x74b   : > { %v1922_v22 = vpop.xlane.xlu1 %1921 }
 0x74c   : > { %v1944_v55 = vsub.f32 %v1829_v5, %v1922_v22 }
 0x74e   : > { %v1952_v57 = vmul.f32 1.442695, %v1944_v55 }
 0x750   : > { %2775 = vpow2.f32 %v1952_v57 }
 0x753   : > { %v1925_v60 = vpop.xlane.xlu0 %1924 }
 0x754   : > { %v1945_v36 = vsub.f32 %v1831_v8, %v1925_v60 }
 0x756   : > { %v3358_v15 = vpop.eup %2775  ;;  %v1954_v62 = vmul.f32 1.442695, %v1945_v36 }
 0x757   : > { %v1968_v63 = vsel %vm505_vm3, %v3358_v15, 0.0 }
 0x758   : > { %2777 = vpow2.f32 %v1954_v62  ;;  %1969 = vadd.xlane.f32.xlu0 %v1968_v63 }
 0x75e   : > { %v3362_v58 = vpop.eup %2777 }
 0x75f   : > { %v1971_v0 = vsel %vm505_vm3, %v3362_v58, 0.0 }
 0x760   : > { %1972 = vadd.xlane.f32.xlu1 %v1971_v0 }
 0x779   : > { %2125 = vrot.lane.b32.xlu1 %v2807_v3, %s2863_s28 }
 0x77c   : > { %v1928_v11 = vpop.xlane.xlu2 %1927 }
 0x77d   : > { %v1946_v1 = vsub.f32 %v1858_v12, %v1928_v11 }
 0x77f   : > { %v1956_v42 = vmul.f32 1.442695, %v1946_v1 }
 0x781   : > { %2779 = vpow2.f32 %v1956_v42  ;;  %2200 = vrot.lane.b32.xlu1 %v3288_v24, %s2863_s28  ;;  %v1739_v24 = vpack.c.bf16 %v3330_v35, %v3330_v35 }
 0x784   : > { %v1931_v21 = vpop.xlane.xlu1 %1930 }
 0x785   : > { %v1947_v5 = vsub.f32 %v1860_v23, %v1931_v21 }
 0x787   : > { %v3369_v6 = vpop.eup %2779  ;;  %v1958_v7 = vmul.f32 1.442695, %v1947_v5 }
 0x788   : > { %v1974_v8 = vsel %vm505_vm3, %v3369_v6, 0.0 }
 0x789   : > { %2781 = vpow2.f32 %v1958_v7  ;;  %1274 = vrot.lane.b32.xlu1 %v1257_v59, %s2864_s29  ;;  %1975 = vadd.xlane.f32.xlu2 %v1974_v8 }
 0x78f   : > { %v3376_v44 = vpop.eup %2781 }
 0x790   : > { %v1977_v38 = vsel %vm505_vm3, %v3376_v44, 0.0 }
 0x791   : > { %1756 = vrot.lane.b32.xlu1 %v1739_v24, %s2865_s8  ;;  %1978 = vadd.xlane.f32.xlu0 %v1977_v38 }
 0x799   : > { %1276 = vrot.lane.b32.xlu1 %v1258_v19, %s2864_s29 }
 0x79b   : > { %v1934_v10 = vpop.xlane.xlu2 %1933 }
 0x79c   : > { %v1948_v12 = vsub.f32 %v1887_v33, %v1934_v10 }
 0x79e   : > { %v1960_v13 = vmul.f32 1.442695, %v1948_v12 }
 0x7a0   : > { %2783 = vpow2.f32 %v1960_v13 }
 0x7a1   : > { %1760 = vrot.lane.b32.xlu1 %v1741_v14, %s2865_s8 }
 0x7a3   : > { %v1940_v35 = vpop.xlane.xlu1 %1939  ;;  %v1937_v28 = vpop.xlane.xlu0 %1936 }
 0x7a4   : > { %v1950_v23 = vsub.f32 %v1916_v50, %v1940_v35  ;;  %v1949_v41 = vsub.f32 %v3349_v49, %v1937_v28  ;;  %v1262_v50 = vpack.c.bf16 %v3232_v37, %v3232_v37  ;;  %v1256_v37 = vpack.c.bf16 %v3214_v51, %v3214_v51 }
 0x7a6   : > { %v3389_v31 = vpop.eup %2783  ;;  %v1964_v32 = vmul.f32 1.442695, %v1950_v23  ;;  %v1962_v9 = vmul.f32 1.442695, %v1949_v41 }
 0x7a7   : > { %v1980_v33 = vsel %vm505_vm3, %v3389_v31, 0.0 }
 0x7a8   : > { %2785 = vpow2.f32 %v1964_v32  ;;  %1981 = vadd.xlane.f32.xlu2 %v1980_v33 }
 0x7a9   : > { %1280 = vrot.lane.b32.xlu1 %v1260_v56, %s2864_s29  ;;  %2787 = vpow2.f32 %v1962_v9 }
 0x7ab   : > { %v1943_v43 = vpop.xlane.xlu2 %1942 }
 0x7ac   : > { %v1951_v45 = vsub.f32 %v3354_v54, %v1943_v43  ;;  %v1738_v54 = vpack.c.bf16 %v3328_v17, %v3328_v17 }
 0x7ae   : > { %v3397_v47 = vpop.eup %2785  ;;  %v1966_v39 = vmul.f32 1.442695, %v1951_v45 }
 0x7af   : > { %v1986_v18 = vsel %vm505_vm3, %v3397_v47, 0.0  ;;  %v3405_v49 = vpop.eup %2787 }
 0x7b0   : > { %1987 = vadd.xlane.f32.xlu0 %v1986_v18  ;;  %2789 = vpow2.f32 %v1966_v39  ;;  %v1983_v34 = vsel %vm505_vm3, %v3405_v49, 0.0 }
 0x7b1   : > { %1764 = vrot.lane.b32.xlu1 %v1743_v46, %s2865_s8 }
 0x7b6   : > { %v3412_v48 = vpop.eup %2789 }
 0x7b7   : > { %v1989_v52 = vsel %vm505_vm3, %v3412_v48, 0.0 }
 0x7b8   : > { %1984 = vadd.xlane.f32.xlu0 %v1983_v34 }
 0x7b9   : > { %1284 = vrot.lane.b32.xlu1 %v1262_v50, %s2864_s29 }
 0x7c0   : > { %2150 = vrot.lane.b32.xlu2 %v3256_v26, %s2863_s28  ;;  %1990 = vadd.xlane.f32.xlu0 %v1989_v52 }
 0x7c1   : > { %1768 = vrot.lane.b32.xlu1 %v1745_v30, %s2865_s8 }
 0x7c8   : > { %1272 = vrot.lane.b32.xlu2 %v1256_v37, %s2864_s29 }
 0x7cb   : > { %v1970_v53 = vpop.xlane.xlu0 %1969 }
 0x7cc   : > { %2791 = vrcp.f32 %v1970_v53  ;;  %v2003_v60 = vand.u32 2147483648, %v1970_v53  ;;  %vm1997_vm10 = vweird.f32 %v1970_v53  ;;  %v2001_v36 = vand.u32 2147483647, %v1970_v53 }
 0x7ce   : > { %v2004_v0 = vor.u32 1.1754944e-38, %v2003_v60  ;;  %vm2002_vm12 = vcmp.eq.f32.partialorder %v2001_v36, 8.507059e+37 }
 0x7d0   : > { %1754 = vrot.lane.b32.xlu2 %v1738_v54, %s2865_s8 }
 0x7d2   : > { %v2792_v40 = vpop.eup %2791 }
 0x7d3   : > { %v1993_v61 = vmul.f32 %v2792_v40, %v1970_v53  ;;  %v1973_v22 = vpop.xlane.xlu1 %1972  ;;  %vm1998_vm2 = vweird.f32 %v2792_v40 }
 0x7d4   : > { %2793 = vrcp.f32 %v1973_v22  ;;  %2175 = vrot.lane.b32.xlu0 %v3274_v16, %s2863_s28  ;;  %vm1999_vm11 = vmor %vm1997_vm10, %vm1998_vm2  ;;  %v2018_v3 = vand.u32 2147483648, %v1973_v22  ;;  %v2016_v1 = vand.u32 2147483647, %v1973_v22  ;;  %vm2012_vm14 = vweird.f32 %v1973_v22 }
 0x7d5   : > { %v1994_v26 = vsub.f32 1.0, %v1993_v61 }
 0x7d6   : > { %v2019_v21 = vor.u32 1.1754944e-38, %v2018_v3  ;;  %vm2017_vm1 = vcmp.eq.f32.partialorder %v2016_v1, 8.507059e+37 }
 0x7d7   : > { %v1995_v55 = vmul.f32 %v2792_v40, %v1994_v26 }
 0x7d9   : > { %v1996_v57 = vadd.f32 %v2792_v40, %v1995_v55 }
 0x7da   : > { %v2794_v51 = vpop.eup %2793 }
 0x7db   : > { %v2008_v62 = vmul.f32 %v2794_v51, %v1973_v22  ;;  %v2000_v17 = vsel %vm1999_vm11, %v2792_v40, %v1996_v57  ;;  %vm2013_vm13 = vweird.f32 %v2794_v51 }
 0x7dc   : > { %v2005_v42 = vsel %vm2002_vm12, %v2004_v0, %v2000_v17  ;;  %vm2014_vm15 = vmor %vm2012_vm14, %vm2013_vm13 }
 0x7dd   : > { %v2009_v63 = vsub.f32 1.0, %v2008_v62  ;;  %v2006_v5 = vmul.f32 %v3358_v15, %v2005_v42 }
 0x7df   : > { %v2010_v11 = vmul.f32 %v2794_v51, %v2009_v63  ;;  %v2112_v24 = vpack.c.bf16 %v2006_v5, %v2006_v5 }
 0x7e1   : > { %v2011_v16 = vadd.f32 %v2794_v51, %v2010_v11  ;;  %v2122_v10 = vunpack.c.l.b16 %v2112_v24 }
 0x7e3   : > { %v2015_v59 = vsel %vm2014_vm15, %v2794_v51, %v2011_v16 }
 0x7e4   : > { %v2020_v7 = vsel %vm2017_vm1, %v2019_v21, %v2015_v59 }
 0x7e5   : > { %v2021_v8 = vmul.f32 %v3362_v58, %v2020_v7 }
 0x7e7   : > { %v2113_v38 = vpack.c.bf16 %v2021_v8, %v2021_v8 }
 0x7e9   : > { %v2123_v19 = vunpack.c.l.b16 %v2113_v38 }
 0x7eb   : > { %v2126_v12 = vpop.permute.xlu1 %2125  ;;  %v2124_v13 = vpack.c.b16 %v2123_v19, %v2122_v10 }
 0x7ec   : > { %2138 = vmatpush.bf16.msrb.mxu0 %v2126_v12 }
 0x7ef   : > { %2574 = vmatmul.msk.bf16.vlgmr.msrb.gmra.mxu0 %vm505_vm3, %v2124_v13 }
 0x7f3   : > { %v2201_v14 = vpop.permute.xlu1 %2200 }
 0x7f4   : > { %2213 = vmatpush.bf16.msrb.mxu3 %v2201_v14 }
 0x7fb   : > { %v1275_v35 = vpop.permute.xlu1 %1274 }
 0x7fc   : > { %1298 = vst.msk [vmem:[#allocation3 + $0x4] sm:$0xf] %vm1296_vm4, %v1275_v35  ;;  %v1976_v15 = vpop.xlane.xlu2 %1975 }
 0x7fd   : > { %2795 = vrcp.f32 %v1976_v15  ;;  %v2033_v34 = vand.u32 2147483648, %v1976_v15  ;;  %vm2027_vm9 = vweird.f32 %v1976_v15  ;;  %v2031_v52 = vand.u32 2147483647, %v1976_v15 }
 0x7ff   : > { %v2034_v61 = vor.u32 1.1754944e-38, %v2033_v34  ;;  %vm2032_vm12 = vcmp.eq.f32.partialorder %v2031_v52, 8.507059e+37 }
 0x803   : > { %v2796_v28 = vpop.eup %2795  ;;  %v1757_v58 = vpop.permute.xlu1 %1756 }
 0x804   : > { %1780 = vst.msk [vmem:[#allocation3 + $0x4] sm:$0xf] %vm1778_vm5, %v1757_v58  ;;  %v1979_v23 = vpop.xlane.xlu0 %1978  ;;  %v2023_v32 = vmul.f32 %v2796_v28, %v1976_v15  ;;  %vm2028_vm7 = vweird.f32 %v2796_v28  ;;  %v2634_v15 = vld [vmem:[%s3552_s4] sm:$0xff] }
 0x805   : > { %2797 = vrcp.f32 %v1979_v23  ;;  %v2048_v18 = vand.u32 2147483648, %v1979_v23  ;;  %v2046_v50 = vand.u32 2147483647, %v1979_v23  ;;  %vm2042_vm8 = vweird.f32 %v1979_v23  ;;  %vm2029_vm10 = vmor %vm2027_vm9, %vm2028_vm7 }
 0x806   : > { %v2024_v41 = vsub.f32 1.0, %v2023_v32 }
 0x807   : > { %v2049_v54 = vor.u32 1.1754944e-38, %v2048_v18  ;;  %vm2047_vm11 = vcmp.eq.f32.partialorder %v2046_v50, 8.507059e+37 }
 0x808   : > { %v2025_v43 = vmul.f32 %v2796_v28, %v2024_v41 }
 0x80a   : > { %v2026_v39 = vadd.f32 %v2796_v28, %v2025_v43 }
 0x80b   : > { %v2798_v56 = vpop.eup %2797  ;;  %v1277_v33 = vpop.permute.xlu1 %1276 }
 0x80c   : > { %v2038_v9 = vmul.f32 %v2798_v56, %v1979_v23  ;;  %1299 = vst.msk [vmem:[#allocation3 + $0x8] sm:$0xf] %vm1296_vm4, %v1277_v33  ;;  %vm2043_vm6 = vweird.f32 %v2798_v56  ;;  %v2030_v40 = vsel %vm2029_vm10, %v2796_v28, %v2026_v39 }
 0x80d   : > { %vm2044_vm2 = vmor %vm2042_vm8, %vm2043_vm6  ;;  %v2035_v26 = vsel %vm2032_vm12, %v2034_v61, %v2030_v40 }
 0x80e   : > { %v2039_v45 = vsub.f32 1.0, %v2038_v9  ;;  %v2036_v57 = vmul.f32 %v3369_v6, %v2035_v26 }
 0x810   : > { %v2040_v46 = vmul.f32 %v2798_v56, %v2039_v45  ;;  %v2114_v62 = vpack.c.bf16 %v2036_v57, %v2036_v57 }
 0x812   : > { %v2041_v30 = vadd.f32 %v2798_v56, %v2040_v46  ;;  %v2147_v63 = vunpack.c.l.b16 %v2114_v62 }
 0x813   : > { %v3435_v37 = vpop.permute.xlu1 %1760 }
 0x814   : > { %v2045_v53 = vsel %vm2044_vm2, %v2798_v56, %v2041_v30 }
 0x815   : > { %v2050_v22 = vsel %vm2047_vm11, %v2049_v54, %v2045_v53 }
 0x816   : > { %v2051_v55 = vmul.f32 %v3376_v44, %v2050_v22 }
 0x818   : > { %v2115_v36 = vpack.c.bf16 %v2051_v55, %v2051_v55 }
 0x81a   : > { %v2148_v17 = vunpack.c.l.b16 %v2115_v36 }
 0x81b   : > { %v1982_v51 = vpop.xlane.xlu2 %1981  ;;  %v1281_v60 = vpop.permute.xlu1 %1280 }
 0x81c   : > { %1301 = vst.msk [vmem:[#allocation3 + $0x10] sm:$0xf] %vm1296_vm4, %v1281_v60  ;;  %2799 = vrcp.f32 %v1982_v51  ;;  %v2149_v42 = vpack.c.b16 %v2148_v17, %v2147_v63  ;;  %vm2057_vm14 = vweird.f32 %v1982_v51  ;;  %v2063_v35 = vand.u32 2147483648, %v1982_v51 }
 0x81d   : > { %v2061_v28 = vand.u32 2147483647, %v1982_v51 }
 0x81e   : > { %v2064_v9 = vor.u32 1.1754944e-38, %v2063_v35 }
 0x81f   : > { %vm2062_vm8 = vcmp.eq.f32.partialorder %v2061_v28, 8.507059e+37 }
 0x822   : > { %v2800_v11 = vpop.eup %2799 }
 0x823   : > { %v2151_v0 = vpop.permute.xlu2 %2150  ;;  %v3440_v3 = vpop.permute.xlu1 %1764  ;;  %v2053_v44 = vmul.f32 %v2800_v11, %v1982_v51  ;;  %vm2058_vm13 = vweird.f32 %v2800_v11 }
 0x824   : > { %v1988_v1 = vpop.xlane.xlu0 %1987  ;;  %2163 = vmatpush.bf16.msrb.mxu1 %v2151_v0  ;;  %vm3446_vm15 = vmor %vm2057_vm14, %vm2058_vm13 }
 0x825   : > { %2801 = vrcp.f32 %v1988_v1  ;;  %v2054_v16 = vsub.f32 1.0, %v2053_v44  ;;  %vm2087_vm7 = vweird.f32 %v1988_v1  ;;  %v2093_v43 = vand.u32 2147483648, %v1988_v1 }
 0x826   : > { %v2091_v46 = vand.u32 2147483647, %v1988_v1 }
 0x827   : > { %2575 = vmatmul.msk.bf16.vlgmr.msrb.gmra.mxu1 %vm505_vm3, %v2149_v42  ;;  %v2055_v8 = vmul.f32 %v2800_v11, %v2054_v16  ;;  %v2094_v54 = vor.u32 1.1754944e-38, %v2093_v43 }
 0x828   : > { %vm2092_vm12 = vcmp.eq.f32.partialorder %v2091_v46, 8.507059e+37 }
 0x829   : > { %v2056_v19 = vadd.f32 %v2800_v11, %v2055_v8 }
 0x82b   : > { %v2802_v6 = vpop.eup %2801  ;;  %v1273_v21 = vpop.permute.xlu2 %1272  ;;  %v2060_v23 = vsel %vm3446_vm15, %v2800_v11, %v2056_v19  ;;  %v1740_v19 = vpack.c.bf16 %v3334_v2, %v3334_v2  ;;  %v2635_v2 = vld [vmem:[%s3552_s4 + $0x8] sm:$0xff] }
 0x82c   : > { %v1285_v5 = vpop.permute.xlu1 %1284  ;;  %v2083_v59 = vmul.f32 %v2802_v6, %v1988_v1  ;;  %1297 = vst.msk [vmem:[#allocation3] sm:$0xf] %vm1296_vm4, %v1273_v21  ;;  %v1985_v7 = vpop.xlane.xlu0 %1984  ;;  %vm2088_vm1 = vweird.f32 %v2802_v6  ;;  %v2065_v50 = vsel %vm2062_vm8, %v2064_v9, %v2060_v23  ;;  %2335 = vmatpush.bf16.msra.mxu0 %v2635_v2  ;;  %v1263_v23 = vpack.c.bf16 %v3234_v27, %v3234_v27 }
 0x82d   : > { %1303 = vst.msk [vmem:[#allocation3 + $0x18] sm:$0xf] %vm1296_vm4, %v1285_v5  ;;  %2803 = vrcp.f32 %v1985_v7  ;;  %v2078_v32 = vand.u32 2147483648, %v1985_v7  ;;  %v2076_v33 = vand.u32 2147483647, %v1985_v7  ;;  %vm3452_vm9 = vmor %vm2087_vm7, %vm2088_vm1  ;;  %vm2072_vm2 = vweird.f32 %v1985_v7 }
 0x82e   : > { %v2084_v24 = vsub.f32 1.0, %v2083_v59  ;;  %v2066_v61 = vmul.f32 %v3389_v31, %v2065_v50 }
 0x82f   : > { %v2079_v34 = vor.u32 1.1754944e-38, %v2078_v32  ;;  %vm2077_vm11 = vcmp.eq.f32.partialorder %v2076_v33, 8.507059e+37  ;;  %v1744_v33 = vpack.c.bf16 %v3344_v29, %v3344_v29 }
 0x830   : > { %v2085_v12 = vmul.f32 %v2802_v6, %v2084_v24  ;;  %v2116_v62 = vpack.c.bf16 %v2066_v61, %v2066_v61  ;;  %2336 = vmatpush.bf16.msra.mxu0 %v2634_v15 }
 0x832   : > { %v2086_v41 = vadd.f32 %v2802_v6, %v2085_v12  ;;  %v2172_v42 = vunpack.c.l.b16 %v2116_v62 }
 0x833   : > { %v2804_v38 = vpop.eup %2803  ;;  %v1755_v10 = vpop.permute.xlu2 %1754 }
 0x834   : > { %v2068_v13 = vmul.f32 %v2804_v38, %v1985_v7  ;;  %1779 = vst.msk [vmem:[#allocation3] sm:$0xf] %vm1778_vm5, %v1755_v10  ;;  %v1991_v14 = vpop.xlane.xlu0 %1990  ;;  %vm2073_vm6 = vweird.f32 %v2804_v38  ;;  %v2090_v30 = vsel %vm3452_vm9, %v2802_v6, %v2086_v41  ;;  %v1769_v61 = vpop.permute.xlu1 %1768 }
 0x835   : > { %2805 = vrcp.f32 %v1991_v14  ;;  %vm2074_vm10 = vmor %vm2072_vm2, %vm2073_vm6  ;;  %v2095_v55 = vsel %vm2092_vm12, %v2094_v54, %v2090_v30  ;;  %v2108_v57 = vand.u32 2147483648, %v1991_v14  ;;  %v2106_v36 = vand.u32 2147483647, %v1991_v14 }
 0x836   : > { %v2069_v58 = vsub.f32 1.0, %v2068_v13  ;;  %v2096_v17 = vmul.f32 %v3397_v47, %v2095_v55  ;;  %vm2102_vm14 = vweird.f32 %v1991_v14  ;;  %v2678_v55 = vld [vmem:[%s3553_s5] ss:$0 sm:$0xff] }
 0x837   : > { %v2109_v0 = vor.u32 1.1754944e-38, %v2108_v57  ;;  %vm2107_vm1 = vcmp.eq.f32.partialorder %v2106_v36, 8.507059e+37 }
 0x838   : > { %v2070_v56 = vmul.f32 %v2804_v38, %v2069_v58 }
 0x83a   : > { %v2071_v18 = vadd.f32 %v2804_v38, %v2070_v56 }
 0x83b   : > { %v2806_v39 = vpop.eup %2805 }
 0x83c   : > { %v2075_v52 = vsel %vm2074_vm10, %v2804_v38, %v2071_v18  ;;  %v2098_v53 = vmul.f32 %v2806_v39, %v1991_v14  ;;  %vm2103_vm13 = vweird.f32 %v2806_v39  ;;  %v1261_v14 = vpack.c.bf16 %v3228_v20, %v3228_v20 }
 0x83d   : > { %v2080_v40 = vsel %vm2077_vm11, %v2079_v34, %v2075_v52  ;;  %vm2104_vm15 = vmor %vm2102_vm14, %vm2103_vm13 }
 0x83e   : > { %v2081_v22 = vmul.f32 %v3405_v49, %v2080_v40  ;;  %v2099_v26 = vsub.f32 1.0, %v2098_v53  ;;  %v2118_v49 = vpack.c.bf16 %v2096_v17, %v2096_v17 }
 0x840   : > { %v2117_v51 = vpack.c.bf16 %v2081_v22, %v2081_v22  ;;  %v2100_v60 = vmul.f32 %v2806_v39, %v2099_v26  ;;  %v2197_v5 = vunpack.c.l.b16 %v2118_v49 }
 0x842   : > { %v2101_v63 = vadd.f32 %v2806_v39, %v2100_v60  ;;  %v2173_v11 = vunpack.c.l.b16 %v2117_v51 }
 0x844   : > { %v2105_v1 = vsel %vm2104_vm15, %v2806_v39, %v2101_v63  ;;  %v2174_v21 = vpack.c.b16 %v2173_v11, %v2172_v42 }
 0x845   : > { %v2110_v31 = vsel %vm2107_vm1, %v2109_v0, %v2105_v1 }
 0x846   : > { %v2111_v44 = vmul.f32 %v3412_v48, %v2110_v31  ;;  %v2176_v6 = vpop.permute.xlu0 %2175  ;;  %v1259_v48 = vpack.c.bf16 %v3220_v4, %v3220_v4  ;;  %v1742_v4 = vpack.c.bf16 %v3340_v25, %v3340_v25 }
 0x847   : > { %2188 = vmatpush.bf16.msrb.mxu2 %v2176_v6 }
 0x848   : > { %v2119_v16 = vpack.c.bf16 %v2111_v44, %v2111_v44 }
 0x84a   : > { %v2198_v59 = vunpack.c.l.b16 %v2119_v16  ;;  %2576 = vmatmul.msk.bf16.vlgmr.msrb.gmra.mxu2 %vm505_vm3, %v2174_v21 }
 0x84c   : > { %v2199_v47 = vpack.c.b16 %v2198_v59, %v2197_v5 }
 0x84e   : > { %2577 = vmatmul.msk.bf16.vlgmr.msrb.gmra.mxu3 %vm505_vm3, %v2199_v47  ;;  %vm2260_vm3 = vcmask 257216  }
 0x86c   : > { %v2140_v7 = vpop.f32.mrf.mxu0 }
 0x86d   : > { %v2220_v8 = vpack.c.bf16 %v2140_v7, %v2140_v7 }
 0x86f   : > { %2236 = vrot.lane.b32.xlu0 %v2220_v8, %s2866_s9 }
 0x874   : > { %v2142_v24 = vpop.f32.mrf.mxu0 }
 0x875   : > { %v2221_v38 = vpack.c.bf16 %v2142_v24, %v2142_v24 }
 0x877   : > { %1278 = vrot.lane.b32.xlu0 %v1259_v48, %s2864_s29  ;;  %2238 = vrot.lane.b32.xlu2 %v2221_v38, %s2866_s9 }
 0x87f   : > { %1758 = vrot.lane.b32.xlu2 %v1740_v19, %s2865_s8 }
 0x8a4   : > { %v2165_v10 = vpop.f32.mrf.mxu1 }
 0x8a5   : > { %v2222_v12 = vpack.c.bf16 %v2165_v10, %v2165_v10 }
 0x8a7   : > { %2240 = vrot.lane.b32.xlu0 %v2222_v12, %s2866_s9 }
 0x8ac   : > { %v2167_v13 = vpop.f32.mrf.mxu1 }
 0x8ad   : > { %v2223_v35 = vpack.c.bf16 %v2167_v13, %v2167_v13 }
 0x8af   : > { %1282 = vrot.lane.b32.xlu0 %v1261_v14, %s2864_s29  ;;  %2242 = vrot.lane.b32.xlu2 %v2223_v35, %s2866_s9 }
 0x8b7   : > { %1762 = vrot.lane.b32.xlu2 %v1742_v4, %s2865_s8 }
 0x8cd   : > { %v2190_v20 = vpop.f32.mrf.mxu2 }
 0x8ce   : > { %v2224_v28 = vpack.c.bf16 %v2190_v20, %v2190_v20 }
 0x8d0   : > { %2244 = vrot.lane.b32.xlu0 %v2224_v28, %s2866_s9 }
 0x8d1   : > { %v2239_v58 = vpop.permute.xlu2 %2238  ;;  %v2215_v41 = vpop.f32.mrf.mxu3 }
 0x8d2   : > { %2262 = vst.msk [vmem:[#allocation3 + $0x4] sm:$0xf] %vm2260_vm3, %v2239_v58  ;;  %v2226_v9 = vpack.c.bf16 %v2215_v41, %v2215_v41 }
 0x8d5   : > { %v2192_v25 = vpop.f32.mrf.mxu2 }
 0x8d6   : > { %v2225_v32 = vpack.c.bf16 %v2192_v25, %v2192_v25 }
 0x8d8   : > { %1286 = vrot.lane.b32.xlu0 %v1263_v23, %s2864_s29  ;;  %2246 = vrot.lane.b32.xlu2 %v2225_v32, %s2866_s9 }
 0x8d9   : > { %v1759_v56 = vpop.permute.xlu2 %1758  ;;  %v2217_v27 = vpop.f32.mrf.mxu3 }
 0x8da   : > { %1781 = vst.msk [vmem:[#allocation3 + $0x8] sm:$0xf] %vm1778_vm5, %v1759_v56  ;;  %v2227_v45 = vpack.c.bf16 %v2217_v27, %v2217_v27 }
 0x8e0   : > { %2248 = vrot.lane.b32.xlu0 %v2226_v9, %s2866_s9  ;;  %1766 = vrot.lane.b32.xlu2 %v1744_v33, %s2865_s8 }
 0x8e1   : > { %v2237_v43 = vpop.permute.xlu0 %2236 }
 0x8e2   : > { %2261 = vst.msk [vmem:[#allocation3] sm:$0xf] %vm2260_vm3, %v2237_v43 }
 0x8e8   : > { %2250 = vrot.lane.b32.xlu2 %v2227_v45, %s2866_s9 }
 0x8e9   : > { %v1279_v46 = vpop.permute.xlu0 %1278  ;;  %v2630_v18 = vld [vmem:[#allocation3] sm:$0xff] }
 0x8ea   : > { %1300 = vst.msk [vmem:[#allocation3 + $0xc] sm:$0xf] %vm1296_vm4, %v1279_v46  ;;  %2602 = vmatmul.msk.bf16.vlgmr.msra.gmra.mxu0 %vm321_vm0, %v2630_v18 }
 0x8eb   : > { %1782 = vst.msk [vmem:[#allocation3 + $0xc] sm:$0xf] %vm1778_vm5, %v3435_v37 }
 0x909   : > { %v2243_v29 = vpop.permute.xlu2 %2242 }
 0x90a   : > { %2264 = vst.msk [vmem:[#allocation3 + $0xc] sm:$0xf] %vm2260_vm3, %v2243_v29 }
 0x911   : > { %v1763_v39 = vpop.permute.xlu2 %1762 }
 0x912   : > { %1783 = vst.msk [vmem:[#allocation3 + $0x10] sm:$0xf] %vm1778_vm5, %v1763_v39 }
 0x919   : > { %v2241_v50 = vpop.permute.xlu0 %2240 }
 0x91a   : > { %2263 = vst.msk [vmem:[#allocation3 + $0x8] sm:$0xf] %vm2260_vm3, %v2241_v50 }
 0x921   : > { %v1283_v34 = vpop.permute.xlu0 %1282  ;;  %v2631_v30 = vld [vmem:[#allocation3 + $0x8] sm:$0xff] }
 0x922   : > { %1302 = vst.msk [vmem:[#allocation3 + $0x14] sm:$0xf] %vm1296_vm4, %v1283_v34  ;;  %2603 = vmatmul.msk.bf16.gmra.mxu0 %vm321_vm0, %v2631_v30 }
 0x923   : > { %1784 = vst.msk [vmem:[#allocation3 + $0x14] sm:$0xf] %vm1778_vm5, %v3440_v3 }
 0x932   : > { %v2247_v37 = vpop.permute.xlu2 %2246 }
 0x933   : > { %2266 = vst.msk [vmem:[#allocation3 + $0x14] sm:$0xf] %vm2260_vm3, %v2247_v37 }
 0x93a   : > { %v1767_v52 = vpop.permute.xlu2 %1766 }
 0x93b   : > { %1785 = vst.msk [vmem:[#allocation3 + $0x18] sm:$0xf] %vm1778_vm5, %v1767_v52 }
 0x942   : > { %v2245_v53 = vpop.permute.xlu0 %2244  ;;  %v2251_v22 = vpop.permute.xlu2 %2250 }
 0x943   : > { %2265 = vst.msk [vmem:[#allocation3 + $0x10] sm:$0xf] %vm2260_vm3, %v2245_v53 }
 0x94a   : > { %v1287_v54 = vpop.permute.xlu0 %1286  ;;  %v2632_v40 = vld [vmem:[#allocation3 + $0x10] sm:$0xff] }
 0x94b   : > { %1304 = vst.msk [vmem:[#allocation3 + $0x1c] sm:$0xf] %vm1296_vm4, %v1287_v54  ;;  %2604 = vmatmul.msk.bf16.gmra.mxu0 %vm321_vm0, %v2632_v40  ;;  %vm2366_vm4 = vcmask 257024  }
 0x94c   : > { %1786 = vst.msk [vmem:[#allocation3 + $0x1c] sm:$0xf] %vm1778_vm5, %v1769_v61 }
 0x94d   : > { %2268 = vst.msk [vmem:[#allocation3 + $0x1c] sm:$0xf] %vm2260_vm3, %v2251_v22 }
 0x952   : > { %v2249_v3 = vpop.permute.xlu0 %2248 }
 0x953   : > { %2267 = vst.msk [vmem:[#allocation3 + $0x18] sm:$0xf] %vm2260_vm3, %v2249_v3 }
 0x95a   : > { %v2633_v26 = vld [vmem:[#allocation3 + $0x18] sm:$0xff] }
 0x95b   : > { %2605 = vmatmul.msk.bf16.gmra.mxu0 %vm321_vm0, %v2633_v26 }
 0x967   : > { %v2338_v57 = vpop.f32.mrf.mxu0 }
 0x968   : > { %v2339_v51 = vadd.f32 %v2678_v55, %v2338_v57 }
 0x96a   : > { %v2358_v60 = vpack.c.bf16 %v2339_v51, %v2339_v51 }
 0x96c   : > { %2367 = vst.msk [vmem:[%s3527_s18] sm:$0xf] %vm2366_vm4, %v2358_v60 }
 0x96f   : > { %v2340_v36 = vpop.f32.mrf.mxu0 }
 0x970   : > { %v2341_v62 = vadd.f32 %v2678_v55, %v2340_v36 }
 0x972   : > { %v2359_v17 = vpack.c.bf16 %v2341_v62, %v2341_v62 }
 0x974   : > { %2368 = vst.msk [vmem:[%s3527_s18 + $0x4] sm:$0xf] %vm2366_vm4, %v2359_v17 }
 0x99f   : > { %v2343_v63 = vpop.f32.mrf.mxu0 }
 0x9a0   : > { %v2344_v0 = vadd.f32 %v2678_v55, %v2343_v63 }
 0x9a2   : > { %v2360_v11 = vpack.c.bf16 %v2344_v0, %v2344_v0 }
 0x9a4   : > { %2369 = vst.msk [vmem:[%s3527_s18 + $0x8] sm:$0xf] %vm2366_vm4, %v2360_v11 }
 0x9a7   : > { %v2345_v1 = vpop.f32.mrf.mxu0 }
 0x9a8   : > { %v2346_v31 = vadd.f32 %v2678_v55, %v2345_v1 }
 0x9aa   : > { %v2361_v42 = vpack.c.bf16 %v2346_v31, %v2346_v31 }
 0x9ac   : > { %2370 = vst.msk [vmem:[%s3527_s18 + $0xc] sm:$0xf] %vm2366_vm4, %v2361_v42 }
 0x9c8   : > { %v2348_v49 = vpop.f32.mrf.mxu0 }
 0x9c9   : > { %v2349_v44 = vadd.f32 %v2678_v55, %v2348_v49 }
 0x9cb   : > { %v2362_v6 = vpack.c.bf16 %v2349_v44, %v2349_v44 }
 0x9cd   : > { %2371 = vst.msk [vmem:[%s3527_s18 + $0x10] sm:$0xf] %vm2366_vm4, %v2362_v6 }
 0x9d0   : > { %v2350_v16 = vpop.f32.mrf.mxu0 }
 0x9d1   : > { %v2351_v21 = vadd.f32 %v2678_v55, %v2350_v16 }
 0x9d3   : > { %v2363_v5 = vpack.c.bf16 %v2351_v21, %v2351_v21 }
 0x9d5   : > { %2372 = vst.msk [vmem:[%s3527_s18 + $0x14] sm:$0xf] %vm2366_vm4, %v2363_v5 }
 0x9d8   : > { %v2353_v59 = vpop.f32.mrf.mxu0 }
 0x9d9   : > { %v2354_v47 = vadd.f32 %v2678_v55, %v2353_v59 }
 0x9db   : > { %v2364_v7 = vpack.c.bf16 %v2354_v47, %v2354_v47 }
 0x9dd   : > { %2373 = vst.msk [vmem:[%s3527_s18 + $0x18] sm:$0xf] %vm2366_vm4, %v2364_v7 }
 0x9e0   : > { %v2355_v8 = vpop.f32.mrf.mxu0 }
 0x9e1   : > { %v2356_v24 = vadd.f32 %v2678_v55, %v2355_v8 }
 0x9e3   : > { %v2365_v48 = vpack.c.bf16 %v2356_v24, %v2356_v24 }
 0x9e5   : > { %2374 = vst.msk [vmem:[%s3527_s18 + $0x1c] sm:$0xf] %vm2366_vm4, %v2365_v48 }
 0x9e6 PF: > { %s17_s21 = sadd.s32 1, %s2848_s21  }
 0x9e7   : > { %p14_p7 = scmp.ge.s32.totalorder %s17_s21, 4  }
 0x9e9   :  { %16 = sbr.rel (!%p14_p7) target bundleno = 1 (0x1), region = 82 }
 0x9ee   :  { %2397 = vsyncpa [#allocation5], 1 }
 0x9ef   :  { %2399 = vsyncpa [#allocation5 + $0x1], 1 }

</bundles_post_ra>
